<compile_context>
chip_gen: v5e
topology: v5e:2x2
jax: 0.10.0
libtpu: 0.0.40
codegen_flags: <defaults>
</compile_context>

<pallas_src>
import jax
import jax.numpy as jnp
from jax.experimental import pallas as pl
from jax.experimental.pallas import tpu as pltpu

_EPS = 1e-5
_VMEM_LIMIT = 64 * 1024 * 1024


def _round_up(n, m):
    return ((n + m - 1) // m) * m


# ---------------------------------------------------------------------------
# Kernel A: conv1a(3x3) + conv1b(1x1) + max-pools + concat  ->  (TB, 64) "cat"
# ---------------------------------------------------------------------------
def _features_kernel(x_ref, w1a_ref, w1b_ref, bcat_ref, cat_ref):
    """x_ref: (25, TB, C) position-major, channels last.
    w1a_ref: (9, C, 64) per-tap weights, real outputs in lanes 0..31 (rest zero).
    w1b_ref: (C, 64), real outputs in lanes 32..63 (rest zero).
    bcat_ref: (1, 64) = [b1a | b1b]."""
    f32 = jnp.float32

    # conv1a: in-kernel im2col as a sum of 9 tap matmuls per 3x3 output position;
    # MaxPool2d(3) over the 3x3 map is a running elementwise max over positions.
    m1 = None
    for oh in range(3):
        for ow in range(3):
            acc = None
            for kh in range(3):
                for kw in range(3):
                    p = (oh + kh) * 5 + (ow + kw)
                    t = kh * 3 + kw
                    c = jnp.dot(x_ref[p], w1a_ref[t], preferred_element_type=f32)
                    acc = c if acc is None else acc + c
            m1 = acc if m1 is None else jnp.maximum(m1, acc)   # (TB, 64); lanes 32..63 == 0

    # conv1b: 1x1 conv at each of the 25 positions; MaxPool2d(5) = running max.
    m2 = None
    for p in range(25):
        v = jnp.dot(x_ref[p], w1b_ref[...], preferred_element_type=f32)
        m2 = v if m2 is None else jnp.maximum(m2, v)           # (TB, 64); lanes 0..31 == 0

    # torch.cat((maxp1, maxp2), dim=1): complementary zero lanes -> plain add.
    # Per-channel conv biases commute with the max, so they are added once here.
    cat_ref[...] = m1 + m2 + bcat_ref[...]


# ---------------------------------------------------------------------------
# Kernel B: BN -> ReLU -> conv2a -> ReLU -> conv2b -> +residual -> [feat | fc]
# ---------------------------------------------------------------------------
def _head_kernel(cat_ref, mean_ref, var_ref, gamma_ref, beta_ref,
                 w2a_ref, b2a_ref, w2b_ref, b2b_ref, wout_ref, bout_ref, out_ref):
    f32 = jnp.float32
    cat = cat_ref[...]                                              # (TB, 64)
    # BatchNorm2d(64), training-mode full-batch statistics (reduced outside).
    bn = (cat - mean_ref[...]) * jax.lax.rsqrt(var_ref[...] + _EPS)
    bn = bn * gamma_ref[...] + beta_ref[...]
    r1 = jnp.maximum(bn, 0.0)
    c2a = jnp.dot(r1, w2a_ref[...], preferred_element_type=f32) + b2a_ref[...]
    r2 = jnp.maximum(c2a, 0.0)
    c2b = jnp.dot(r2, w2b_ref[...], preferred_element_type=f32) + b2b_ref[...]
    feat = cat + c2b                                                # residual, (TB, 64)
    # Lane-dense (TB, 128) store: wout = [I_64 | fc column @ lane 64 | zeros].
    out_ref[...] = jnp.dot(feat, wout_ref[...], preferred_element_type=f32) + bout_ref[...]


def wcrn_forward(x, params, *, block_b=256):
    """x: (B, bands, 5, 5) float32 NCHW.  Returns (out (B, 1), features (B, 64))."""
    assert block_b % 8 == 0
    B, C, H, W = x.shape
    assert (H, W) == (5, 5), "WCRN concat constraint requires 5x5 spatial patches"

    # ---- layout glue (no HBM data amplification) ---------------------------
    x_pos = jnp.transpose(x, (2, 3, 0, 1)).reshape(H * W, B, C)     # (25, B, C)
    TB = min(block_b, _round_up(B, 8))                              # batch tile
    B_pad = _round_up(B, TB)
    if B_pad != B:
        x_pos = jnp.pad(x_pos, ((0, 0), (0, B_pad - B), (0, 0)))
    grid = (B_pad // TB,)

    # conv weights: channels-last, zero-padded into complementary 64-lane halves.
    w1a_taps = jnp.transpose(params["w1a"], (2, 3, 1, 0)).reshape(9, C, 32)
    w1a_taps = jnp.pad(w1a_taps, ((0, 0), (0, 0), (0, 32)))             # lanes 0..31
    w1b = jnp.pad(params["w1b"].reshape(32, C).T, ((0, 0), (32, 0)))    # lanes 32..63
    b_cat = jnp.concatenate([params["b1a"], params["b1b"]]).reshape(1, 64)

    gamma = params["gamma"].reshape(1, 64)
    beta = params["beta"].reshape(1, 64)
    w2a = params["w2a"].reshape(64, 64).T
    b2a = params["b2a"].reshape(1, 64)
    w2b = params["w2b"].reshape(64, 64).T
    b2b = params["b2b"].reshape(1, 64)
    # fused [features | fc] projection -> single unmasked 128-lane output store.
    w_out = (jnp.zeros((64, 128), jnp.float32)
             .at[:, :64].set(jnp.eye(64, dtype=jnp.float32))
             .at[:, 64].set(params["wfc"][0]))
    b_out = jnp.zeros((1, 128), jnp.float32).at[0, 64].set(params["bfc"][0])

    cparams = pltpu.CompilerParams(dimension_semantics=("parallel",),
                                   vmem_limit_bytes=_VMEM_LIMIT)
    const = lambda *shape: pl.BlockSpec(shape, lambda i: (0,) * len(shape))

    # ---- kernel A: convs + pools + concat ----------------------------------
    cat_full = pl.pallas_call(
        _features_kernel,
        out_shape=jax.ShapeDtypeStruct((B_pad, 64), jnp.float32),
        grid=grid,
        in_specs=[
            pl.BlockSpec((H * W, TB, C), lambda i: (0, i, 0)),
            const(9, C, 64),
            const(C, 64),
            const(1, 64),
        ],
        out_specs=pl.BlockSpec((TB, 64), lambda i: (i, 0)),
        compiler_params=cparams,
    )(x_pos, w1a_taps, w1b, b_cat)

    # ---- full-batch BN statistics (training mode, biased variance) ---------
    cat = cat_full[:B]
    mean = jnp.mean(cat, axis=0, keepdims=True)
    var = jnp.mean(jnp.square(cat - mean), axis=0, keepdims=True)

    # ---- kernel B: BN -> ReLU -> conv2a -> ReLU -> conv2b -> +res -> fc ----
    out_full = pl.pallas_call(
        _head_kernel,
        out_shape=jax.ShapeDtypeStruct((B_pad, 128), jnp.float32),
        grid=grid,
        in_specs=[
            pl.BlockSpec((TB, 64), lambda i: (i, 0)),
            const(1, 64), const(1, 64), const(1, 64), const(1, 64),
            const(64, 64), const(1, 64), const(64, 64), const(1, 64),
            const(64, 128), const(1, 128),
        ],
        out_specs=pl.BlockSpec((TB, 128), lambda i: (i, 0)),
        compiler_params=cparams,
    )(cat_full, mean, var, gamma, beta, w2a, b2a, w2b, b2b, w_out, b_out)

    return out_full[:B, 64:65], out_full[:B, :64]


# --------------------------- pure-JAX reference -----------------------------
def _reference_forward(x, params):
    dn = ("NCHW", "OIHW", "NCHW")
    c1a = jax.lax.conv_general_dilated(x, params["w1a"], (1, 1), "VALID",
                                       dimension_numbers=dn)
    c1a = c1a + params["b1a"].reshape(1, -1, 1, 1)
    c1b = jax.lax.conv_general_dilated(x, params["w1b"], (1, 1), "VALID",
                                       dimension_numbers=dn)
    c1b = c1b + params["b1b"].reshape(1, -1, 1, 1)
    m1 = jnp.max(c1a, axis=(2, 3))
    m2 = jnp.max(c1b, axis=(2, 3))
    cat = jnp.concatenate([m1, m2], axis=1)
    mean = jnp.mean(cat, axis=0, keepdims=True)
    var = jnp.mean((cat - mean) ** 2, axis=0, keepdims=True)
    bn = (cat - mean) * jax.lax.rsqrt(var + _EPS) * params["gamma"] + params["beta"]
    r1 = jnp.maximum(bn, 0.0)
    c2a = r1 @ params["w2a"].reshape(64, 64).T + params["b2a"]
    r2 = jnp.maximum(c2a, 0.0)
    c2b = r2 @ params["w2b"].reshape(64, 64).T + params["b2b"]
    feat = cat + c2b
    out = feat @ params["wfc"].T + params["bfc"]
    return out, feat


def init_params(key, bands=13):
    ks = jax.random.split(key, 10)

    def w(k, shape, fan_in):
        return jax.random.normal(k, shape, jnp.float32) / jnp.sqrt(jnp.float32(fan_in))

    return dict(
        w1a=w(ks[0], (32, bands, 3, 3), bands * 9),
        b1a=w(ks[1], (32,), bands * 9),
        w1b=w(ks[2], (32, bands, 1, 1), bands),
        b1b=w(ks[3], (32,), bands),
        gamma=jnp.ones((64,), jnp.float32),
        beta=jnp.zeros((64,), jnp.float32),
        w2a=w(ks[4], (64, 64, 1, 1), 64),
        b2a=w(ks[5], (64,), 64),
        w2b=w(ks[6], (64, 64, 1, 1), 64),
        b2b=w(ks[7], (64,), 64),
        wfc=w(ks[8], (1, 64), 64),
        bfc=w(ks[9], (1,), 64),
    )


if __name__ == "__main__":
    key = jax.random.PRNGKey(0)
    kx, kp, kx2 = jax.random.split(key, 3)
    bands, batch = 13, 4
    x = jax.random.normal(kx, (batch, bands, 5, 5), jnp.float32)
    params = init_params(kp, bands)

    out, feat = jax.jit(wcrn_forward)(x, params)
    jax.block_until_ready((out, feat))
    assert out.shape == (batch, 1) and feat.shape == (batch, 64)

    ref_out, ref_feat = _reference_forward(x, params)
    assert jnp.allclose(out, ref_out, rtol=1e-3, atol=1e-3)
    assert jnp.allclose(feat, ref_feat, rtol=1e-3, atol=1e-3)

    # exercise the multi-tile grid path (padded batch, several 'parallel' steps).
    x2 = jax.random.normal(kx2, (20, bands, 5, 5), jnp.float32)
    out2, feat2 = wcrn_forward(x2, params, block_b=8)
    jax.block_until_ready((out2, feat2))
    ref_out2, ref_feat2 = _reference_forward(x2, params)
    assert jnp.allclose(out2, ref_out2, rtol=1e-3, atol=1e-3)
    assert jnp.allclose(feat2, ref_feat2, rtol=1e-3, atol=1e-3)

    print("KERNEL_OK")
</pallas_src>

<mosaic_0001>
module attributes {stable_mosaic.version = 11 : i64} {
  func.func @_head_kernel(%arg0: i32, %arg1: memref<8x64xf32, #tpu.memory_space<vmem>>, %arg2: memref<1x64xf32, #tpu.memory_space<vmem>>, %arg3: memref<1x64xf32, #tpu.memory_space<vmem>>, %arg4: memref<1x64xf32, #tpu.memory_space<vmem>>, %arg5: memref<1x64xf32, #tpu.memory_space<vmem>>, %arg6: memref<64x64xf32, #tpu.memory_space<vmem>>, %arg7: memref<1x64xf32, #tpu.memory_space<vmem>>, %arg8: memref<64x64xf32, #tpu.memory_space<vmem>>, %arg9: memref<1x64xf32, #tpu.memory_space<vmem>>, %arg10: memref<64x128xf32, #tpu.memory_space<vmem>>, %arg11: memref<1x128xf32, #tpu.memory_space<vmem>>, %arg12: memref<8x128xf32, #tpu.memory_space<vmem>>) attributes {dimension_semantics = [#tpu.dimension_semantics<parallel>], iteration_bounds = array<i64: 1>, scalar_prefetch = 0 : i64, scratch_operands = 0 : i64, tpu.core_type = #tpu.core_type<tc>, window_params = [{transform_indices = @transform_0, window_bounds = array<i64: 8, 64>}, {pipeline_mode = #tpu.pipeline_mode<synchronous>, transform_indices = @transform_1, window_bounds = array<i64: 1, 64>}, {pipeline_mode = #tpu.pipeline_mode<synchronous>, transform_indices = @transform_2, window_bounds = array<i64: 1, 64>}, {pipeline_mode = #tpu.pipeline_mode<synchronous>, transform_indices = @transform_3, window_bounds = array<i64: 1, 64>}, {pipeline_mode = #tpu.pipeline_mode<synchronous>, transform_indices = @transform_4, window_bounds = array<i64: 1, 64>}, {pipeline_mode = #tpu.pipeline_mode<synchronous>, transform_indices = @transform_5, window_bounds = array<i64: 64, 64>}, {pipeline_mode = #tpu.pipeline_mode<synchronous>, transform_indices = @transform_6, window_bounds = array<i64: 1, 64>}, {pipeline_mode = #tpu.pipeline_mode<synchronous>, transform_indices = @transform_7, window_bounds = array<i64: 64, 64>}, {pipeline_mode = #tpu.pipeline_mode<synchronous>, transform_indices = @transform_8, window_bounds = array<i64: 1, 64>}, {pipeline_mode = #tpu.pipeline_mode<synchronous>, transform_indices = @transform_9, window_bounds = array<i64: 64, 128>}, {pipeline_mode = #tpu.pipeline_mode<synchronous>, transform_indices = @transform_10, window_bounds = array<i64: 1, 128>}, {transform_indices = @transform_11, window_bounds = array<i64: 8, 128>}]} {
    %c0 = arith.constant 0 : index
    %c0_0 = arith.constant 0 : index
    %0 = vector.load %arg1[%c0, %c0_0] : memref<8x64xf32, #tpu.memory_space<vmem>>, vector<8x64xf32>
    %c0_1 = arith.constant 0 : index
    %c0_2 = arith.constant 0 : index
    %1 = vector.load %arg2[%c0_1, %c0_2] : memref<1x64xf32, #tpu.memory_space<vmem>>, vector<1x64xf32>
    %2 = vector.broadcast %1 : vector<1x64xf32> to vector<8x64xf32>
    %3 = arith.subf %0, %2 : vector<8x64xf32>
    %c0_3 = arith.constant 0 : index
    %c0_4 = arith.constant 0 : index
    %4 = vector.load %arg3[%c0_3, %c0_4] : memref<1x64xf32, #tpu.memory_space<vmem>>, vector<1x64xf32>
    %cst = arith.constant 9.99999974E-6 : f32
    %5 = vector.broadcast %cst : f32 to vector<1x64xf32>
    %6 = arith.addf %4, %5 : vector<1x64xf32>
    %7 = math.rsqrt %6 : vector<1x64xf32>
    %8 = vector.broadcast %7 : vector<1x64xf32> to vector<8x64xf32>
    %9 = arith.mulf %3, %8 : vector<8x64xf32>
    %c0_5 = arith.constant 0 : index
    %c0_6 = arith.constant 0 : index
    %10 = vector.load %arg4[%c0_5, %c0_6] : memref<1x64xf32, #tpu.memory_space<vmem>>, vector<1x64xf32>
    %11 = vector.broadcast %10 : vector<1x64xf32> to vector<8x64xf32>
    %12 = arith.mulf %9, %11 : vector<8x64xf32>
    %c0_7 = arith.constant 0 : index
    %c0_8 = arith.constant 0 : index
    %13 = vector.load %arg5[%c0_7, %c0_8] : memref<1x64xf32, #tpu.memory_space<vmem>>, vector<1x64xf32>
    %14 = vector.broadcast %13 : vector<1x64xf32> to vector<8x64xf32>
    %15 = arith.addf %12, %14 : vector<8x64xf32>
    %cst_9 = arith.constant 0.000000e+00 : f32
    %16 = vector.broadcast %cst_9 : f32 to vector<8x64xf32>
    %17 = arith.maximumf %15, %16 : vector<8x64xf32>
    %c0_10 = arith.constant 0 : index
    %c0_11 = arith.constant 0 : index
    %18 = vector.load %arg6[%c0_10, %c0_11] : memref<64x64xf32, #tpu.memory_space<vmem>>, vector<64x64xf32>
    %cst_12 = arith.constant dense<0.000000e+00> : vector<8x64xf32>
    %19 = tpu.matmul %17, %18, %cst_12 {dimension_numbers = #tpu.dot_dimension_numbers<[1], [0], [0], [1], [0, 0, 1, 1], [], []>} : vector<8x64xf32>, vector<64x64xf32>, vector<8x64xf32> -> vector<8x64xf32>
    %c0_13 = arith.constant 0 : index
    %c0_14 = arith.constant 0 : index
    %20 = vector.load %arg7[%c0_13, %c0_14] : memref<1x64xf32, #tpu.memory_space<vmem>>, vector<1x64xf32>
    %21 = vector.broadcast %20 : vector<1x64xf32> to vector<8x64xf32>
    %22 = arith.addf %19, %21 : vector<8x64xf32>
    %cst_15 = arith.constant 0.000000e+00 : f32
    %23 = vector.broadcast %cst_15 : f32 to vector<8x64xf32>
    %24 = arith.maximumf %22, %23 : vector<8x64xf32>
    %c0_16 = arith.constant 0 : index
    %c0_17 = arith.constant 0 : index
    %25 = vector.load %arg8[%c0_16, %c0_17] : memref<64x64xf32, #tpu.memory_space<vmem>>, vector<64x64xf32>
    %cst_18 = arith.constant dense<0.000000e+00> : vector<8x64xf32>
    %26 = tpu.matmul %24, %25, %cst_18 {dimension_numbers = #tpu.dot_dimension_numbers<[1], [0], [0], [1], [0, 0, 1, 1], [], []>} : vector<8x64xf32>, vector<64x64xf32>, vector<8x64xf32> -> vector<8x64xf32>
    %c0_19 = arith.constant 0 : index
    %c0_20 = arith.constant 0 : index
    %27 = vector.load %arg9[%c0_19, %c0_20] : memref<1x64xf32, #tpu.memory_space<vmem>>, vector<1x64xf32>
    %28 = vector.broadcast %27 : vector<1x64xf32> to vector<8x64xf32>
    %29 = arith.addf %26, %28 : vector<8x64xf32>
    %30 = arith.addf %0, %29 : vector<8x64xf32>
    %c0_21 = arith.constant 0 : index
    %c0_22 = arith.constant 0 : index
    %31 = vector.load %arg10[%c0_21, %c0_22] : memref<64x128xf32, #tpu.memory_space<vmem>>, vector<64x128xf32>
    %cst_23 = arith.constant dense<0.000000e+00> : vector<8x128xf32>
    %32 = tpu.matmul %30, %31, %cst_23 {dimension_numbers = #tpu.dot_dimension_numbers<[1], [0], [0], [1], [0, 0, 1, 1], [], []>} : vector<8x64xf32>, vector<64x128xf32>, vector<8x128xf32> -> vector<8x128xf32>
    %c0_24 = arith.constant 0 : index
    %c0_25 = arith.constant 0 : index
    %33 = vector.load %arg11[%c0_24, %c0_25] : memref<1x128xf32, #tpu.memory_space<vmem>>, vector<1x128xf32>
    %34 = vector.broadcast %33 : vector<1x128xf32> to vector<8x128xf32>
    %35 = arith.addf %32, %34 : vector<8x128xf32>
    %c0_26 = arith.constant 0 : index
    %c0_27 = arith.constant 0 : index
    %36 = vector.load %arg12[%c0_26, %c0_27] : memref<8x128xf32, #tpu.memory_space<vmem>>, vector<8x128xf32>
    tpu.vector_store %arg12[%c0_26, %c0_27], %35 {strides = array<i32>} : memref<8x128xf32, #tpu.memory_space<vmem>>, vector<8x128xf32>,
    return
  }
  func.func @transform_0(%arg0: i32) -> (i32, i32) {
    %c0_i32 = arith.constant 0 : i32
    %c0_i32_0 = arith.constant 0 : i32
    return %arg0, %c0_i32 : i32, i32
  }
  func.func @transform_1(%arg0: i32) -> (i32, i32) {
    %c0_i32 = arith.constant 0 : i32
    %c0_i32_0 = arith.constant 0 : i32
    %c0_i32_1 = arith.constant 0 : i32
    return %c0_i32, %c0_i32_0 : i32, i32
  }
  func.func @transform_2(%arg0: i32) -> (i32, i32) {
    %c0_i32 = arith.constant 0 : i32
    %c0_i32_0 = arith.constant 0 : i32
    %c0_i32_1 = arith.constant 0 : i32
    return %c0_i32, %c0_i32_0 : i32, i32
  }
  func.func @transform_3(%arg0: i32) -> (i32, i32) {
    %c0_i32 = arith.constant 0 : i32
    %c0_i32_0 = arith.constant 0 : i32
    %c0_i32_1 = arith.constant 0 : i32
    return %c0_i32, %c0_i32_0 : i32, i32
  }
  func.func @transform_4(%arg0: i32) -> (i32, i32) {
    %c0_i32 = arith.constant 0 : i32
    %c0_i32_0 = arith.constant 0 : i32
    %c0_i32_1 = arith.constant 0 : i32
    return %c0_i32, %c0_i32_0 : i32, i32
  }
  func.func @transform_5(%arg0: i32) -> (i32, i32) {
    %c0_i32 = arith.constant 0 : i32
    %c0_i32_0 = arith.constant 0 : i32
    %c0_i32_1 = arith.constant 0 : i32
    return %c0_i32, %c0_i32_0 : i32, i32
  }
  func.func @transform_6(%arg0: i32) -> (i32, i32) {
    %c0_i32 = arith.constant 0 : i32
    %c0_i32_0 = arith.constant 0 : i32
    %c0_i32_1 = arith.constant 0 : i32
    return %c0_i32, %c0_i32_0 : i32, i32
  }
  func.func @transform_7(%arg0: i32) -> (i32, i32) {
    %c0_i32 = arith.constant 0 : i32
    %c0_i32_0 = arith.constant 0 : i32
    %c0_i32_1 = arith.constant 0 : i32
    return %c0_i32, %c0_i32_0 : i32, i32
  }
  func.func @transform_8(%arg0: i32) -> (i32, i32) {
    %c0_i32 = arith.constant 0 : i32
    %c0_i32_0 = arith.constant 0 : i32
    %c0_i32_1 = arith.constant 0 : i32
    return %c0_i32, %c0_i32_0 : i32, i32
  }
  func.func @transform_9(%arg0: i32) -> (i32, i32) {
    %c0_i32 = arith.constant 0 : i32
    %c0_i32_0 = arith.constant 0 : i32
    %c0_i32_1 = arith.constant 0 : i32
    return %c0_i32, %c0_i32_0 : i32, i32
  }
  func.func @transform_10(%arg0: i32) -> (i32, i32) {
    %c0_i32 = arith.constant 0 : i32
    %c0_i32_0 = arith.constant 0 : i32
    %c0_i32_1 = arith.constant 0 : i32
    return %c0_i32, %c0_i32_0 : i32, i32
  }
  func.func @transform_11(%arg0: i32) -> (i32, i32) {
    %c0_i32 = arith.constant 0 : i32
    %c0_i32_0 = arith.constant 0 : i32
    return %arg0, %c0_i32 : i32, i32
  }
}

module attributes {stable_mosaic.version = 11 : i64} {
  func.func @_features_kernel(%arg0: i32, %arg1: memref<25x8x13xf32, #tpu.memory_space<vmem>>, %arg2: memref<9x13x64xf32, #tpu.memory_space<vmem>>, %arg3: memref<13x64xf32, #tpu.memory_space<vmem>>, %arg4: memref<1x64xf32, #tpu.memory_space<vmem>>, %arg5: memref<8x64xf32, #tpu.memory_space<vmem>>) attributes {dimension_semantics = [#tpu.dimension_semantics<parallel>], iteration_bounds = array<i64: 1>, scalar_prefetch = 0 : i64, scratch_operands = 0 : i64, tpu.core_type = #tpu.core_type<tc>, window_params = [{transform_indices = @transform_0, window_bounds = array<i64: 25, 8, 13>}, {pipeline_mode = #tpu.pipeline_mode<synchronous>, transform_indices = @transform_1, window_bounds = array<i64: 9, 13, 64>}, {pipeline_mode = #tpu.pipeline_mode<synchronous>, transform_indices = @transform_2, window_bounds = array<i64: 13, 64>}, {pipeline_mode = #tpu.pipeline_mode<synchronous>, transform_indices = @transform_3, window_bounds = array<i64: 1, 64>}, {transform_indices = @transform_4, window_bounds = array<i64: 8, 64>}]} {
    %c0 = arith.constant 0 : index
    %c0_0 = arith.constant 0 : index
    %c0_1 = arith.constant 0 : index
    %0 = vector.load %arg1[%c0, %c0_0, %c0_1] : memref<25x8x13xf32, #tpu.memory_space<vmem>>, vector<1x8x13xf32>
    %1 = vector.shape_cast %0 : vector<1x8x13xf32> to vector<8x13xf32>
    %c0_2 = arith.constant 0 : index
    %c0_3 = arith.constant 0 : index
    %c0_4 = arith.constant 0 : index
    %2 = vector.load %arg2[%c0_2, %c0_3, %c0_4] : memref<9x13x64xf32, #tpu.memory_space<vmem>>, vector<1x13x64xf32>
    %3 = vector.shape_cast %2 : vector<1x13x64xf32> to vector<13x64xf32>
    %cst = arith.constant dense<0.000000e+00> : vector<8x64xf32>
    %4 = tpu.matmul %1, %3, %cst {dimension_numbers = #tpu.dot_dimension_numbers<[1], [0], [0], [1], [0, 0, 1, 1], [], []>} : vector<8x13xf32>, vector<13x64xf32>, vector<8x64xf32> -> vector<8x64xf32>
    %c1 = arith.constant 1 : index
    %c0_5 = arith.constant 0 : index
    %c0_6 = arith.constant 0 : index
    %5 = vector.load %arg1[%c1, %c0_5, %c0_6] : memref<25x8x13xf32, #tpu.memory_space<vmem>>, vector<1x8x13xf32>
    %6 = vector.shape_cast %5 : vector<1x8x13xf32> to vector<8x13xf32>
    %c1_7 = arith.constant 1 : index
    %c0_8 = arith.constant 0 : index
    %c0_9 = arith.constant 0 : index
    %7 = vector.load %arg2[%c1_7, %c0_8, %c0_9] : memref<9x13x64xf32, #tpu.memory_space<vmem>>, vector<1x13x64xf32>
    %8 = vector.shape_cast %7 : vector<1x13x64xf32> to vector<13x64xf32>
    %cst_10 = arith.constant dense<0.000000e+00> : vector<8x64xf32>
    %9 = tpu.matmul %6, %8, %cst_10 {dimension_numbers = #tpu.dot_dimension_numbers<[1], [0], [0], [1], [0, 0, 1, 1], [], []>} : vector<8x13xf32>, vector<13x64xf32>, vector<8x64xf32> -> vector<8x64xf32>
    %10 = arith.addf %4, %9 : vector<8x64xf32>
    %c2 = arith.constant 2 : index
    %c0_11 = arith.constant 0 : index
    %c0_12 = arith.constant 0 : index
    %11 = vector.load %arg1[%c2, %c0_11, %c0_12] : memref<25x8x13xf32, #tpu.memory_space<vmem>>, vector<1x8x13xf32>
    %12 = vector.shape_cast %11 : vector<1x8x13xf32> to vector<8x13xf32>
    %c2_13 = arith.constant 2 : index
    %c0_14 = arith.constant 0 : index
    %c0_15 = arith.constant 0 : index
    %13 = vector.load %arg2[%c2_13, %c0_14, %c0_15] : memref<9x13x64xf32, #tpu.memory_space<vmem>>, vector<1x13x64xf32>
    %14 = vector.shape_cast %13 : vector<1x13x64xf32> to vector<13x64xf32>
    %cst_16 = arith.constant dense<0.000000e+00> : vector<8x64xf32>
    %15 = tpu.matmul %12, %14, %cst_16 {dimension_numbers = #tpu.dot_dimension_numbers<[1], [0], [0], [1], [0, 0, 1, 1], [], []>} : vector<8x13xf32>, vector<13x64xf32>, vector<8x64xf32> -> vector<8x64xf32>
    %16 = arith.addf %10, %15 : vector<8x64xf32>
    %c5 = arith.constant 5 : index
    %c0_17 = arith.constant 0 : index
    %c0_18 = arith.constant 0 : index
    %17 = vector.load %arg1[%c5, %c0_17, %c0_18] : memref<25x8x13xf32, #tpu.memory_space<vmem>>, vector<1x8x13xf32>
    %18 = vector.shape_cast %17 : vector<1x8x13xf32> to vector<8x13xf32>
    %c3 = arith.constant 3 : index
    %c0_19 = arith.constant 0 : index
    %c0_20 = arith.constant 0 : index
    %19 = vector.load %arg2[%c3, %c0_19, %c0_20] : memref<9x13x64xf32, #tpu.memory_space<vmem>>, vector<1x13x64xf32>
    %20 = vector.shape_cast %19 : vector<1x13x64xf32> to vector<13x64xf32>
    %cst_21 = arith.constant dense<0.000000e+00> : vector<8x64xf32>
    %21 = tpu.matmul %18, %20, %cst_21 {dimension_numbers = #tpu.dot_dimension_numbers<[1], [0], [0], [1], [0, 0, 1, 1], [], []>} : vector<8x13xf32>, vector<13x64xf32>, vector<8x64xf32> -> vector<8x64xf32>
    %22 = arith.addf %16, %21 : vector<8x64xf32>
    %c6 = arith.constant 6 : index
    %c0_22 = arith.constant 0 : index
    %c0_23 = arith.constant 0 : index
    %23 = vector.load %arg1[%c6, %c0_22, %c0_23] : memref<25x8x13xf32, #tpu.memory_space<vmem>>, vector<1x8x13xf32>
    %24 = vector.shape_cast %23 : vector<1x8x13xf32> to vector<8x13xf32>
    %c4 = arith.constant 4 : index
    %c0_24 = arith.constant 0 : index
    %c0_25 = arith.constant 0 : index
    %25 = vector.load %arg2[%c4, %c0_24, %c0_25] : memref<9x13x64xf32, #tpu.memory_space<vmem>>, vector<1x13x64xf32>
    %26 = vector.shape_cast %25 : vector<1x13x64xf32> to vector<13x64xf32>
    %cst_26 = arith.constant dense<0.000000e+00> : vector<8x64xf32>
    %27 = tpu.matmul %24, %26, %cst_26 {dimension_numbers = #tpu.dot_dimension_numbers<[1], [0], [0], [1], [0, 0, 1, 1], [], []>} : vector<8x13xf32>, vector<13x64xf32>, vector<8x64xf32> -> vector<8x64xf32>
    %28 = arith.addf %22, %27 : vector<8x64xf32>
    %c7 = arith.constant 7 : index
    %c0_27 = arith.constant 0 : index
    %c0_28 = arith.constant 0 : index
    %29 = vector.load %arg1[%c7, %c0_27, %c0_28] : memref<25x8x13xf32, #tpu.memory_space<vmem>>, vector<1x8x13xf32>
    %30 = vector.shape_cast %29 : vector<1x8x13xf32> to vector<8x13xf32>
    %c5_29 = arith.constant 5 : index
    %c0_30 = arith.constant 0 : index
    %c0_31 = arith.constant 0 : index
    %31 = vector.load %arg2[%c5_29, %c0_30, %c0_31] : memref<9x13x64xf32, #tpu.memory_space<vmem>>, vector<1x13x64xf32>
    %32 = vector.shape_cast %31 : vector<1x13x64xf32> to vector<13x64xf32>
    %cst_32 = arith.constant dense<0.000000e+00> : vector<8x64xf32>
    %33 = tpu.matmul %30, %32, %cst_32 {dimension_numbers = #tpu.dot_dimension_numbers<[1], [0], [0], [1], [0, 0, 1, 1], [], []>} : vector<8x13xf32>, vector<13x64xf32>, vector<8x64xf32> -> vector<8x64xf32>
    %34 = arith.addf %28, %33 : vector<8x64xf32>
    %c10 = arith.constant 10 : index
    %c0_33 = arith.constant 0 : index
    %c0_34 = arith.constant 0 : index
    %35 = vector.load %arg1[%c10, %c0_33, %c0_34] : memref<25x8x13xf32, #tpu.memory_space<vmem>>, vector<1x8x13xf32>
    %36 = vector.shape_cast %35 : vector<1x8x13xf32> to vector<8x13xf32>
    %c6_35 = arith.constant 6 : index
    %c0_36 = arith.constant 0 : index
    %c0_37 = arith.constant 0 : index
    %37 = vector.load %arg2[%c6_35, %c0_36, %c0_37] : memref<9x13x64xf32, #tpu.memory_space<vmem>>, vector<1x13x64xf32>
    %38 = vector.shape_cast %37 : vector<1x13x64xf32> to vector<13x64xf32>
    %cst_38 = arith.constant dense<0.000000e+00> : vector<8x64xf32>
    %39 = tpu.matmul %36, %38, %cst_38 {dimension_numbers = #tpu.dot_dimension_numbers<[1], [0], [0], [1], [0, 0, 1, 1], [], []>} : vector<8x13xf32>, vector<13x64xf32>, vector<8x64xf32> -> vector<8x64xf32>
    %40 = arith.addf %34, %39 : vector<8x64xf32>
    %c11 = arith.constant 11 : index
    %c0_39 = arith.constant 0 : index
    %c0_40 = arith.constant 0 : index
    %41 = vector.load %arg1[%c11, %c0_39, %c0_40] : memref<25x8x13xf32, #tpu.memory_space<vmem>>, vector<1x8x13xf32>
    %42 = vector.shape_cast %41 : vector<1x8x13xf32> to vector<8x13xf32>
    %c7_41 = arith.constant 7 : index
    %c0_42 = arith.constant 0 : index
    %c0_43 = arith.constant 0 : index
    %43 = vector.load %arg2[%c7_41, %c0_42, %c0_43] : memref<9x13x64xf32, #tpu.memory_space<vmem>>, vector<1x13x64xf32>
    %44 = vector.shape_cast %43 : vector<1x13x64xf32> to vector<13x64xf32>
    %cst_44 = arith.constant dense<0.000000e+00> : vector<8x64xf32>
    %45 = tpu.matmul %42, %44, %cst_44 {dimension_numbers = #tpu.dot_dimension_numbers<[1], [0], [0], [1], [0, 0, 1, 1], [], []>} : vector<8x13xf32>, vector<13x64xf32>, vector<8x64xf32> -> vector<8x64xf32>
    %46 = arith.addf %40, %45 : vector<8x64xf32>
    %c12 = arith.constant 12 : index
    %c0_45 = arith.constant 0 : index
    %c0_46 = arith.constant 0 : index
    %47 = vector.load %arg1[%c12, %c0_45, %c0_46] : memref<25x8x13xf32, #tpu.memory_space<vmem>>, vector<1x8x13xf32>
    %48 = vector.shape_cast %47 : vector<1x8x13xf32> to vector<8x13xf32>
    %c8 = arith.constant 8 : index
    %c0_47 = arith.constant 0 : index
    %c0_48 = arith.constant 0 : index
    %49 = vector.load %arg2[%c8, %c0_47, %c0_48] : memref<9x13x64xf32, #tpu.memory_space<vmem>>, vector<1x13x64xf32>
    %50 = vector.shape_cast %49 : vector<1x13x64xf32> to vector<13x64xf32>
    %cst_49 = arith.constant dense<0.000000e+00> : vector<8x64xf32>
    %51 = tpu.matmul %48, %50, %cst_49 {dimension_numbers = #tpu.dot_dimension_numbers<[1], [0], [0], [1], [0, 0, 1, 1], [], []>} : vector<8x13xf32>, vector<13x64xf32>, vector<8x64xf32> -> vector<8x64xf32>
    %52 = arith.addf %46, %51 : vector<8x64xf32>
    %c1_50 = arith.constant 1 : index
    %c0_51 = arith.constant 0 : index
    %c0_52 = arith.constant 0 : index
    %53 = vector.load %arg1[%c1_50, %c0_51, %c0_52] : memref<25x8x13xf32, #tpu.memory_space<vmem>>, vector<1x8x13xf32>
    %54 = vector.shape_cast %53 : vector<1x8x13xf32> to vector<8x13xf32>
    %c0_53 = arith.constant 0 : index
    %c0_54 = arith.constant 0 : index
    %c0_55 = arith.constant 0 : index
    %55 = vector.load %arg2[%c0_53, %c0_54, %c0_55] : memref<9x13x64xf32, #tpu.memory_space<vmem>>, vector<1x13x64xf32>
    %56 = vector.shape_cast %55 : vector<1x13x64xf32> to vector<13x64xf32>
    %cst_56 = arith.constant dense<0.000000e+00> : vector<8x64xf32>
    %57 = tpu.matmul %54, %56, %cst_56 {dimension_numbers = #tpu.dot_dimension_numbers<[1], [0], [0], [1], [0, 0, 1, 1], [], []>} : vector<8x13xf32>, vector<13x64xf32>, vector<8x64xf32> -> vector<8x64xf32>
    %c2_57 = arith.constant 2 : index
    %c0_58 = arith.constant 0 : index
    %c0_59 = arith.constant 0 : index
    %58 = vector.load %arg1[%c2_57, %c0_58, %c0_59] : memref<25x8x13xf32, #tpu.memory_space<vmem>>, vector<1x8x13xf32>
    %59 = vector.shape_cast %58 : vector<1x8x13xf32> to vector<8x13xf32>
    %c1_60 = arith.constant 1 : index
    %c0_61 = arith.constant 0 : index
    %c0_62 = arith.constant 0 : index
    %60 = vector.load %arg2[%c1_60, %c0_61, %c0_62] : memref<9x13x64xf32, #tpu.memory_space<vmem>>, vector<1x13x64xf32>
    %61 = vector.shape_cast %60 : vector<1x13x64xf32> to vector<13x64xf32>
    %cst_63 = arith.constant dense<0.000000e+00> : vector<8x64xf32>
    %62 = tpu.matmul %59, %61, %cst_63 {dimension_numbers = #tpu.dot_dimension_numbers<[1], [0], [0], [1], [0, 0, 1, 1], [], []>} : vector<8x13xf32>, vector<13x64xf32>, vector<8x64xf32> -> vector<8x64xf32>
    %63 = arith.addf %57, %62 : vector<8x64xf32>
    %c3_64 = arith.constant 3 : index
    %c0_65 = arith.constant 0 : index
    %c0_66 = arith.constant 0 : index
    %64 = vector.load %arg1[%c3_64, %c0_65, %c0_66] : memref<25x8x13xf32, #tpu.memory_space<vmem>>, vector<1x8x13xf32>
    %65 = vector.shape_cast %64 : vector<1x8x13xf32> to vector<8x13xf32>
    %c2_67 = arith.constant 2 : index
    %c0_68 = arith.constant 0 : index
    %c0_69 = arith.constant 0 : index
    %66 = vector.load %arg2[%c2_67, %c0_68, %c0_69] : memref<9x13x64xf32, #tpu.memory_space<vmem>>, vector<1x13x64xf32>
    %67 = vector.shape_cast %66 : vector<1x13x64xf32> to vector<13x64xf32>
    %cst_70 = arith.constant dense<0.000000e+00> : vector<8x64xf32>
    %68 = tpu.matmul %65, %67, %cst_70 {dimension_numbers = #tpu.dot_dimension_numbers<[1], [0], [0], [1], [0, 0, 1, 1], [], []>} : vector<8x13xf32>, vector<13x64xf32>, vector<8x64xf32> -> vector<8x64xf32>
    %69 = arith.addf %63, %68 : vector<8x64xf32>
    %c6_71 = arith.constant 6 : index
    %c0_72 = arith.constant 0 : index
    %c0_73 = arith.constant 0 : index
    %70 = vector.load %arg1[%c6_71, %c0_72, %c0_73] : memref<25x8x13xf32, #tpu.memory_space<vmem>>, vector<1x8x13xf32>
    %71 = vector.shape_cast %70 : vector<1x8x13xf32> to vector<8x13xf32>
    %c3_74 = arith.constant 3 : index
    %c0_75 = arith.constant 0 : index
    %c0_76 = arith.constant 0 : index
    %72 = vector.load %arg2[%c3_74, %c0_75, %c0_76] : memref<9x13x64xf32, #tpu.memory_space<vmem>>, vector<1x13x64xf32>
    %73 = vector.shape_cast %72 : vector<1x13x64xf32> to vector<13x64xf32>
    %cst_77 = arith.constant dense<0.000000e+00> : vector<8x64xf32>
    %74 = tpu.matmul %71, %73, %cst_77 {dimension_numbers = #tpu.dot_dimension_numbers<[1], [0], [0], [1], [0, 0, 1, 1], [], []>} : vector<8x13xf32>, vector<13x64xf32>, vector<8x64xf32> -> vector<8x64xf32>
    %75 = arith.addf %69, %74 : vector<8x64xf32>
    %c7_78 = arith.constant 7 : index
    %c0_79 = arith.constant 0 : index
    %c0_80 = arith.constant 0 : index
    %76 = vector.load %arg1[%c7_78, %c0_79, %c0_80] : memref<25x8x13xf32, #tpu.memory_space<vmem>>, vector<1x8x13xf32>
    %77 = vector.shape_cast %76 : vector<1x8x13xf32> to vector<8x13xf32>
    %c4_81 = arith.constant 4 : index
    %c0_82 = arith.constant 0 : index
    %c0_83 = arith.constant 0 : index
    %78 = vector.load %arg2[%c4_81, %c0_82, %c0_83] : memref<9x13x64xf32, #tpu.memory_space<vmem>>, vector<1x13x64xf32>
    %79 = vector.shape_cast %78 : vector<1x13x64xf32> to vector<13x64xf32>
    %cst_84 = arith.constant dense<0.000000e+00> : vector<8x64xf32>
    %80 = tpu.matmul %77, %79, %cst_84 {dimension_numbers = #tpu.dot_dimension_numbers<[1], [0], [0], [1], [0, 0, 1, 1], [], []>} : vector<8x13xf32>, vector<13x64xf32>, vector<8x64xf32> -> vector<8x64xf32>
    %81 = arith.addf %75, %80 : vector<8x64xf32>
    %c8_85 = arith.constant 8 : index
    %c0_86 = arith.constant 0 : index
    %c0_87 = arith.constant 0 : index
    %82 = vector.load %arg1[%c8_85, %c0_86, %c0_87] : memref<25x8x13xf32, #tpu.memory_space<vmem>>, vector<1x8x13xf32>
    %83 = vector.shape_cast %82 : vector<1x8x13xf32> to vector<8x13xf32>
    %c5_88 = arith.constant 5 : index
    %c0_89 = arith.constant 0 : index
    %c0_90 = arith.constant 0 : index
    %84 = vector.load %arg2[%c5_88, %c0_89, %c0_90] : memref<9x13x64xf32, #tpu.memory_space<vmem>>, vector<1x13x64xf32>
    %85 = vector.shape_cast %84 : vector<1x13x64xf32> to vector<13x64xf32>
    %cst_91 = arith.constant dense<0.000000e+00> : vector<8x64xf32>
    %86 = tpu.matmul %83, %85, %cst_91 {dimension_numbers = #tpu.dot_dimension_numbers<[1], [0], [0], [1], [0, 0, 1, 1], [], []>} : vector<8x13xf32>, vector<13x64xf32>, vector<8x64xf32> -> vector<8x64xf32>
    %87 = arith.addf %81, %86 : vector<8x64xf32>
    %c11_92 = arith.constant 11 : index
    %c0_93 = arith.constant 0 : index
    %c0_94 = arith.constant 0 : index
    %88 = vector.load %arg1[%c11_92, %c0_93, %c0_94] : memref<25x8x13xf32, #tpu.memory_space<vmem>>, vector<1x8x13xf32>
    %89 = vector.shape_cast %88 : vector<1x8x13xf32> to vector<8x13xf32>
    %c6_95 = arith.constant 6 : index
    %c0_96 = arith.constant 0 : index
    %c0_97 = arith.constant 0 : index
    %90 = vector.load %arg2[%c6_95, %c0_96, %c0_97] : memref<9x13x64xf32, #tpu.memory_space<vmem>>, vector<1x13x64xf32>
    %91 = vector.shape_cast %90 : vector<1x13x64xf32> to vector<13x64xf32>
    %cst_98 = arith.constant dense<0.000000e+00> : vector<8x64xf32>
    %92 = tpu.matmul %89, %91, %cst_98 {dimension_numbers = #tpu.dot_dimension_numbers<[1], [0], [0], [1], [0, 0, 1, 1], [], []>} : vector<8x13xf32>, vector<13x64xf32>, vector<8x64xf32> -> vector<8x64xf32>
    %93 = arith.addf %87, %92 : vector<8x64xf32>
    %c12_99 = arith.constant 12 : index
    %c0_100 = arith.constant 0 : index
    %c0_101 = arith.constant 0 : index
    %94 = vector.load %arg1[%c12_99, %c0_100, %c0_101] : memref<25x8x13xf32, #tpu.memory_space<vmem>>, vector<1x8x13xf32>
    %95 = vector.shape_cast %94 : vector<1x8x13xf32> to vector<8x13xf32>
    %c7_102 = arith.constant 7 : index
    %c0_103 = arith.constant 0 : index
    %c0_104 = arith.constant 0 : index
    %96 = vector.load %arg2[%c7_102, %c0_103, %c0_104] : memref<9x13x64xf32, #tpu.memory_space<vmem>>, vector<1x13x64xf32>
    %97 = vector.shape_cast %96 : vector<1x13x64xf32> to vector<13x64xf32>
    %cst_105 = arith.constant dense<0.000000e+00> : vector<8x64xf32>
    %98 = tpu.matmul %95, %97, %cst_105 {dimension_numbers = #tpu.dot_dimension_numbers<[1], [0], [0], [1], [0, 0, 1, 1], [], []>} : vector<8x13xf32>, vector<13x64xf32>, vector<8x64xf32> -> vector<8x64xf32>
    %99 = arith.addf %93, %98 : vector<8x64xf32>
    %c13 = arith.constant 13 : index
    %c0_106 = arith.constant 0 : index
    %c0_107 = arith.constant 0 : index
    %100 = vector.load %arg1[%c13, %c0_106, %c0_107] : memref<25x8x13xf32, #tpu.memory_space<vmem>>, vector<1x8x13xf32>
    %101 = vector.shape_cast %100 : vector<1x8x13xf32> to vector<8x13xf32>
    %c8_108 = arith.constant 8 : index
    %c0_109 = arith.constant 0 : index
    %c0_110 = arith.constant 0 : index
    %102 = vector.load %arg2[%c8_108, %c0_109, %c0_110] : memref<9x13x64xf32, #tpu.memory_space<vmem>>, vector<1x13x64xf32>
    %103 = vector.shape_cast %102 : vector<1x13x64xf32> to vector<13x64xf32>
    %cst_111 = arith.constant dense<0.000000e+00> : vector<8x64xf32>
    %104 = tpu.matmul %101, %103, %cst_111 {dimension_numbers = #tpu.dot_dimension_numbers<[1], [0], [0], [1], [0, 0, 1, 1], [], []>} : vector<8x13xf32>, vector<13x64xf32>, vector<8x64xf32> -> vector<8x64xf32>
    %105 = arith.addf %99, %104 : vector<8x64xf32>
    %106 = arith.maximumf %52, %105 : vector<8x64xf32>
    %c2_112 = arith.constant 2 : index
    %c0_113 = arith.constant 0 : index
    %c0_114 = arith.constant 0 : index
    %107 = vector.load %arg1[%c2_112, %c0_113, %c0_114] : memref<25x8x13xf32, #tpu.memory_space<vmem>>, vector<1x8x13xf32>
    %108 = vector.shape_cast %107 : vector<1x8x13xf32> to vector<8x13xf32>
    %c0_115 = arith.constant 0 : index
    %c0_116 = arith.constant 0 : index
    %c0_117 = arith.constant 0 : index
    %109 = vector.load %arg2[%c0_115, %c0_116, %c0_117] : memref<9x13x64xf32, #tpu.memory_space<vmem>>, vector<1x13x64xf32>
    %110 = vector.shape_cast %109 : vector<1x13x64xf32> to vector<13x64xf32>
    %cst_118 = arith.constant dense<0.000000e+00> : vector<8x64xf32>
    %111 = tpu.matmul %108, %110, %cst_118 {dimension_numbers = #tpu.dot_dimension_numbers<[1], [0], [0], [1], [0, 0, 1, 1], [], []>} : vector<8x13xf32>, vector<13x64xf32>, vector<8x64xf32> -> vector<8x64xf32>
    %c3_119 = arith.constant 3 : index
    %c0_120 = arith.constant 0 : index
    %c0_121 = arith.constant 0 : index
    %112 = vector.load %arg1[%c3_119, %c0_120, %c0_121] : memref<25x8x13xf32, #tpu.memory_space<vmem>>, vector<1x8x13xf32>
    %113 = vector.shape_cast %112 : vector<1x8x13xf32> to vector<8x13xf32>
    %c1_122 = arith.constant 1 : index
    %c0_123 = arith.constant 0 : index
    %c0_124 = arith.constant 0 : index
    %114 = vector.load %arg2[%c1_122, %c0_123, %c0_124] : memref<9x13x64xf32, #tpu.memory_space<vmem>>, vector<1x13x64xf32>
    %115 = vector.shape_cast %114 : vector<1x13x64xf32> to vector<13x64xf32>
    %cst_125 = arith.constant dense<0.000000e+00> : vector<8x64xf32>
    %116 = tpu.matmul %113, %115, %cst_125 {dimension_numbers = #tpu.dot_dimension_numbers<[1], [0], [0], [1], [0, 0, 1, 1], [], []>} : vector<8x13xf32>, vector<13x64xf32>, vector<8x64xf32> -> vector<8x64xf32>
    %117 = arith.addf %111, %116 : vector<8x64xf32>
    %c4_126 = arith.constant 4 : index
    %c0_127 = arith.constant 0 : index
    %c0_128 = arith.constant 0 : index
    %118 = vector.load %arg1[%c4_126, %c0_127, %c0_128] : memref<25x8x13xf32, #tpu.memory_space<vmem>>, vector<1x8x13xf32>
    %119 = vector.shape_cast %118 : vector<1x8x13xf32> to vector<8x13xf32>
    %c2_129 = arith.constant 2 : index
    %c0_130 = arith.constant 0 : index
    %c0_131 = arith.constant 0 : index
    %120 = vector.load %arg2[%c2_129, %c0_130, %c0_131] : memref<9x13x64xf32, #tpu.memory_space<vmem>>, vector<1x13x64xf32>
    %121 = vector.shape_cast %120 : vector<1x13x64xf32> to vector<13x64xf32>
    %cst_132 = arith.constant dense<0.000000e+00> : vector<8x64xf32>
    %122 = tpu.matmul %119, %121, %cst_132 {dimension_numbers = #tpu.dot_dimension_numbers<[1], [0], [0], [1], [0, 0, 1, 1], [], []>} : vector<8x13xf32>, vector<13x64xf32>, vector<8x64xf32> -> vector<8x64xf32>
    %123 = arith.addf %117, %122 : vector<8x64xf32>
    %c7_133 = arith.constant 7 : index
    %c0_134 = arith.constant 0 : index
    %c0_135 = arith.constant 0 : index
    %124 = vector.load %arg1[%c7_133, %c0_134, %c0_135] : memref<25x8x13xf32, #tpu.memory_space<vmem>>, vector<1x8x13xf32>
    %125 = vector.shape_cast %124 : vector<1x8x13xf32> to vector<8x13xf32>
    %c3_136 = arith.constant 3 : index
    %c0_137 = arith.constant 0 : index
    %c0_138 = arith.constant 0 : index
    %126 = vector.load %arg2[%c3_136, %c0_137, %c0_138] : memref<9x13x64xf32, #tpu.memory_space<vmem>>, vector<1x13x64xf32>
    %127 = vector.shape_cast %126 : vector<1x13x64xf32> to vector<13x64xf32>
    %cst_139 = arith.constant dense<0.000000e+00> : vector<8x64xf32>
    %128 = tpu.matmul %125, %127, %cst_139 {dimension_numbers = #tpu.dot_dimension_numbers<[1], [0], [0], [1], [0, 0, 1, 1], [], []>} : vector<8x13xf32>, vector<13x64xf32>, vector<8x64xf32> -> vector<8x64xf32>
    %129 = arith.addf %123, %128 : vector<8x64xf32>
    %c8_140 = arith.constant 8 : index
    %c0_141 = arith.constant 0 : index
    %c0_142 = arith.constant 0 : index
    %130 = vector.load %arg1[%c8_140, %c0_141, %c0_142] : memref<25x8x13xf32, #tpu.memory_space<vmem>>, vector<1x8x13xf32>
    %131 = vector.shape_cast %130 : vector<1x8x13xf32> to vector<8x13xf32>
    %c4_143 = arith.constant 4 : index
    %c0_144 = arith.constant 0 : index
    %c0_145 = arith.constant 0 : index
    %132 = vector.load %arg2[%c4_143, %c0_144, %c0_145] : memref<9x13x64xf32, #tpu.memory_space<vmem>>, vector<1x13x64xf32>
    %133 = vector.shape_cast %132 : vector<1x13x64xf32> to vector<13x64xf32>
    %cst_146 = arith.constant dense<0.000000e+00> : vector<8x64xf32>
    %134 = tpu.matmul %131, %133, %cst_146 {dimension_numbers = #tpu.dot_dimension_numbers<[1], [0], [0], [1], [0, 0, 1, 1], [], []>} : vector<8x13xf32>, vector<13x64xf32>, vector<8x64xf32> -> vector<8x64xf32>
    %135 = arith.addf %129, %134 : vector<8x64xf32>
    %c9 = arith.constant 9 : index
    %c0_147 = arith.constant 0 : index
    %c0_148 = arith.constant 0 : index
    %136 = vector.load %arg1[%c9, %c0_147, %c0_148] : memref<25x8x13xf32, #tpu.memory_space<vmem>>, vector<1x8x13xf32>
    %137 = vector.shape_cast %136 : vector<1x8x13xf32> to vector<8x13xf32>
    %c5_149 = arith.constant 5 : index
    %c0_150 = arith.constant 0 : index
    %c0_151 = arith.constant 0 : index
    %138 = vector.load %arg2[%c5_149, %c0_150, %c0_151] : memref<9x13x64xf32, #tpu.memory_space<vmem>>, vector<1x13x64xf32>
    %139 = vector.shape_cast %138 : vector<1x13x64xf32> to vector<13x64xf32>
    %cst_152 = arith.constant dense<0.000000e+00> : vector<8x64xf32>
    %140 = tpu.matmul %137, %139, %cst_152 {dimension_numbers = #tpu.dot_dimension_numbers<[1], [0], [0], [1], [0, 0, 1, 1], [], []>} : vector<8x13xf32>, vector<13x64xf32>, vector<8x64xf32> -> vector<8x64xf32>
    %141 = arith.addf %135, %140 : vector<8x64xf32>
    %c12_153 = arith.constant 12 : index
    %c0_154 = arith.constant 0 : index
    %c0_155 = arith.constant 0 : index
    %142 = vector.load %arg1[%c12_153, %c0_154, %c0_155] : memref<25x8x13xf32, #tpu.memory_space<vmem>>, vector<1x8x13xf32>
    %143 = vector.shape_cast %142 : vector<1x8x13xf32> to vector<8x13xf32>
    %c6_156 = arith.constant 6 : index
    %c0_157 = arith.constant 0 : index
    %c0_158 = arith.constant 0 : index
    %144 = vector.load %arg2[%c6_156, %c0_157, %c0_158] : memref<9x13x64xf32, #tpu.memory_space<vmem>>, vector<1x13x64xf32>
    %145 = vector.shape_cast %144 : vector<1x13x64xf32> to vector<13x64xf32>
    %cst_159 = arith.constant dense<0.000000e+00> : vector<8x64xf32>
    %146 = tpu.matmul %143, %145, %cst_159 {dimension_numbers = #tpu.dot_dimension_numbers<[1], [0], [0], [1], [0, 0, 1, 1], [], []>} : vector<8x13xf32>, vector<13x64xf32>, vector<8x64xf32> -> vector<8x64xf32>
    %147 = arith.addf %141, %146 : vector<8x64xf32>
    %c13_160 = arith.constant 13 : index
    %c0_161 = arith.constant 0 : index
    %c0_162 = arith.constant 0 : index
    %148 = vector.load %arg1[%c13_160, %c0_161, %c0_162] : memref<25x8x13xf32, #tpu.memory_space<vmem>>, vector<1x8x13xf32>
    %149 = vector.shape_cast %148 : vector<1x8x13xf32> to vector<8x13xf32>
    %c7_163 = arith.constant 7 : index
    %c0_164 = arith.constant 0 : index
    %c0_165 = arith.constant 0 : index
    %150 = vector.load %arg2[%c7_163, %c0_164, %c0_165] : memref<9x13x64xf32, #tpu.memory_space<vmem>>, vector<1x13x64xf32>
    %151 = vector.shape_cast %150 : vector<1x13x64xf32> to vector<13x64xf32>
    %cst_166 = arith.constant dense<0.000000e+00> : vector<8x64xf32>
    %152 = tpu.matmul %149, %151, %cst_166 {dimension_numbers = #tpu.dot_dimension_numbers<[1], [0], [0], [1], [0, 0, 1, 1], [], []>} : vector<8x13xf32>, vector<13x64xf32>, vector<8x64xf32> -> vector<8x64xf32>
    %153 = arith.addf %147, %152 : vector<8x64xf32>
    %c14 = arith.constant 14 : index
    %c0_167 = arith.constant 0 : index
    %c0_168 = arith.constant 0 : index
    %154 = vector.load %arg1[%c14, %c0_167, %c0_168] : memref<25x8x13xf32, #tpu.memory_space<vmem>>, vector<1x8x13xf32>
    %155 = vector.shape_cast %154 : vector<1x8x13xf32> to vector<8x13xf32>
    %c8_169 = arith.constant 8 : index
    %c0_170 = arith.constant 0 : index
    %c0_171 = arith.constant 0 : index
    %156 = vector.load %arg2[%c8_169, %c0_170, %c0_171] : memref<9x13x64xf32, #tpu.memory_space<vmem>>, vector<1x13x64xf32>
    %157 = vector.shape_cast %156 : vector<1x13x64xf32> to vector<13x64xf32>
    %cst_172 = arith.constant dense<0.000000e+00> : vector<8x64xf32>
    %158 = tpu.matmul %155, %157, %cst_172 {dimension_numbers = #tpu.dot_dimension_numbers<[1], [0], [0], [1], [0, 0, 1, 1], [], []>} : vector<8x13xf32>, vector<13x64xf32>, vector<8x64xf32> -> vector<8x64xf32>
    %159 = arith.addf %153, %158 : vector<8x64xf32>
    %160 = arith.maximumf %106, %159 : vector<8x64xf32>
    %c5_173 = arith.constant 5 : index
    %c0_174 = arith.constant 0 : index
    %c0_175 = arith.constant 0 : index
    %161 = vector.load %arg1[%c5_173, %c0_174, %c0_175] : memref<25x8x13xf32, #tpu.memory_space<vmem>>, vector<1x8x13xf32>
    %162 = vector.shape_cast %161 : vector<1x8x13xf32> to vector<8x13xf32>
    %c0_176 = arith.constant 0 : index
    %c0_177 = arith.constant 0 : index
    %c0_178 = arith.constant 0 : index
    %163 = vector.load %arg2[%c0_176, %c0_177, %c0_178] : memref<9x13x64xf32, #tpu.memory_space<vmem>>, vector<1x13x64xf32>
    %164 = vector.shape_cast %163 : vector<1x13x64xf32> to vector<13x64xf32>
    %cst_179 = arith.constant dense<0.000000e+00> : vector<8x64xf32>
    %165 = tpu.matmul %162, %164, %cst_179 {dimension_numbers = #tpu.dot_dimension_numbers<[1], [0], [0], [1], [0, 0, 1, 1], [], []>} : vector<8x13xf32>, vector<13x64xf32>, vector<8x64xf32> -> vector<8x64xf32>
    %c6_180 = arith.constant 6 : index
    %c0_181 = arith.constant 0 : index
    %c0_182 = arith.constant 0 : index
    %166 = vector.load %arg1[%c6_180, %c0_181, %c0_182] : memref<25x8x13xf32, #tpu.memory_space<vmem>>, vector<1x8x13xf32>
    %167 = vector.shape_cast %166 : vector<1x8x13xf32> to vector<8x13xf32>
    %c1_183 = arith.constant 1 : index
    %c0_184 = arith.constant 0 : index
    %c0_185 = arith.constant 0 : index
    %168 = vector.load %arg2[%c1_183, %c0_184, %c0_185] : memref<9x13x64xf32, #tpu.memory_space<vmem>>, vector<1x13x64xf32>
    %169 = vector.shape_cast %168 : vector<1x13x64xf32> to vector<13x64xf32>
    %cst_186 = arith.constant dense<0.000000e+00> : vector<8x64xf32>
    %170 = tpu.matmul %167, %169, %cst_186 {dimension_numbers = #tpu.dot_dimension_numbers<[1], [0], [0], [1], [0, 0, 1, 1], [], []>} : vector<8x13xf32>, vector<13x64xf32>, vector<8x64xf32> -> vector<8x64xf32>
    %171 = arith.addf %165, %170 : vector<8x64xf32>
    %c7_187 = arith.constant 7 : index
    %c0_188 = arith.constant 0 : index
    %c0_189 = arith.constant 0 : index
    %172 = vector.load %arg1[%c7_187, %c0_188, %c0_189] : memref<25x8x13xf32, #tpu.memory_space<vmem>>, vector<1x8x13xf32>
    %173 = vector.shape_cast %172 : vector<1x8x13xf32> to vector<8x13xf32>
    %c2_190 = arith.constant 2 : index
    %c0_191 = arith.constant 0 : index
    %c0_192 = arith.constant 0 : index
    %174 = vector.load %arg2[%c2_190, %c0_191, %c0_192] : memref<9x13x64xf32, #tpu.memory_space<vmem>>, vector<1x13x64xf32>
    %175 = vector.shape_cast %174 : vector<1x13x64xf32> to vector<13x64xf32>
    %cst_193 = arith.constant dense<0.000000e+00> : vector<8x64xf32>
    %176 = tpu.matmul %173, %175, %cst_193 {dimension_numbers = #tpu.dot_dimension_numbers<[1], [0], [0], [1], [0, 0, 1, 1], [], []>} : vector<8x13xf32>, vector<13x64xf32>, vector<8x64xf32> -> vector<8x64xf32>
    %177 = arith.addf %171, %176 : vector<8x64xf32>
    %c10_194 = arith.constant 10 : index
    %c0_195 = arith.constant 0 : index
    %c0_196 = arith.constant 0 : index
    %178 = vector.load %arg1[%c10_194, %c0_195, %c0_196] : memref<25x8x13xf32, #tpu.memory_space<vmem>>, vector<1x8x13xf32>
    %179 = vector.shape_cast %178 : vector<1x8x13xf32> to vector<8x13xf32>
    %c3_197 = arith.constant 3 : index
    %c0_198 = arith.constant 0 : index
    %c0_199 = arith.constant 0 : index
    %180 = vector.load %arg2[%c3_197, %c0_198, %c0_199] : memref<9x13x64xf32, #tpu.memory_space<vmem>>, vector<1x13x64xf32>
    %181 = vector.shape_cast %180 : vector<1x13x64xf32> to vector<13x64xf32>
    %cst_200 = arith.constant dense<0.000000e+00> : vector<8x64xf32>
    %182 = tpu.matmul %179, %181, %cst_200 {dimension_numbers = #tpu.dot_dimension_numbers<[1], [0], [0], [1], [0, 0, 1, 1], [], []>} : vector<8x13xf32>, vector<13x64xf32>, vector<8x64xf32> -> vector<8x64xf32>
    %183 = arith.addf %177, %182 : vector<8x64xf32>
    %c11_201 = arith.constant 11 : index
    %c0_202 = arith.constant 0 : index
    %c0_203 = arith.constant 0 : index
    %184 = vector.load %arg1[%c11_201, %c0_202, %c0_203] : memref<25x8x13xf32, #tpu.memory_space<vmem>>, vector<1x8x13xf32>
    %185 = vector.shape_cast %184 : vector<1x8x13xf32> to vector<8x13xf32>
    %c4_204 = arith.constant 4 : index
    %c0_205 = arith.constant 0 : index
    %c0_206 = arith.constant 0 : index
    %186 = vector.load %arg2[%c4_204, %c0_205, %c0_206] : memref<9x13x64xf32, #tpu.memory_space<vmem>>, vector<1x13x64xf32>
    %187 = vector.shape_cast %186 : vector<1x13x64xf32> to vector<13x64xf32>
    %cst_207 = arith.constant dense<0.000000e+00> : vector<8x64xf32>
    %188 = tpu.matmul %185, %187, %cst_207 {dimension_numbers = #tpu.dot_dimension_numbers<[1], [0], [0], [1], [0, 0, 1, 1], [], []>} : vector<8x13xf32>, vector<13x64xf32>, vector<8x64xf32> -> vector<8x64xf32>
    %189 = arith.addf %183, %188 : vector<8x64xf32>
    %c12_208 = arith.constant 12 : index
    %c0_209 = arith.constant 0 : index
    %c0_210 = arith.constant 0 : index
    %190 = vector.load %arg1[%c12_208, %c0_209, %c0_210] : memref<25x8x13xf32, #tpu.memory_space<vmem>>, vector<1x8x13xf32>
    %191 = vector.shape_cast %190 : vector<1x8x13xf32> to vector<8x13xf32>
    %c5_211 = arith.constant 5 : index
    %c0_212 = arith.constant 0 : index
    %c0_213 = arith.constant 0 : index
    %192 = vector.load %arg2[%c5_211, %c0_212, %c0_213] : memref<9x13x64xf32, #tpu.memory_space<vmem>>, vector<1x13x64xf32>
    %193 = vector.shape_cast %192 : vector<1x13x64xf32> to vector<13x64xf32>
    %cst_214 = arith.constant dense<0.000000e+00> : vector<8x64xf32>
    %194 = tpu.matmul %191, %193, %cst_214 {dimension_numbers = #tpu.dot_dimension_numbers<[1], [0], [0], [1], [0, 0, 1, 1], [], []>} : vector<8x13xf32>, vector<13x64xf32>, vector<8x64xf32> -> vector<8x64xf32>
    %195 = arith.addf %189, %194 : vector<8x64xf32>
    %c15 = arith.constant 15 : index
    %c0_215 = arith.constant 0 : index
    %c0_216 = arith.constant 0 : index
    %196 = vector.load %arg1[%c15, %c0_215, %c0_216] : memref<25x8x13xf32, #tpu.memory_space<vmem>>, vector<1x8x13xf32>
    %197 = vector.shape_cast %196 : vector<1x8x13xf32> to vector<8x13xf32>
    %c6_217 = arith.constant 6 : index
    %c0_218 = arith.constant 0 : index
    %c0_219 = arith.constant 0 : index
    %198 = vector.load %arg2[%c6_217, %c0_218, %c0_219] : memref<9x13x64xf32, #tpu.memory_space<vmem>>, vector<1x13x64xf32>
    %199 = vector.shape_cast %198 : vector<1x13x64xf32> to vector<13x64xf32>
    %cst_220 = arith.constant dense<0.000000e+00> : vector<8x64xf32>
    %200 = tpu.matmul %197, %199, %cst_220 {dimension_numbers = #tpu.dot_dimension_numbers<[1], [0], [0], [1], [0, 0, 1, 1], [], []>} : vector<8x13xf32>, vector<13x64xf32>, vector<8x64xf32> -> vector<8x64xf32>
    %201 = arith.addf %195, %200 : vector<8x64xf32>
    %c16 = arith.constant 16 : index
    %c0_221 = arith.constant 0 : index
    %c0_222 = arith.constant 0 : index
    %202 = vector.load %arg1[%c16, %c0_221, %c0_222] : memref<25x8x13xf32, #tpu.memory_space<vmem>>, vector<1x8x13xf32>
    %203 = vector.shape_cast %202 : vector<1x8x13xf32> to vector<8x13xf32>
    %c7_223 = arith.constant 7 : index
    %c0_224 = arith.constant 0 : index
    %c0_225 = arith.constant 0 : index
    %204 = vector.load %arg2[%c7_223, %c0_224, %c0_225] : memref<9x13x64xf32, #tpu.memory_space<vmem>>, vector<1x13x64xf32>
    %205 = vector.shape_cast %204 : vector<1x13x64xf32> to vector<13x64xf32>
    %cst_226 = arith.constant dense<0.000000e+00> : vector<8x64xf32>
    %206 = tpu.matmul %203, %205, %cst_226 {dimension_numbers = #tpu.dot_dimension_numbers<[1], [0], [0], [1], [0, 0, 1, 1], [], []>} : vector<8x13xf32>, vector<13x64xf32>, vector<8x64xf32> -> vector<8x64xf32>
    %207 = arith.addf %201, %206 : vector<8x64xf32>
    %c17 = arith.constant 17 : index
    %c0_227 = arith.constant 0 : index
    %c0_228 = arith.constant 0 : index
    %208 = vector.load %arg1[%c17, %c0_227, %c0_228] : memref<25x8x13xf32, #tpu.memory_space<vmem>>, vector<1x8x13xf32>
    %209 = vector.shape_cast %208 : vector<1x8x13xf32> to vector<8x13xf32>
    %c8_229 = arith.constant 8 : index
    %c0_230 = arith.constant 0 : index
    %c0_231 = arith.constant 0 : index
    %210 = vector.load %arg2[%c8_229, %c0_230, %c0_231] : memref<9x13x64xf32, #tpu.memory_space<vmem>>, vector<1x13x64xf32>
    %211 = vector.shape_cast %210 : vector<1x13x64xf32> to vector<13x64xf32>
    %cst_232 = arith.constant dense<0.000000e+00> : vector<8x64xf32>
    %212 = tpu.matmul %209, %211, %cst_232 {dimension_numbers = #tpu.dot_dimension_numbers<[1], [0], [0], [1], [0, 0, 1, 1], [], []>} : vector<8x13xf32>, vector<13x64xf32>, vector<8x64xf32> -> vector<8x64xf32>
    %213 = arith.addf %207, %212 : vector<8x64xf32>
    %214 = arith.maximumf %160, %213 : vector<8x64xf32>
    %c6_233 = arith.constant 6 : index
    %c0_234 = arith.constant 0 : index
    %c0_235 = arith.constant 0 : index
    %215 = vector.load %arg1[%c6_233, %c0_234, %c0_235] : memref<25x8x13xf32, #tpu.memory_space<vmem>>, vector<1x8x13xf32>
    %216 = vector.shape_cast %215 : vector<1x8x13xf32> to vector<8x13xf32>
    %c0_236 = arith.constant 0 : index
    %c0_237 = arith.constant 0 : index
    %c0_238 = arith.constant 0 : index
    %217 = vector.load %arg2[%c0_236, %c0_237, %c0_238] : memref<9x13x64xf32, #tpu.memory_space<vmem>>, vector<1x13x64xf32>
    %218 = vector.shape_cast %217 : vector<1x13x64xf32> to vector<13x64xf32>
    %cst_239 = arith.constant dense<0.000000e+00> : vector<8x64xf32>
    %219 = tpu.matmul %216, %218, %cst_239 {dimension_numbers = #tpu.dot_dimension_numbers<[1], [0], [0], [1], [0, 0, 1, 1], [], []>} : vector<8x13xf32>, vector<13x64xf32>, vector<8x64xf32> -> vector<8x64xf32>
    %c7_240 = arith.constant 7 : index
    %c0_241 = arith.constant 0 : index
    %c0_242 = arith.constant 0 : index
    %220 = vector.load %arg1[%c7_240, %c0_241, %c0_242] : memref<25x8x13xf32, #tpu.memory_space<vmem>>, vector<1x8x13xf32>
    %221 = vector.shape_cast %220 : vector<1x8x13xf32> to vector<8x13xf32>
    %c1_243 = arith.constant 1 : index
    %c0_244 = arith.constant 0 : index
    %c0_245 = arith.constant 0 : index
    %222 = vector.load %arg2[%c1_243, %c0_244, %c0_245] : memref<9x13x64xf32, #tpu.memory_space<vmem>>, vector<1x13x64xf32>
    %223 = vector.shape_cast %222 : vector<1x13x64xf32> to vector<13x64xf32>
    %cst_246 = arith.constant dense<0.000000e+00> : vector<8x64xf32>
    %224 = tpu.matmul %221, %223, %cst_246 {dimension_numbers = #tpu.dot_dimension_numbers<[1], [0], [0], [1], [0, 0, 1, 1], [], []>} : vector<8x13xf32>, vector<13x64xf32>, vector<8x64xf32> -> vector<8x64xf32>
    %225 = arith.addf %219, %224 : vector<8x64xf32>
    %c8_247 = arith.constant 8 : index
    %c0_248 = arith.constant 0 : index
    %c0_249 = arith.constant 0 : index
    %226 = vector.load %arg1[%c8_247, %c0_248, %c0_249] : memref<25x8x13xf32, #tpu.memory_space<vmem>>, vector<1x8x13xf32>
    %227 = vector.shape_cast %226 : vector<1x8x13xf32> to vector<8x13xf32>
    %c2_250 = arith.constant 2 : index
    %c0_251 = arith.constant 0 : index
    %c0_252 = arith.constant 0 : index
    %228 = vector.load %arg2[%c2_250, %c0_251, %c0_252] : memref<9x13x64xf32, #tpu.memory_space<vmem>>, vector<1x13x64xf32>
    %229 = vector.shape_cast %228 : vector<1x13x64xf32> to vector<13x64xf32>
    %cst_253 = arith.constant dense<0.000000e+00> : vector<8x64xf32>
    %230 = tpu.matmul %227, %229, %cst_253 {dimension_numbers = #tpu.dot_dimension_numbers<[1], [0], [0], [1], [0, 0, 1, 1], [], []>} : vector<8x13xf32>, vector<13x64xf32>, vector<8x64xf32> -> vector<8x64xf32>
    %231 = arith.addf %225, %230 : vector<8x64xf32>
    %c11_254 = arith.constant 11 : index
    %c0_255 = arith.constant 0 : index
    %c0_256 = arith.constant 0 : index
    %232 = vector.load %arg1[%c11_254, %c0_255, %c0_256] : memref<25x8x13xf32, #tpu.memory_space<vmem>>, vector<1x8x13xf32>
    %233 = vector.shape_cast %232 : vector<1x8x13xf32> to vector<8x13xf32>
    %c3_257 = arith.constant 3 : index
    %c0_258 = arith.constant 0 : index
    %c0_259 = arith.constant 0 : index
    %234 = vector.load %arg2[%c3_257, %c0_258, %c0_259] : memref<9x13x64xf32, #tpu.memory_space<vmem>>, vector<1x13x64xf32>
    %235 = vector.shape_cast %234 : vector<1x13x64xf32> to vector<13x64xf32>
    %cst_260 = arith.constant dense<0.000000e+00> : vector<8x64xf32>
    %236 = tpu.matmul %233, %235, %cst_260 {dimension_numbers = #tpu.dot_dimension_numbers<[1], [0], [0], [1], [0, 0, 1, 1], [], []>} : vector<8x13xf32>, vector<13x64xf32>, vector<8x64xf32> -> vector<8x64xf32>
    %237 = arith.addf %231, %236 : vector<8x64xf32>
    %c12_261 = arith.constant 12 : index
    %c0_262 = arith.constant 0 : index
    %c0_263 = arith.constant 0 : index
    %238 = vector.load %arg1[%c12_261, %c0_262, %c0_263] : memref<25x8x13xf32, #tpu.memory_space<vmem>>, vector<1x8x13xf32>
    %239 = vector.shape_cast %238 : vector<1x8x13xf32> to vector<8x13xf32>
    %c4_264 = arith.constant 4 : index
    %c0_265 = arith.constant 0 : index
    %c0_266 = arith.constant 0 : index
    %240 = vector.load %arg2[%c4_264, %c0_265, %c0_266] : memref<9x13x64xf32, #tpu.memory_space<vmem>>, vector<1x13x64xf32>
    %241 = vector.shape_cast %240 : vector<1x13x64xf32> to vector<13x64xf32>
    %cst_267 = arith.constant dense<0.000000e+00> : vector<8x64xf32>
    %242 = tpu.matmul %239, %241, %cst_267 {dimension_numbers = #tpu.dot_dimension_numbers<[1], [0], [0], [1], [0, 0, 1, 1], [], []>} : vector<8x13xf32>, vector<13x64xf32>, vector<8x64xf32> -> vector<8x64xf32>
    %243 = arith.addf %237, %242 : vector<8x64xf32>
    %c13_268 = arith.constant 13 : index
    %c0_269 = arith.constant 0 : index
    %c0_270 = arith.constant 0 : index
    %244 = vector.load %arg1[%c13_268, %c0_269, %c0_270] : memref<25x8x13xf32, #tpu.memory_space<vmem>>, vector<1x8x13xf32>
    %245 = vector.shape_cast %244 : vector<1x8x13xf32> to vector<8x13xf32>
    %c5_271 = arith.constant 5 : index
    %c0_272 = arith.constant 0 : index
    %c0_273 = arith.constant 0 : index
    %246 = vector.load %arg2[%c5_271, %c0_272, %c0_273] : memref<9x13x64xf32, #tpu.memory_space<vmem>>, vector<1x13x64xf32>
    %247 = vector.shape_cast %246 : vector<1x13x64xf32> to vector<13x64xf32>
    %cst_274 = arith.constant dense<0.000000e+00> : vector<8x64xf32>
    %248 = tpu.matmul %245, %247, %cst_274 {dimension_numbers = #tpu.dot_dimension_numbers<[1], [0], [0], [1], [0, 0, 1, 1], [], []>} : vector<8x13xf32>, vector<13x64xf32>, vector<8x64xf32> -> vector<8x64xf32>
    %249 = arith.addf %243, %248 : vector<8x64xf32>
    %c16_275 = arith.constant 16 : index
    %c0_276 = arith.constant 0 : index
    %c0_277 = arith.constant 0 : index
    %250 = vector.load %arg1[%c16_275, %c0_276, %c0_277] : memref<25x8x13xf32, #tpu.memory_space<vmem>>, vector<1x8x13xf32>
    %251 = vector.shape_cast %250 : vector<1x8x13xf32> to vector<8x13xf32>
    %c6_278 = arith.constant 6 : index
    %c0_279 = arith.constant 0 : index
    %c0_280 = arith.constant 0 : index
    %252 = vector.load %arg2[%c6_278, %c0_279, %c0_280] : memref<9x13x64xf32, #tpu.memory_space<vmem>>, vector<1x13x64xf32>
    %253 = vector.shape_cast %252 : vector<1x13x64xf32> to vector<13x64xf32>
    %cst_281 = arith.constant dense<0.000000e+00> : vector<8x64xf32>
    %254 = tpu.matmul %251, %253, %cst_281 {dimension_numbers = #tpu.dot_dimension_numbers<[1], [0], [0], [1], [0, 0, 1, 1], [], []>} : vector<8x13xf32>, vector<13x64xf32>, vector<8x64xf32> -> vector<8x64xf32>
    %255 = arith.addf %249, %254 : vector<8x64xf32>
    %c17_282 = arith.constant 17 : index
    %c0_283 = arith.constant 0 : index
    %c0_284 = arith.constant 0 : index
    %256 = vector.load %arg1[%c17_282, %c0_283, %c0_284] : memref<25x8x13xf32, #tpu.memory_space<vmem>>, vector<1x8x13xf32>
    %257 = vector.shape_cast %256 : vector<1x8x13xf32> to vector<8x13xf32>
    %c7_285 = arith.constant 7 : index
    %c0_286 = arith.constant 0 : index
    %c0_287 = arith.constant 0 : index
    %258 = vector.load %arg2[%c7_285, %c0_286, %c0_287] : memref<9x13x64xf32, #tpu.memory_space<vmem>>, vector<1x13x64xf32>
    %259 = vector.shape_cast %258 : vector<1x13x64xf32> to vector<13x64xf32>
    %cst_288 = arith.constant dense<0.000000e+00> : vector<8x64xf32>
    %260 = tpu.matmul %257, %259, %cst_288 {dimension_numbers = #tpu.dot_dimension_numbers<[1], [0], [0], [1], [0, 0, 1, 1], [], []>} : vector<8x13xf32>, vector<13x64xf32>, vector<8x64xf32> -> vector<8x64xf32>
    %261 = arith.addf %255, %260 : vector<8x64xf32>
    %c18 = arith.constant 18 : index
    %c0_289 = arith.constant 0 : index
    %c0_290 = arith.constant 0 : index
    %262 = vector.load %arg1[%c18, %c0_289, %c0_290] : memref<25x8x13xf32, #tpu.memory_space<vmem>>, vector<1x8x13xf32>
    %263 = vector.shape_cast %262 : vector<1x8x13xf32> to vector<8x13xf32>
    %c8_291 = arith.constant 8 : index
    %c0_292 = arith.constant 0 : index
    %c0_293 = arith.constant 0 : index
    %264 = vector.load %arg2[%c8_291, %c0_292, %c0_293] : memref<9x13x64xf32, #tpu.memory_space<vmem>>, vector<1x13x64xf32>
    %265 = vector.shape_cast %264 : vector<1x13x64xf32> to vector<13x64xf32>
    %cst_294 = arith.constant dense<0.000000e+00> : vector<8x64xf32>
    %266 = tpu.matmul %263, %265, %cst_294 {dimension_numbers = #tpu.dot_dimension_numbers<[1], [0], [0], [1], [0, 0, 1, 1], [], []>} : vector<8x13xf32>, vector<13x64xf32>, vector<8x64xf32> -> vector<8x64xf32>
    %267 = arith.addf %261, %266 : vector<8x64xf32>
    %268 = arith.maximumf %214, %267 : vector<8x64xf32>
    %c7_295 = arith.constant 7 : index
    %c0_296 = arith.constant 0 : index
    %c0_297 = arith.constant 0 : index
    %269 = vector.load %arg1[%c7_295, %c0_296, %c0_297] : memref<25x8x13xf32, #tpu.memory_space<vmem>>, vector<1x8x13xf32>
    %270 = vector.shape_cast %269 : vector<1x8x13xf32> to vector<8x13xf32>
    %c0_298 = arith.constant 0 : index
    %c0_299 = arith.constant 0 : index
    %c0_300 = arith.constant 0 : index
    %271 = vector.load %arg2[%c0_298, %c0_299, %c0_300] : memref<9x13x64xf32, #tpu.memory_space<vmem>>, vector<1x13x64xf32>
    %272 = vector.shape_cast %271 : vector<1x13x64xf32> to vector<13x64xf32>
    %cst_301 = arith.constant dense<0.000000e+00> : vector<8x64xf32>
    %273 = tpu.matmul %270, %272, %cst_301 {dimension_numbers = #tpu.dot_dimension_numbers<[1], [0], [0], [1], [0, 0, 1, 1], [], []>} : vector<8x13xf32>, vector<13x64xf32>, vector<8x64xf32> -> vector<8x64xf32>
    %c8_302 = arith.constant 8 : index
    %c0_303 = arith.constant 0 : index
    %c0_304 = arith.constant 0 : index
    %274 = vector.load %arg1[%c8_302, %c0_303, %c0_304] : memref<25x8x13xf32, #tpu.memory_space<vmem>>, vector<1x8x13xf32>
    %275 = vector.shape_cast %274 : vector<1x8x13xf32> to vector<8x13xf32>
    %c1_305 = arith.constant 1 : index
    %c0_306 = arith.constant 0 : index
    %c0_307 = arith.constant 0 : index
    %276 = vector.load %arg2[%c1_305, %c0_306, %c0_307] : memref<9x13x64xf32, #tpu.memory_space<vmem>>, vector<1x13x64xf32>
    %277 = vector.shape_cast %276 : vector<1x13x64xf32> to vector<13x64xf32>
    %cst_308 = arith.constant dense<0.000000e+00> : vector<8x64xf32>
    %278 = tpu.matmul %275, %277, %cst_308 {dimension_numbers = #tpu.dot_dimension_numbers<[1], [0], [0], [1], [0, 0, 1, 1], [], []>} : vector<8x13xf32>, vector<13x64xf32>, vector<8x64xf32> -> vector<8x64xf32>
    %279 = arith.addf %273, %278 : vector<8x64xf32>
    %c9_309 = arith.constant 9 : index
    %c0_310 = arith.constant 0 : index
    %c0_311 = arith.constant 0 : index
    %280 = vector.load %arg1[%c9_309, %c0_310, %c0_311] : memref<25x8x13xf32, #tpu.memory_space<vmem>>, vector<1x8x13xf32>
    %281 = vector.shape_cast %280 : vector<1x8x13xf32> to vector<8x13xf32>
    %c2_312 = arith.constant 2 : index
    %c0_313 = arith.constant 0 : index
    %c0_314 = arith.constant 0 : index
    %282 = vector.load %arg2[%c2_312, %c0_313, %c0_314] : memref<9x13x64xf32, #tpu.memory_space<vmem>>, vector<1x13x64xf32>
    %283 = vector.shape_cast %282 : vector<1x13x64xf32> to vector<13x64xf32>
    %cst_315 = arith.constant dense<0.000000e+00> : vector<8x64xf32>
    %284 = tpu.matmul %281, %283, %cst_315 {dimension_numbers = #tpu.dot_dimension_numbers<[1], [0], [0], [1], [0, 0, 1, 1], [], []>} : vector<8x13xf32>, vector<13x64xf32>, vector<8x64xf32> -> vector<8x64xf32>
    %285 = arith.addf %279, %284 : vector<8x64xf32>
    %c12_316 = arith.constant 12 : index
    %c0_317 = arith.constant 0 : index
    %c0_318 = arith.constant 0 : index
    %286 = vector.load %arg1[%c12_316, %c0_317, %c0_318] : memref<25x8x13xf32, #tpu.memory_space<vmem>>, vector<1x8x13xf32>
    %287 = vector.shape_cast %286 : vector<1x8x13xf32> to vector<8x13xf32>
    %c3_319 = arith.constant 3 : index
    %c0_320 = arith.constant 0 : index
    %c0_321 = arith.constant 0 : index
    %288 = vector.load %arg2[%c3_319, %c0_320, %c0_321] : memref<9x13x64xf32, #tpu.memory_space<vmem>>, vector<1x13x64xf32>
    %289 = vector.shape_cast %288 : vector<1x13x64xf32> to vector<13x64xf32>
    %cst_322 = arith.constant dense<0.000000e+00> : vector<8x64xf32>
    %290 = tpu.matmul %287, %289, %cst_322 {dimension_numbers = #tpu.dot_dimension_numbers<[1], [0], [0], [1], [0, 0, 1, 1], [], []>} : vector<8x13xf32>, vector<13x64xf32>, vector<8x64xf32> -> vector<8x64xf32>
    %291 = arith.addf %285, %290 : vector<8x64xf32>
    %c13_323 = arith.constant 13 : index
    %c0_324 = arith.constant 0 : index
    %c0_325 = arith.constant 0 : index
    %292 = vector.load %arg1[%c13_323, %c0_324, %c0_325] : memref<25x8x13xf32, #tpu.memory_space<vmem>>, vector<1x8x13xf32>
    %293 = vector.shape_cast %292 : vector<1x8x13xf32> to vector<8x13xf32>
    %c4_326 = arith.constant 4 : index
    %c0_327 = arith.constant 0 : index
    %c0_328 = arith.constant 0 : index
    %294 = vector.load %arg2[%c4_326, %c0_327, %c0_328] : memref<9x13x64xf32, #tpu.memory_space<vmem>>, vector<1x13x64xf32>
    %295 = vector.shape_cast %294 : vector<1x13x64xf32> to vector<13x64xf32>
    %cst_329 = arith.constant dense<0.000000e+00> : vector<8x64xf32>
    %296 = tpu.matmul %293, %295, %cst_329 {dimension_numbers = #tpu.dot_dimension_numbers<[1], [0], [0], [1], [0, 0, 1, 1], [], []>} : vector<8x13xf32>, vector<13x64xf32>, vector<8x64xf32> -> vector<8x64xf32>
    %297 = arith.addf %291, %296 : vector<8x64xf32>
    %c14_330 = arith.constant 14 : index
    %c0_331 = arith.constant 0 : index
    %c0_332 = arith.constant 0 : index
    %298 = vector.load %arg1[%c14_330, %c0_331, %c0_332] : memref<25x8x13xf32, #tpu.memory_space<vmem>>, vector<1x8x13xf32>
    %299 = vector.shape_cast %298 : vector<1x8x13xf32> to vector<8x13xf32>
    %c5_333 = arith.constant 5 : index
    %c0_334 = arith.constant 0 : index
    %c0_335 = arith.constant 0 : index
    %300 = vector.load %arg2[%c5_333, %c0_334, %c0_335] : memref<9x13x64xf32, #tpu.memory_space<vmem>>, vector<1x13x64xf32>
    %301 = vector.shape_cast %300 : vector<1x13x64xf32> to vector<13x64xf32>
    %cst_336 = arith.constant dense<0.000000e+00> : vector<8x64xf32>
    %302 = tpu.matmul %299, %301, %cst_336 {dimension_numbers = #tpu.dot_dimension_numbers<[1], [0], [0], [1], [0, 0, 1, 1], [], []>} : vector<8x13xf32>, vector<13x64xf32>, vector<8x64xf32> -> vector<8x64xf32>
    %303 = arith.addf %297, %302 : vector<8x64xf32>
    %c17_337 = arith.constant 17 : index
    %c0_338 = arith.constant 0 : index
    %c0_339 = arith.constant 0 : index
    %304 = vector.load %arg1[%c17_337, %c0_338, %c0_339] : memref<25x8x13xf32, #tpu.memory_space<vmem>>, vector<1x8x13xf32>
    %305 = vector.shape_cast %304 : vector<1x8x13xf32> to vector<8x13xf32>
    %c6_340 = arith.constant 6 : index
    %c0_341 = arith.constant 0 : index
    %c0_342 = arith.constant 0 : index
    %306 = vector.load %arg2[%c6_340, %c0_341, %c0_342] : memref<9x13x64xf32, #tpu.memory_space<vmem>>, vector<1x13x64xf32>
    %307 = vector.shape_cast %306 : vector<1x13x64xf32> to vector<13x64xf32>
    %cst_343 = arith.constant dense<0.000000e+00> : vector<8x64xf32>
    %308 = tpu.matmul %305, %307, %cst_343 {dimension_numbers = #tpu.dot_dimension_numbers<[1], [0], [0], [1], [0, 0, 1, 1], [], []>} : vector<8x13xf32>, vector<13x64xf32>, vector<8x64xf32> -> vector<8x64xf32>
    %309 = arith.addf %303, %308 : vector<8x64xf32>
    %c18_344 = arith.constant 18 : index
    %c0_345 = arith.constant 0 : index
    %c0_346 = arith.constant 0 : index
    %310 = vector.load %arg1[%c18_344, %c0_345, %c0_346] : memref<25x8x13xf32, #tpu.memory_space<vmem>>, vector<1x8x13xf32>
    %311 = vector.shape_cast %310 : vector<1x8x13xf32> to vector<8x13xf32>
    %c7_347 = arith.constant 7 : index
    %c0_348 = arith.constant 0 : index
    %c0_349 = arith.constant 0 : index
    %312 = vector.load %arg2[%c7_347, %c0_348, %c0_349] : memref<9x13x64xf32, #tpu.memory_space<vmem>>, vector<1x13x64xf32>
    %313 = vector.shape_cast %312 : vector<1x13x64xf32> to vector<13x64xf32>
    %cst_350 = arith.constant dense<0.000000e+00> : vector<8x64xf32>
    %314 = tpu.matmul %311, %313, %cst_350 {dimension_numbers = #tpu.dot_dimension_numbers<[1], [0], [0], [1], [0, 0, 1, 1], [], []>} : vector<8x13xf32>, vector<13x64xf32>, vector<8x64xf32> -> vector<8x64xf32>
    %315 = arith.addf %309, %314 : vector<8x64xf32>
    %c19 = arith.constant 19 : index
    %c0_351 = arith.constant 0 : index
    %c0_352 = arith.constant 0 : index
    %316 = vector.load %arg1[%c19, %c0_351, %c0_352] : memref<25x8x13xf32, #tpu.memory_space<vmem>>, vector<1x8x13xf32>
    %317 = vector.shape_cast %316 : vector<1x8x13xf32> to vector<8x13xf32>
    %c8_353 = arith.constant 8 : index
    %c0_354 = arith.constant 0 : index
    %c0_355 = arith.constant 0 : index
    %318 = vector.load %arg2[%c8_353, %c0_354, %c0_355] : memref<9x13x64xf32, #tpu.memory_space<vmem>>, vector<1x13x64xf32>
    %319 = vector.shape_cast %318 : vector<1x13x64xf32> to vector<13x64xf32>
    %cst_356 = arith.constant dense<0.000000e+00> : vector<8x64xf32>
    %320 = tpu.matmul %317, %319, %cst_356 {dimension_numbers = #tpu.dot_dimension_numbers<[1], [0], [0], [1], [0, 0, 1, 1], [], []>} : vector<8x13xf32>, vector<13x64xf32>, vector<8x64xf32> -> vector<8x64xf32>
    %321 = arith.addf %315, %320 : vector<8x64xf32>
    %322 = arith.maximumf %268, %321 : vector<8x64xf32>
    %c10_357 = arith.constant 10 : index
    %c0_358 = arith.constant 0 : index
    %c0_359 = arith.constant 0 : index
    %323 = vector.load %arg1[%c10_357, %c0_358, %c0_359] : memref<25x8x13xf32, #tpu.memory_space<vmem>>, vector<1x8x13xf32>
    %324 = vector.shape_cast %323 : vector<1x8x13xf32> to vector<8x13xf32>
    %c0_360 = arith.constant 0 : index
    %c0_361 = arith.constant 0 : index
    %c0_362 = arith.constant 0 : index
    %325 = vector.load %arg2[%c0_360, %c0_361, %c0_362] : memref<9x13x64xf32, #tpu.memory_space<vmem>>, vector<1x13x64xf32>
    %326 = vector.shape_cast %325 : vector<1x13x64xf32> to vector<13x64xf32>
    %cst_363 = arith.constant dense<0.000000e+00> : vector<8x64xf32>
    %327 = tpu.matmul %324, %326, %cst_363 {dimension_numbers = #tpu.dot_dimension_numbers<[1], [0], [0], [1], [0, 0, 1, 1], [], []>} : vector<8x13xf32>, vector<13x64xf32>, vector<8x64xf32> -> vector<8x64xf32>
    %c11_364 = arith.constant 11 : index
    %c0_365 = arith.constant 0 : index
    %c0_366 = arith.constant 0 : index
    %328 = vector.load %arg1[%c11_364, %c0_365, %c0_366] : memref<25x8x13xf32, #tpu.memory_space<vmem>>, vector<1x8x13xf32>
    %329 = vector.shape_cast %328 : vector<1x8x13xf32> to vector<8x13xf32>
    %c1_367 = arith.constant 1 : index
    %c0_368 = arith.constant 0 : index
    %c0_369 = arith.constant 0 : index
    %330 = vector.load %arg2[%c1_367, %c0_368, %c0_369] : memref<9x13x64xf32, #tpu.memory_space<vmem>>, vector<1x13x64xf32>
    %331 = vector.shape_cast %330 : vector<1x13x64xf32> to vector<13x64xf32>
    %cst_370 = arith.constant dense<0.000000e+00> : vector<8x64xf32>
    %332 = tpu.matmul %329, %331, %cst_370 {dimension_numbers = #tpu.dot_dimension_numbers<[1], [0], [0], [1], [0, 0, 1, 1], [], []>} : vector<8x13xf32>, vector<13x64xf32>, vector<8x64xf32> -> vector<8x64xf32>
    %333 = arith.addf %327, %332 : vector<8x64xf32>
    %c12_371 = arith.constant 12 : index
    %c0_372 = arith.constant 0 : index
    %c0_373 = arith.constant 0 : index
    %334 = vector.load %arg1[%c12_371, %c0_372, %c0_373] : memref<25x8x13xf32, #tpu.memory_space<vmem>>, vector<1x8x13xf32>
    %335 = vector.shape_cast %334 : vector<1x8x13xf32> to vector<8x13xf32>
    %c2_374 = arith.constant 2 : index
    %c0_375 = arith.constant 0 : index
    %c0_376 = arith.constant 0 : index
    %336 = vector.load %arg2[%c2_374, %c0_375, %c0_376] : memref<9x13x64xf32, #tpu.memory_space<vmem>>, vector<1x13x64xf32>
    %337 = vector.shape_cast %336 : vector<1x13x64xf32> to vector<13x64xf32>
    %cst_377 = arith.constant dense<0.000000e+00> : vector<8x64xf32>
    %338 = tpu.matmul %335, %337, %cst_377 {dimension_numbers = #tpu.dot_dimension_numbers<[1], [0], [0], [1], [0, 0, 1, 1], [], []>} : vector<8x13xf32>, vector<13x64xf32>, vector<8x64xf32> -> vector<8x64xf32>
    %339 = arith.addf %333, %338 : vector<8x64xf32>
    %c15_378 = arith.constant 15 : index
    %c0_379 = arith.constant 0 : index
    %c0_380 = arith.constant 0 : index
    %340 = vector.load %arg1[%c15_378, %c0_379, %c0_380] : memref<25x8x13xf32, #tpu.memory_space<vmem>>, vector<1x8x13xf32>
    %341 = vector.shape_cast %340 : vector<1x8x13xf32> to vector<8x13xf32>
    %c3_381 = arith.constant 3 : index
    %c0_382 = arith.constant 0 : index
    %c0_383 = arith.constant 0 : index
    %342 = vector.load %arg2[%c3_381, %c0_382, %c0_383] : memref<9x13x64xf32, #tpu.memory_space<vmem>>, vector<1x13x64xf32>
    %343 = vector.shape_cast %342 : vector<1x13x64xf32> to vector<13x64xf32>
    %cst_384 = arith.constant dense<0.000000e+00> : vector<8x64xf32>
    %344 = tpu.matmul %341, %343, %cst_384 {dimension_numbers = #tpu.dot_dimension_numbers<[1], [0], [0], [1], [0, 0, 1, 1], [], []>} : vector<8x13xf32>, vector<13x64xf32>, vector<8x64xf32> -> vector<8x64xf32>
    %345 = arith.addf %339, %344 : vector<8x64xf32>
    %c16_385 = arith.constant 16 : index
    %c0_386 = arith.constant 0 : index
    %c0_387 = arith.constant 0 : index
    %346 = vector.load %arg1[%c16_385, %c0_386, %c0_387] : memref<25x8x13xf32, #tpu.memory_space<vmem>>, vector<1x8x13xf32>
    %347 = vector.shape_cast %346 : vector<1x8x13xf32> to vector<8x13xf32>
    %c4_388 = arith.constant 4 : index
    %c0_389 = arith.constant 0 : index
    %c0_390 = arith.constant 0 : index
    %348 = vector.load %arg2[%c4_388, %c0_389, %c0_390] : memref<9x13x64xf32, #tpu.memory_space<vmem>>, vector<1x13x64xf32>
    %349 = vector.shape_cast %348 : vector<1x13x64xf32> to vector<13x64xf32>
    %cst_391 = arith.constant dense<0.000000e+00> : vector<8x64xf32>
    %350 = tpu.matmul %347, %349, %cst_391 {dimension_numbers = #tpu.dot_dimension_numbers<[1], [0], [0], [1], [0, 0, 1, 1], [], []>} : vector<8x13xf32>, vector<13x64xf32>, vector<8x64xf32> -> vector<8x64xf32>
    %351 = arith.addf %345, %350 : vector<8x64xf32>
    %c17_392 = arith.constant 17 : index
    %c0_393 = arith.constant 0 : index
    %c0_394 = arith.constant 0 : index
    %352 = vector.load %arg1[%c17_392, %c0_393, %c0_394] : memref<25x8x13xf32, #tpu.memory_space<vmem>>, vector<1x8x13xf32>
    %353 = vector.shape_cast %352 : vector<1x8x13xf32> to vector<8x13xf32>
    %c5_395 = arith.constant 5 : index
    %c0_396 = arith.constant 0 : index
    %c0_397 = arith.constant 0 : index
    %354 = vector.load %arg2[%c5_395, %c0_396, %c0_397] : memref<9x13x64xf32, #tpu.memory_space<vmem>>, vector<1x13x64xf32>
    %355 = vector.shape_cast %354 : vector<1x13x64xf32> to vector<13x64xf32>
    %cst_398 = arith.constant dense<0.000000e+00> : vector<8x64xf32>
    %356 = tpu.matmul %353, %355, %cst_398 {dimension_numbers = #tpu.dot_dimension_numbers<[1], [0], [0], [1], [0, 0, 1, 1], [], []>} : vector<8x13xf32>, vector<13x64xf32>, vector<8x64xf32> -> vector<8x64xf32>
    %357 = arith.addf %351, %356 : vector<8x64xf32>
    %c20 = arith.constant 20 : index
    %c0_399 = arith.constant 0 : index
    %c0_400 = arith.constant 0 : index
    %358 = vector.load %arg1[%c20, %c0_399, %c0_400] : memref<25x8x13xf32, #tpu.memory_space<vmem>>, vector<1x8x13xf32>
    %359 = vector.shape_cast %358 : vector<1x8x13xf32> to vector<8x13xf32>
    %c6_401 = arith.constant 6 : index
    %c0_402 = arith.constant 0 : index
    %c0_403 = arith.constant 0 : index
    %360 = vector.load %arg2[%c6_401, %c0_402, %c0_403] : memref<9x13x64xf32, #tpu.memory_space<vmem>>, vector<1x13x64xf32>
    %361 = vector.shape_cast %360 : vector<1x13x64xf32> to vector<13x64xf32>
    %cst_404 = arith.constant dense<0.000000e+00> : vector<8x64xf32>
    %362 = tpu.matmul %359, %361, %cst_404 {dimension_numbers = #tpu.dot_dimension_numbers<[1], [0], [0], [1], [0, 0, 1, 1], [], []>} : vector<8x13xf32>, vector<13x64xf32>, vector<8x64xf32> -> vector<8x64xf32>
    %363 = arith.addf %357, %362 : vector<8x64xf32>
    %c21 = arith.constant 21 : index
    %c0_405 = arith.constant 0 : index
    %c0_406 = arith.constant 0 : index
    %364 = vector.load %arg1[%c21, %c0_405, %c0_406] : memref<25x8x13xf32, #tpu.memory_space<vmem>>, vector<1x8x13xf32>
    %365 = vector.shape_cast %364 : vector<1x8x13xf32> to vector<8x13xf32>
    %c7_407 = arith.constant 7 : index
    %c0_408 = arith.constant 0 : index
    %c0_409 = arith.constant 0 : index
    %366 = vector.load %arg2[%c7_407, %c0_408, %c0_409] : memref<9x13x64xf32, #tpu.memory_space<vmem>>, vector<1x13x64xf32>
    %367 = vector.shape_cast %366 : vector<1x13x64xf32> to vector<13x64xf32>
    %cst_410 = arith.constant dense<0.000000e+00> : vector<8x64xf32>
    %368 = tpu.matmul %365, %367, %cst_410 {dimension_numbers = #tpu.dot_dimension_numbers<[1], [0], [0], [1], [0, 0, 1, 1], [], []>} : vector<8x13xf32>, vector<13x64xf32>, vector<8x64xf32> -> vector<8x64xf32>
    %369 = arith.addf %363, %368 : vector<8x64xf32>
    %c22 = arith.constant 22 : index
    %c0_411 = arith.constant 0 : index
    %c0_412 = arith.constant 0 : index
    %370 = vector.load %arg1[%c22, %c0_411, %c0_412] : memref<25x8x13xf32, #tpu.memory_space<vmem>>, vector<1x8x13xf32>
    %371 = vector.shape_cast %370 : vector<1x8x13xf32> to vector<8x13xf32>
    %c8_413 = arith.constant 8 : index
    %c0_414 = arith.constant 0 : index
    %c0_415 = arith.constant 0 : index
    %372 = vector.load %arg2[%c8_413, %c0_414, %c0_415] : memref<9x13x64xf32, #tpu.memory_space<vmem>>, vector<1x13x64xf32>
    %373 = vector.shape_cast %372 : vector<1x13x64xf32> to vector<13x64xf32>
    %cst_416 = arith.constant dense<0.000000e+00> : vector<8x64xf32>
    %374 = tpu.matmul %371, %373, %cst_416 {dimension_numbers = #tpu.dot_dimension_numbers<[1], [0], [0], [1], [0, 0, 1, 1], [], []>} : vector<8x13xf32>, vector<13x64xf32>, vector<8x64xf32> -> vector<8x64xf32>
    %375 = arith.addf %369, %374 : vector<8x64xf32>
    %376 = arith.maximumf %322, %375 : vector<8x64xf32>
    %c11_417 = arith.constant 11 : index
    %c0_418 = arith.constant 0 : index
    %c0_419 = arith.constant 0 : index
    %377 = vector.load %arg1[%c11_417, %c0_418, %c0_419] : memref<25x8x13xf32, #tpu.memory_space<vmem>>, vector<1x8x13xf32>
    %378 = vector.shape_cast %377 : vector<1x8x13xf32> to vector<8x13xf32>
    %c0_420 = arith.constant 0 : index
    %c0_421 = arith.constant 0 : index
    %c0_422 = arith.constant 0 : index
    %379 = vector.load %arg2[%c0_420, %c0_421, %c0_422] : memref<9x13x64xf32, #tpu.memory_space<vmem>>, vector<1x13x64xf32>
    %380 = vector.shape_cast %379 : vector<1x13x64xf32> to vector<13x64xf32>
    %cst_423 = arith.constant dense<0.000000e+00> : vector<8x64xf32>
    %381 = tpu.matmul %378, %380, %cst_423 {dimension_numbers = #tpu.dot_dimension_numbers<[1], [0], [0], [1], [0, 0, 1, 1], [], []>} : vector<8x13xf32>, vector<13x64xf32>, vector<8x64xf32> -> vector<8x64xf32>
    %c12_424 = arith.constant 12 : index
    %c0_425 = arith.constant 0 : index
    %c0_426 = arith.constant 0 : index
    %382 = vector.load %arg1[%c12_424, %c0_425, %c0_426] : memref<25x8x13xf32, #tpu.memory_space<vmem>>, vector<1x8x13xf32>
    %383 = vector.shape_cast %382 : vector<1x8x13xf32> to vector<8x13xf32>
    %c1_427 = arith.constant 1 : index
    %c0_428 = arith.constant 0 : index
    %c0_429 = arith.constant 0 : index
    %384 = vector.load %arg2[%c1_427, %c0_428, %c0_429] : memref<9x13x64xf32, #tpu.memory_space<vmem>>, vector<1x13x64xf32>
    %385 = vector.shape_cast %384 : vector<1x13x64xf32> to vector<13x64xf32>
    %cst_430 = arith.constant dense<0.000000e+00> : vector<8x64xf32>
    %386 = tpu.matmul %383, %385, %cst_430 {dimension_numbers = #tpu.dot_dimension_numbers<[1], [0], [0], [1], [0, 0, 1, 1], [], []>} : vector<8x13xf32>, vector<13x64xf32>, vector<8x64xf32> -> vector<8x64xf32>
    %387 = arith.addf %381, %386 : vector<8x64xf32>
    %c13_431 = arith.constant 13 : index
    %c0_432 = arith.constant 0 : index
    %c0_433 = arith.constant 0 : index
    %388 = vector.load %arg1[%c13_431, %c0_432, %c0_433] : memref<25x8x13xf32, #tpu.memory_space<vmem>>, vector<1x8x13xf32>
    %389 = vector.shape_cast %388 : vector<1x8x13xf32> to vector<8x13xf32>
    %c2_434 = arith.constant 2 : index
    %c0_435 = arith.constant 0 : index
    %c0_436 = arith.constant 0 : index
    %390 = vector.load %arg2[%c2_434, %c0_435, %c0_436] : memref<9x13x64xf32, #tpu.memory_space<vmem>>, vector<1x13x64xf32>
    %391 = vector.shape_cast %390 : vector<1x13x64xf32> to vector<13x64xf32>
    %cst_437 = arith.constant dense<0.000000e+00> : vector<8x64xf32>
    %392 = tpu.matmul %389, %391, %cst_437 {dimension_numbers = #tpu.dot_dimension_numbers<[1], [0], [0], [1], [0, 0, 1, 1], [], []>} : vector<8x13xf32>, vector<13x64xf32>, vector<8x64xf32> -> vector<8x64xf32>
    %393 = arith.addf %387, %392 : vector<8x64xf32>
    %c16_438 = arith.constant 16 : index
    %c0_439 = arith.constant 0 : index
    %c0_440 = arith.constant 0 : index
    %394 = vector.load %arg1[%c16_438, %c0_439, %c0_440] : memref<25x8x13xf32, #tpu.memory_space<vmem>>, vector<1x8x13xf32>
    %395 = vector.shape_cast %394 : vector<1x8x13xf32> to vector<8x13xf32>
    %c3_441 = arith.constant 3 : index
    %c0_442 = arith.constant 0 : index
    %c0_443 = arith.constant 0 : index
    %396 = vector.load %arg2[%c3_441, %c0_442, %c0_443] : memref<9x13x64xf32, #tpu.memory_space<vmem>>, vector<1x13x64xf32>
    %397 = vector.shape_cast %396 : vector<1x13x64xf32> to vector<13x64xf32>
    %cst_444 = arith.constant dense<0.000000e+00> : vector<8x64xf32>
    %398 = tpu.matmul %395, %397, %cst_444 {dimension_numbers = #tpu.dot_dimension_numbers<[1], [0], [0], [1], [0, 0, 1, 1], [], []>} : vector<8x13xf32>, vector<13x64xf32>, vector<8x64xf32> -> vector<8x64xf32>
    %399 = arith.addf %393, %398 : vector<8x64xf32>
    %c17_445 = arith.constant 17 : index
    %c0_446 = arith.constant 0 : index
    %c0_447 = arith.constant 0 : index
    %400 = vector.load %arg1[%c17_445, %c0_446, %c0_447] : memref<25x8x13xf32, #tpu.memory_space<vmem>>, vector<1x8x13xf32>
    %401 = vector.shape_cast %400 : vector<1x8x13xf32> to vector<8x13xf32>
    %c4_448 = arith.constant 4 : index
    %c0_449 = arith.constant 0 : index
    %c0_450 = arith.constant 0 : index
    %402 = vector.load %arg2[%c4_448, %c0_449, %c0_450] : memref<9x13x64xf32, #tpu.memory_space<vmem>>, vector<1x13x64xf32>
    %403 = vector.shape_cast %402 : vector<1x13x64xf32> to vector<13x64xf32>
    %cst_451 = arith.constant dense<0.000000e+00> : vector<8x64xf32>
    %404 = tpu.matmul %401, %403, %cst_451 {dimension_numbers = #tpu.dot_dimension_numbers<[1], [0], [0], [1], [0, 0, 1, 1], [], []>} : vector<8x13xf32>, vector<13x64xf32>, vector<8x64xf32> -> vector<8x64xf32>
    %405 = arith.addf %399, %404 : vector<8x64xf32>
    %c18_452 = arith.constant 18 : index
    %c0_453 = arith.constant 0 : index
    %c0_454 = arith.constant 0 : index
    %406 = vector.load %arg1[%c18_452, %c0_453, %c0_454] : memref<25x8x13xf32, #tpu.memory_space<vmem>>, vector<1x8x13xf32>
    %407 = vector.shape_cast %406 : vector<1x8x13xf32> to vector<8x13xf32>
    %c5_455 = arith.constant 5 : index
    %c0_456 = arith.constant 0 : index
    %c0_457 = arith.constant 0 : index
    %408 = vector.load %arg2[%c5_455, %c0_456, %c0_457] : memref<9x13x64xf32, #tpu.memory_space<vmem>>, vector<1x13x64xf32>
    %409 = vector.shape_cast %408 : vector<1x13x64xf32> to vector<13x64xf32>
    %cst_458 = arith.constant dense<0.000000e+00> : vector<8x64xf32>
    %410 = tpu.matmul %407, %409, %cst_458 {dimension_numbers = #tpu.dot_dimension_numbers<[1], [0], [0], [1], [0, 0, 1, 1], [], []>} : vector<8x13xf32>, vector<13x64xf32>, vector<8x64xf32> -> vector<8x64xf32>
    %411 = arith.addf %405, %410 : vector<8x64xf32>
    %c21_459 = arith.constant 21 : index
    %c0_460 = arith.constant 0 : index
    %c0_461 = arith.constant 0 : index
    %412 = vector.load %arg1[%c21_459, %c0_460, %c0_461] : memref<25x8x13xf32, #tpu.memory_space<vmem>>, vector<1x8x13xf32>
    %413 = vector.shape_cast %412 : vector<1x8x13xf32> to vector<8x13xf32>
    %c6_462 = arith.constant 6 : index
    %c0_463 = arith.constant 0 : index
    %c0_464 = arith.constant 0 : index
    %414 = vector.load %arg2[%c6_462, %c0_463, %c0_464] : memref<9x13x64xf32, #tpu.memory_space<vmem>>, vector<1x13x64xf32>
    %415 = vector.shape_cast %414 : vector<1x13x64xf32> to vector<13x64xf32>
    %cst_465 = arith.constant dense<0.000000e+00> : vector<8x64xf32>
    %416 = tpu.matmul %413, %415, %cst_465 {dimension_numbers = #tpu.dot_dimension_numbers<[1], [0], [0], [1], [0, 0, 1, 1], [], []>} : vector<8x13xf32>, vector<13x64xf32>, vector<8x64xf32> -> vector<8x64xf32>
    %417 = arith.addf %411, %416 : vector<8x64xf32>
    %c22_466 = arith.constant 22 : index
    %c0_467 = arith.constant 0 : index
    %c0_468 = arith.constant 0 : index
    %418 = vector.load %arg1[%c22_466, %c0_467, %c0_468] : memref<25x8x13xf32, #tpu.memory_space<vmem>>, vector<1x8x13xf32>
    %419 = vector.shape_cast %418 : vector<1x8x13xf32> to vector<8x13xf32>
    %c7_469 = arith.constant 7 : index
    %c0_470 = arith.constant 0 : index
    %c0_471 = arith.constant 0 : index
    %420 = vector.load %arg2[%c7_469, %c0_470, %c0_471] : memref<9x13x64xf32, #tpu.memory_space<vmem>>, vector<1x13x64xf32>
    %421 = vector.shape_cast %420 : vector<1x13x64xf32> to vector<13x64xf32>
    %cst_472 = arith.constant dense<0.000000e+00> : vector<8x64xf32>
    %422 = tpu.matmul %419, %421, %cst_472 {dimension_numbers = #tpu.dot_dimension_numbers<[1], [0], [0], [1], [0, 0, 1, 1], [], []>} : vector<8x13xf32>, vector<13x64xf32>, vector<8x64xf32> -> vector<8x64xf32>
    %423 = arith.addf %417, %422 : vector<8x64xf32>
    %c23 = arith.constant 23 : index
    %c0_473 = arith.constant 0 : index
    %c0_474 = arith.constant 0 : index
    %424 = vector.load %arg1[%c23, %c0_473, %c0_474] : memref<25x8x13xf32, #tpu.memory_space<vmem>>, vector<1x8x13xf32>
    %425 = vector.shape_cast %424 : vector<1x8x13xf32> to vector<8x13xf32>
    %c8_475 = arith.constant 8 : index
    %c0_476 = arith.constant 0 : index
    %c0_477 = arith.constant 0 : index
    %426 = vector.load %arg2[%c8_475, %c0_476, %c0_477] : memref<9x13x64xf32, #tpu.memory_space<vmem>>, vector<1x13x64xf32>
    %427 = vector.shape_cast %426 : vector<1x13x64xf32> to vector<13x64xf32>
    %cst_478 = arith.constant dense<0.000000e+00> : vector<8x64xf32>
    %428 = tpu.matmul %425, %427, %cst_478 {dimension_numbers = #tpu.dot_dimension_numbers<[1], [0], [0], [1], [0, 0, 1, 1], [], []>} : vector<8x13xf32>, vector<13x64xf32>, vector<8x64xf32> -> vector<8x64xf32>
    %429 = arith.addf %423, %428 : vector<8x64xf32>
    %430 = arith.maximumf %376, %429 : vector<8x64xf32>
    %c12_479 = arith.constant 12 : index
    %c0_480 = arith.constant 0 : index
    %c0_481 = arith.constant 0 : index
    %431 = vector.load %arg1[%c12_479, %c0_480, %c0_481] : memref<25x8x13xf32, #tpu.memory_space<vmem>>, vector<1x8x13xf32>
    %432 = vector.shape_cast %431 : vector<1x8x13xf32> to vector<8x13xf32>
    %c0_482 = arith.constant 0 : index
    %c0_483 = arith.constant 0 : index
    %c0_484 = arith.constant 0 : index
    %433 = vector.load %arg2[%c0_482, %c0_483, %c0_484] : memref<9x13x64xf32, #tpu.memory_space<vmem>>, vector<1x13x64xf32>
    %434 = vector.shape_cast %433 : vector<1x13x64xf32> to vector<13x64xf32>
    %cst_485 = arith.constant dense<0.000000e+00> : vector<8x64xf32>
    %435 = tpu.matmul %432, %434, %cst_485 {dimension_numbers = #tpu.dot_dimension_numbers<[1], [0], [0], [1], [0, 0, 1, 1], [], []>} : vector<8x13xf32>, vector<13x64xf32>, vector<8x64xf32> -> vector<8x64xf32>
    %c13_486 = arith.constant 13 : index
    %c0_487 = arith.constant 0 : index
    %c0_488 = arith.constant 0 : index
    %436 = vector.load %arg1[%c13_486, %c0_487, %c0_488] : memref<25x8x13xf32, #tpu.memory_space<vmem>>, vector<1x8x13xf32>
    %437 = vector.shape_cast %436 : vector<1x8x13xf32> to vector<8x13xf32>
    %c1_489 = arith.constant 1 : index
    %c0_490 = arith.constant 0 : index
    %c0_491 = arith.constant 0 : index
    %438 = vector.load %arg2[%c1_489, %c0_490, %c0_491] : memref<9x13x64xf32, #tpu.memory_space<vmem>>, vector<1x13x64xf32>
    %439 = vector.shape_cast %438 : vector<1x13x64xf32> to vector<13x64xf32>
    %cst_492 = arith.constant dense<0.000000e+00> : vector<8x64xf32>
    %440 = tpu.matmul %437, %439, %cst_492 {dimension_numbers = #tpu.dot_dimension_numbers<[1], [0], [0], [1], [0, 0, 1, 1], [], []>} : vector<8x13xf32>, vector<13x64xf32>, vector<8x64xf32> -> vector<8x64xf32>
    %441 = arith.addf %435, %440 : vector<8x64xf32>
    %c14_493 = arith.constant 14 : index
    %c0_494 = arith.constant 0 : index
    %c0_495 = arith.constant 0 : index
    %442 = vector.load %arg1[%c14_493, %c0_494, %c0_495] : memref<25x8x13xf32, #tpu.memory_space<vmem>>, vector<1x8x13xf32>
    %443 = vector.shape_cast %442 : vector<1x8x13xf32> to vector<8x13xf32>
    %c2_496 = arith.constant 2 : index
    %c0_497 = arith.constant 0 : index
    %c0_498 = arith.constant 0 : index
    %444 = vector.load %arg2[%c2_496, %c0_497, %c0_498] : memref<9x13x64xf32, #tpu.memory_space<vmem>>, vector<1x13x64xf32>
    %445 = vector.shape_cast %444 : vector<1x13x64xf32> to vector<13x64xf32>
    %cst_499 = arith.constant dense<0.000000e+00> : vector<8x64xf32>
    %446 = tpu.matmul %443, %445, %cst_499 {dimension_numbers = #tpu.dot_dimension_numbers<[1], [0], [0], [1], [0, 0, 1, 1], [], []>} : vector<8x13xf32>, vector<13x64xf32>, vector<8x64xf32> -> vector<8x64xf32>
    %447 = arith.addf %441, %446 : vector<8x64xf32>
    %c17_500 = arith.constant 17 : index
    %c0_501 = arith.constant 0 : index
    %c0_502 = arith.constant 0 : index
    %448 = vector.load %arg1[%c17_500, %c0_501, %c0_502] : memref<25x8x13xf32, #tpu.memory_space<vmem>>, vector<1x8x13xf32>
    %449 = vector.shape_cast %448 : vector<1x8x13xf32> to vector<8x13xf32>
    %c3_503 = arith.constant 3 : index
    %c0_504 = arith.constant 0 : index
    %c0_505 = arith.constant 0 : index
    %450 = vector.load %arg2[%c3_503, %c0_504, %c0_505] : memref<9x13x64xf32, #tpu.memory_space<vmem>>, vector<1x13x64xf32>
    %451 = vector.shape_cast %450 : vector<1x13x64xf32> to vector<13x64xf32>
    %cst_506 = arith.constant dense<0.000000e+00> : vector<8x64xf32>
    %452 = tpu.matmul %449, %451, %cst_506 {dimension_numbers = #tpu.dot_dimension_numbers<[1], [0], [0], [1], [0, 0, 1, 1], [], []>} : vector<8x13xf32>, vector<13x64xf32>, vector<8x64xf32> -> vector<8x64xf32>
    %453 = arith.addf %447, %452 : vector<8x64xf32>
    %c18_507 = arith.constant 18 : index
    %c0_508 = arith.constant 0 : index
    %c0_509 = arith.constant 0 : index
    %454 = vector.load %arg1[%c18_507, %c0_508, %c0_509] : memref<25x8x13xf32, #tpu.memory_space<vmem>>, vector<1x8x13xf32>
    %455 = vector.shape_cast %454 : vector<1x8x13xf32> to vector<8x13xf32>
    %c4_510 = arith.constant 4 : index
    %c0_511 = arith.constant 0 : index
    %c0_512 = arith.constant 0 : index
    %456 = vector.load %arg2[%c4_510, %c0_511, %c0_512] : memref<9x13x64xf32, #tpu.memory_space<vmem>>, vector<1x13x64xf32>
    %457 = vector.shape_cast %456 : vector<1x13x64xf32> to vector<13x64xf32>
    %cst_513 = arith.constant dense<0.000000e+00> : vector<8x64xf32>
    %458 = tpu.matmul %455, %457, %cst_513 {dimension_numbers = #tpu.dot_dimension_numbers<[1], [0], [0], [1], [0, 0, 1, 1], [], []>} : vector<8x13xf32>, vector<13x64xf32>, vector<8x64xf32> -> vector<8x64xf32>
    %459 = arith.addf %453, %458 : vector<8x64xf32>
    %c19_514 = arith.constant 19 : index
    %c0_515 = arith.constant 0 : index
    %c0_516 = arith.constant 0 : index
    %460 = vector.load %arg1[%c19_514, %c0_515, %c0_516] : memref<25x8x13xf32, #tpu.memory_space<vmem>>, vector<1x8x13xf32>
    %461 = vector.shape_cast %460 : vector<1x8x13xf32> to vector<8x13xf32>
    %c5_517 = arith.constant 5 : index
    %c0_518 = arith.constant 0 : index
    %c0_519 = arith.constant 0 : index
    %462 = vector.load %arg2[%c5_517, %c0_518, %c0_519] : memref<9x13x64xf32, #tpu.memory_space<vmem>>, vector<1x13x64xf32>
    %463 = vector.shape_cast %462 : vector<1x13x64xf32> to vector<13x64xf32>
    %cst_520 = arith.constant dense<0.000000e+00> : vector<8x64xf32>
    %464 = tpu.matmul %461, %463, %cst_520 {dimension_numbers = #tpu.dot_dimension_numbers<[1], [0], [0], [1], [0, 0, 1, 1], [], []>} : vector<8x13xf32>, vector<13x64xf32>, vector<8x64xf32> -> vector<8x64xf32>
    %465 = arith.addf %459, %464 : vector<8x64xf32>
    %c22_521 = arith.constant 22 : index
    %c0_522 = arith.constant 0 : index
    %c0_523 = arith.constant 0 : index
    %466 = vector.load %arg1[%c22_521, %c0_522, %c0_523] : memref<25x8x13xf32, #tpu.memory_space<vmem>>, vector<1x8x13xf32>
    %467 = vector.shape_cast %466 : vector<1x8x13xf32> to vector<8x13xf32>
    %c6_524 = arith.constant 6 : index
    %c0_525 = arith.constant 0 : index
    %c0_526 = arith.constant 0 : index
    %468 = vector.load %arg2[%c6_524, %c0_525, %c0_526] : memref<9x13x64xf32, #tpu.memory_space<vmem>>, vector<1x13x64xf32>
    %469 = vector.shape_cast %468 : vector<1x13x64xf32> to vector<13x64xf32>
    %cst_527 = arith.constant dense<0.000000e+00> : vector<8x64xf32>
    %470 = tpu.matmul %467, %469, %cst_527 {dimension_numbers = #tpu.dot_dimension_numbers<[1], [0], [0], [1], [0, 0, 1, 1], [], []>} : vector<8x13xf32>, vector<13x64xf32>, vector<8x64xf32> -> vector<8x64xf32>
    %471 = arith.addf %465, %470 : vector<8x64xf32>
    %c23_528 = arith.constant 23 : index
    %c0_529 = arith.constant 0 : index
    %c0_530 = arith.constant 0 : index
    %472 = vector.load %arg1[%c23_528, %c0_529, %c0_530] : memref<25x8x13xf32, #tpu.memory_space<vmem>>, vector<1x8x13xf32>
    %473 = vector.shape_cast %472 : vector<1x8x13xf32> to vector<8x13xf32>
    %c7_531 = arith.constant 7 : index
    %c0_532 = arith.constant 0 : index
    %c0_533 = arith.constant 0 : index
    %474 = vector.load %arg2[%c7_531, %c0_532, %c0_533] : memref<9x13x64xf32, #tpu.memory_space<vmem>>, vector<1x13x64xf32>
    %475 = vector.shape_cast %474 : vector<1x13x64xf32> to vector<13x64xf32>
    %cst_534 = arith.constant dense<0.000000e+00> : vector<8x64xf32>
    %476 = tpu.matmul %473, %475, %cst_534 {dimension_numbers = #tpu.dot_dimension_numbers<[1], [0], [0], [1], [0, 0, 1, 1], [], []>} : vector<8x13xf32>, vector<13x64xf32>, vector<8x64xf32> -> vector<8x64xf32>
    %477 = arith.addf %471, %476 : vector<8x64xf32>
    %c24 = arith.constant 24 : index
    %c0_535 = arith.constant 0 : index
    %c0_536 = arith.constant 0 : index
    %478 = vector.load %arg1[%c24, %c0_535, %c0_536] : memref<25x8x13xf32, #tpu.memory_space<vmem>>, vector<1x8x13xf32>
    %479 = vector.shape_cast %478 : vector<1x8x13xf32> to vector<8x13xf32>
    %c8_537 = arith.constant 8 : index
    %c0_538 = arith.constant 0 : index
    %c0_539 = arith.constant 0 : index
    %480 = vector.load %arg2[%c8_537, %c0_538, %c0_539] : memref<9x13x64xf32, #tpu.memory_space<vmem>>, vector<1x13x64xf32>
    %481 = vector.shape_cast %480 : vector<1x13x64xf32> to vector<13x64xf32>
    %cst_540 = arith.constant dense<0.000000e+00> : vector<8x64xf32>
    %482 = tpu.matmul %479, %481, %cst_540 {dimension_numbers = #tpu.dot_dimension_numbers<[1], [0], [0], [1], [0, 0, 1, 1], [], []>} : vector<8x13xf32>, vector<13x64xf32>, vector<8x64xf32> -> vector<8x64xf32>
    %483 = arith.addf %477, %482 : vector<8x64xf32>
    %484 = arith.maximumf %430, %483 : vector<8x64xf32>
    %c0_541 = arith.constant 0 : index
    %c0_542 = arith.constant 0 : index
    %c0_543 = arith.constant 0 : index
    %485 = vector.load %arg1[%c0_541, %c0_542, %c0_543] : memref<25x8x13xf32, #tpu.memory_space<vmem>>, vector<1x8x13xf32>
    %486 = vector.shape_cast %485 : vector<1x8x13xf32> to vector<8x13xf32>
    %c0_544 = arith.constant 0 : index
    %c0_545 = arith.constant 0 : index
    %487 = vector.load %arg3[%c0_544, %c0_545] : memref<13x64xf32, #tpu.memory_space<vmem>>, vector<13x64xf32>
    %cst_546 = arith.constant dense<0.000000e+00> : vector<8x64xf32>
    %488 = tpu.matmul %486, %487, %cst_546 {dimension_numbers = #tpu.dot_dimension_numbers<[1], [0], [0], [1], [0, 0, 1, 1], [], []>} : vector<8x13xf32>, vector<13x64xf32>, vector<8x64xf32> -> vector<8x64xf32>
    %c1_547 = arith.constant 1 : index
    %c0_548 = arith.constant 0 : index
    %c0_549 = arith.constant 0 : index
    %489 = vector.load %arg1[%c1_547, %c0_548, %c0_549] : memref<25x8x13xf32, #tpu.memory_space<vmem>>, vector<1x8x13xf32>
    %490 = vector.shape_cast %489 : vector<1x8x13xf32> to vector<8x13xf32>
    %c0_550 = arith.constant 0 : index
    %c0_551 = arith.constant 0 : index
    %491 = vector.load %arg3[%c0_550, %c0_551] : memref<13x64xf32, #tpu.memory_space<vmem>>, vector<13x64xf32>
    %cst_552 = arith.constant dense<0.000000e+00> : vector<8x64xf32>
    %492 = tpu.matmul %490, %491, %cst_552 {dimension_numbers = #tpu.dot_dimension_numbers<[1], [0], [0], [1], [0, 0, 1, 1], [], []>} : vector<8x13xf32>, vector<13x64xf32>, vector<8x64xf32> -> vector<8x64xf32>
    %493 = arith.maximumf %488, %492 : vector<8x64xf32>
    %c2_553 = arith.constant 2 : index
    %c0_554 = arith.constant 0 : index
    %c0_555 = arith.constant 0 : index
    %494 = vector.load %arg1[%c2_553, %c0_554, %c0_555] : memref<25x8x13xf32, #tpu.memory_space<vmem>>, vector<1x8x13xf32>
    %495 = vector.shape_cast %494 : vector<1x8x13xf32> to vector<8x13xf32>
    %c0_556 = arith.constant 0 : index
    %c0_557 = arith.constant 0 : index
    %496 = vector.load %arg3[%c0_556, %c0_557] : memref<13x64xf32, #tpu.memory_space<vmem>>, vector<13x64xf32>
    %cst_558 = arith.constant dense<0.000000e+00> : vector<8x64xf32>
    %497 = tpu.matmul %495, %496, %cst_558 {dimension_numbers = #tpu.dot_dimension_numbers<[1], [0], [0], [1], [0, 0, 1, 1], [], []>} : vector<8x13xf32>, vector<13x64xf32>, vector<8x64xf32> -> vector<8x64xf32>
    %498 = arith.maximumf %493, %497 : vector<8x64xf32>
    %c3_559 = arith.constant 3 : index
    %c0_560 = arith.constant 0 : index
    %c0_561 = arith.constant 0 : index
    %499 = vector.load %arg1[%c3_559, %c0_560, %c0_561] : memref<25x8x13xf32, #tpu.memory_space<vmem>>, vector<1x8x13xf32>
    %500 = vector.shape_cast %499 : vector<1x8x13xf32> to vector<8x13xf32>
    %c0_562 = arith.constant 0 : index
    %c0_563 = arith.constant 0 : index
    %501 = vector.load %arg3[%c0_562, %c0_563] : memref<13x64xf32, #tpu.memory_space<vmem>>, vector<13x64xf32>
    %cst_564 = arith.constant dense<0.000000e+00> : vector<8x64xf32>
    %502 = tpu.matmul %500, %501, %cst_564 {dimension_numbers = #tpu.dot_dimension_numbers<[1], [0], [0], [1], [0, 0, 1, 1], [], []>} : vector<8x13xf32>, vector<13x64xf32>, vector<8x64xf32> -> vector<8x64xf32>
    %503 = arith.maximumf %498, %502 : vector<8x64xf32>
    %c4_565 = arith.constant 4 : index
    %c0_566 = arith.constant 0 : index
    %c0_567 = arith.constant 0 : index
    %504 = vector.load %arg1[%c4_565, %c0_566, %c0_567] : memref<25x8x13xf32, #tpu.memory_space<vmem>>, vector<1x8x13xf32>
    %505 = vector.shape_cast %504 : vector<1x8x13xf32> to vector<8x13xf32>
    %c0_568 = arith.constant 0 : index
    %c0_569 = arith.constant 0 : index
    %506 = vector.load %arg3[%c0_568, %c0_569] : memref<13x64xf32, #tpu.memory_space<vmem>>, vector<13x64xf32>
    %cst_570 = arith.constant dense<0.000000e+00> : vector<8x64xf32>
    %507 = tpu.matmul %505, %506, %cst_570 {dimension_numbers = #tpu.dot_dimension_numbers<[1], [0], [0], [1], [0, 0, 1, 1], [], []>} : vector<8x13xf32>, vector<13x64xf32>, vector<8x64xf32> -> vector<8x64xf32>
    %508 = arith.maximumf %503, %507 : vector<8x64xf32>
    %c5_571 = arith.constant 5 : index
    %c0_572 = arith.constant 0 : index
    %c0_573 = arith.constant 0 : index
    %509 = vector.load %arg1[%c5_571, %c0_572, %c0_573] : memref<25x8x13xf32, #tpu.memory_space<vmem>>, vector<1x8x13xf32>
    %510 = vector.shape_cast %509 : vector<1x8x13xf32> to vector<8x13xf32>
    %c0_574 = arith.constant 0 : index
    %c0_575 = arith.constant 0 : index
    %511 = vector.load %arg3[%c0_574, %c0_575] : memref<13x64xf32, #tpu.memory_space<vmem>>, vector<13x64xf32>
    %cst_576 = arith.constant dense<0.000000e+00> : vector<8x64xf32>
    %512 = tpu.matmul %510, %511, %cst_576 {dimension_numbers = #tpu.dot_dimension_numbers<[1], [0], [0], [1], [0, 0, 1, 1], [], []>} : vector<8x13xf32>, vector<13x64xf32>, vector<8x64xf32> -> vector<8x64xf32>
    %513 = arith.maximumf %508, %512 : vector<8x64xf32>
    %c6_577 = arith.constant 6 : index
    %c0_578 = arith.constant 0 : index
    %c0_579 = arith.constant 0 : index
    %514 = vector.load %arg1[%c6_577, %c0_578, %c0_579] : memref<25x8x13xf32, #tpu.memory_space<vmem>>, vector<1x8x13xf32>
    %515 = vector.shape_cast %514 : vector<1x8x13xf32> to vector<8x13xf32>
    %c0_580 = arith.constant 0 : index
    %c0_581 = arith.constant 0 : index
    %516 = vector.load %arg3[%c0_580, %c0_581] : memref<13x64xf32, #tpu.memory_space<vmem>>, vector<13x64xf32>
    %cst_582 = arith.constant dense<0.000000e+00> : vector<8x64xf32>
    %517 = tpu.matmul %515, %516, %cst_582 {dimension_numbers = #tpu.dot_dimension_numbers<[1], [0], [0], [1], [0, 0, 1, 1], [], []>} : vector<8x13xf32>, vector<13x64xf32>, vector<8x64xf32> -> vector<8x64xf32>
    %518 = arith.maximumf %513, %517 : vector<8x64xf32>
    %c7_583 = arith.constant 7 : index
    %c0_584 = arith.constant 0 : index
    %c0_585 = arith.constant 0 : index
    %519 = vector.load %arg1[%c7_583, %c0_584, %c0_585] : memref<25x8x13xf32, #tpu.memory_space<vmem>>, vector<1x8x13xf32>
    %520 = vector.shape_cast %519 : vector<1x8x13xf32> to vector<8x13xf32>
    %c0_586 = arith.constant 0 : index
    %c0_587 = arith.constant 0 : index
    %521 = vector.load %arg3[%c0_586, %c0_587] : memref<13x64xf32, #tpu.memory_space<vmem>>, vector<13x64xf32>
    %cst_588 = arith.constant dense<0.000000e+00> : vector<8x64xf32>
    %522 = tpu.matmul %520, %521, %cst_588 {dimension_numbers = #tpu.dot_dimension_numbers<[1], [0], [0], [1], [0, 0, 1, 1], [], []>} : vector<8x13xf32>, vector<13x64xf32>, vector<8x64xf32> -> vector<8x64xf32>
    %523 = arith.maximumf %518, %522 : vector<8x64xf32>
    %c8_589 = arith.constant 8 : index
    %c0_590 = arith.constant 0 : index
    %c0_591 = arith.constant 0 : index
    %524 = vector.load %arg1[%c8_589, %c0_590, %c0_591] : memref<25x8x13xf32, #tpu.memory_space<vmem>>, vector<1x8x13xf32>
    %525 = vector.shape_cast %524 : vector<1x8x13xf32> to vector<8x13xf32>
    %c0_592 = arith.constant 0 : index
    %c0_593 = arith.constant 0 : index
    %526 = vector.load %arg3[%c0_592, %c0_593] : memref<13x64xf32, #tpu.memory_space<vmem>>, vector<13x64xf32>
    %cst_594 = arith.constant dense<0.000000e+00> : vector<8x64xf32>
    %527 = tpu.matmul %525, %526, %cst_594 {dimension_numbers = #tpu.dot_dimension_numbers<[1], [0], [0], [1], [0, 0, 1, 1], [], []>} : vector<8x13xf32>, vector<13x64xf32>, vector<8x64xf32> -> vector<8x64xf32>
    %528 = arith.maximumf %523, %527 : vector<8x64xf32>
    %c9_595 = arith.constant 9 : index
    %c0_596 = arith.constant 0 : index
    %c0_597 = arith.constant 0 : index
    %529 = vector.load %arg1[%c9_595, %c0_596, %c0_597] : memref<25x8x13xf32, #tpu.memory_space<vmem>>, vector<1x8x13xf32>
    %530 = vector.shape_cast %529 : vector<1x8x13xf32> to vector<8x13xf32>
    %c0_598 = arith.constant 0 : index
    %c0_599 = arith.constant 0 : index
    %531 = vector.load %arg3[%c0_598, %c0_599] : memref<13x64xf32, #tpu.memory_space<vmem>>, vector<13x64xf32>
    %cst_600 = arith.constant dense<0.000000e+00> : vector<8x64xf32>
    %532 = tpu.matmul %530, %531, %cst_600 {dimension_numbers = #tpu.dot_dimension_numbers<[1], [0], [0], [1], [0, 0, 1, 1], [], []>} : vector<8x13xf32>, vector<13x64xf32>, vector<8x64xf32> -> vector<8x64xf32>
    %533 = arith.maximumf %528, %532 : vector<8x64xf32>
    %c10_601 = arith.constant 10 : index
    %c0_602 = arith.constant 0 : index
    %c0_603 = arith.constant 0 : index
    %534 = vector.load %arg1[%c10_601, %c0_602, %c0_603] : memref<25x8x13xf32, #tpu.memory_space<vmem>>, vector<1x8x13xf32>
    %535 = vector.shape_cast %534 : vector<1x8x13xf32> to vector<8x13xf32>
    %c0_604 = arith.constant 0 : index
    %c0_605 = arith.constant 0 : index
    %536 = vector.load %arg3[%c0_604, %c0_605] : memref<13x64xf32, #tpu.memory_space<vmem>>, vector<13x64xf32>
    %cst_606 = arith.constant dense<0.000000e+00> : vector<8x64xf32>
    %537 = tpu.matmul %535, %536, %cst_606 {dimension_numbers = #tpu.dot_dimension_numbers<[1], [0], [0], [1], [0, 0, 1, 1], [], []>} : vector<8x13xf32>, vector<13x64xf32>, vector<8x64xf32> -> vector<8x64xf32>
    %538 = arith.maximumf %533, %537 : vector<8x64xf32>
    %c11_607 = arith.constant 11 : index
    %c0_608 = arith.constant 0 : index
    %c0_609 = arith.constant 0 : index
    %539 = vector.load %arg1[%c11_607, %c0_608, %c0_609] : memref<25x8x13xf32, #tpu.memory_space<vmem>>, vector<1x8x13xf32>
    %540 = vector.shape_cast %539 : vector<1x8x13xf32> to vector<8x13xf32>
    %c0_610 = arith.constant 0 : index
    %c0_611 = arith.constant 0 : index
    %541 = vector.load %arg3[%c0_610, %c0_611] : memref<13x64xf32, #tpu.memory_space<vmem>>, vector<13x64xf32>
    %cst_612 = arith.constant dense<0.000000e+00> : vector<8x64xf32>
    %542 = tpu.matmul %540, %541, %cst_612 {dimension_numbers = #tpu.dot_dimension_numbers<[1], [0], [0], [1], [0, 0, 1, 1], [], []>} : vector<8x13xf32>, vector<13x64xf32>, vector<8x64xf32> -> vector<8x64xf32>
    %543 = arith.maximumf %538, %542 : vector<8x64xf32>
    %c12_613 = arith.constant 12 : index
    %c0_614 = arith.constant 0 : index
    %c0_615 = arith.constant 0 : index
    %544 = vector.load %arg1[%c12_613, %c0_614, %c0_615] : memref<25x8x13xf32, #tpu.memory_space<vmem>>, vector<1x8x13xf32>
    %545 = vector.shape_cast %544 : vector<1x8x13xf32> to vector<8x13xf32>
    %c0_616 = arith.constant 0 : index
    %c0_617 = arith.constant 0 : index
    %546 = vector.load %arg3[%c0_616, %c0_617] : memref<13x64xf32, #tpu.memory_space<vmem>>, vector<13x64xf32>
    %cst_618 = arith.constant dense<0.000000e+00> : vector<8x64xf32>
    %547 = tpu.matmul %545, %546, %cst_618 {dimension_numbers = #tpu.dot_dimension_numbers<[1], [0], [0], [1], [0, 0, 1, 1], [], []>} : vector<8x13xf32>, vector<13x64xf32>, vector<8x64xf32> -> vector<8x64xf32>
    %548 = arith.maximumf %543, %547 : vector<8x64xf32>
    %c13_619 = arith.constant 13 : index
    %c0_620 = arith.constant 0 : index
    %c0_621 = arith.constant 0 : index
    %549 = vector.load %arg1[%c13_619, %c0_620, %c0_621] : memref<25x8x13xf32, #tpu.memory_space<vmem>>, vector<1x8x13xf32>
    %550 = vector.shape_cast %549 : vector<1x8x13xf32> to vector<8x13xf32>
    %c0_622 = arith.constant 0 : index
    %c0_623 = arith.constant 0 : index
    %551 = vector.load %arg3[%c0_622, %c0_623] : memref<13x64xf32, #tpu.memory_space<vmem>>, vector<13x64xf32>
    %cst_624 = arith.constant dense<0.000000e+00> : vector<8x64xf32>
    %552 = tpu.matmul %550, %551, %cst_624 {dimension_numbers = #tpu.dot_dimension_numbers<[1], [0], [0], [1], [0, 0, 1, 1], [], []>} : vector<8x13xf32>, vector<13x64xf32>, vector<8x64xf32> -> vector<8x64xf32>
    %553 = arith.maximumf %548, %552 : vector<8x64xf32>
    %c14_625 = arith.constant 14 : index
    %c0_626 = arith.constant 0 : index
    %c0_627 = arith.constant 0 : index
    %554 = vector.load %arg1[%c14_625, %c0_626, %c0_627] : memref<25x8x13xf32, #tpu.memory_space<vmem>>, vector<1x8x13xf32>
    %555 = vector.shape_cast %554 : vector<1x8x13xf32> to vector<8x13xf32>
    %c0_628 = arith.constant 0 : index
    %c0_629 = arith.constant 0 : index
    %556 = vector.load %arg3[%c0_628, %c0_629] : memref<13x64xf32, #tpu.memory_space<vmem>>, vector<13x64xf32>
    %cst_630 = arith.constant dense<0.000000e+00> : vector<8x64xf32>
    %557 = tpu.matmul %555, %556, %cst_630 {dimension_numbers = #tpu.dot_dimension_numbers<[1], [0], [0], [1], [0, 0, 1, 1], [], []>} : vector<8x13xf32>, vector<13x64xf32>, vector<8x64xf32> -> vector<8x64xf32>
    %558 = arith.maximumf %553, %557 : vector<8x64xf32>
    %c15_631 = arith.constant 15 : index
    %c0_632 = arith.constant 0 : index
    %c0_633 = arith.constant 0 : index
    %559 = vector.load %arg1[%c15_631, %c0_632, %c0_633] : memref<25x8x13xf32, #tpu.memory_space<vmem>>, vector<1x8x13xf32>
    %560 = vector.shape_cast %559 : vector<1x8x13xf32> to vector<8x13xf32>
    %c0_634 = arith.constant 0 : index
    %c0_635 = arith.constant 0 : index
    %561 = vector.load %arg3[%c0_634, %c0_635] : memref<13x64xf32, #tpu.memory_space<vmem>>, vector<13x64xf32>
    %cst_636 = arith.constant dense<0.000000e+00> : vector<8x64xf32>
    %562 = tpu.matmul %560, %561, %cst_636 {dimension_numbers = #tpu.dot_dimension_numbers<[1], [0], [0], [1], [0, 0, 1, 1], [], []>} : vector<8x13xf32>, vector<13x64xf32>, vector<8x64xf32> -> vector<8x64xf32>
    %563 = arith.maximumf %558, %562 : vector<8x64xf32>
    %c16_637 = arith.constant 16 : index
    %c0_638 = arith.constant 0 : index
    %c0_639 = arith.constant 0 : index
    %564 = vector.load %arg1[%c16_637, %c0_638, %c0_639] : memref<25x8x13xf32, #tpu.memory_space<vmem>>, vector<1x8x13xf32>
    %565 = vector.shape_cast %564 : vector<1x8x13xf32> to vector<8x13xf32>
    %c0_640 = arith.constant 0 : index
    %c0_641 = arith.constant 0 : index
    %566 = vector.load %arg3[%c0_640, %c0_641] : memref<13x64xf32, #tpu.memory_space<vmem>>, vector<13x64xf32>
    %cst_642 = arith.constant dense<0.000000e+00> : vector<8x64xf32>
    %567 = tpu.matmul %565, %566, %cst_642 {dimension_numbers = #tpu.dot_dimension_numbers<[1], [0], [0], [1], [0, 0, 1, 1], [], []>} : vector<8x13xf32>, vector<13x64xf32>, vector<8x64xf32> -> vector<8x64xf32>
    %568 = arith.maximumf %563, %567 : vector<8x64xf32>
    %c17_643 = arith.constant 17 : index
    %c0_644 = arith.constant 0 : index
    %c0_645 = arith.constant 0 : index
    %569 = vector.load %arg1[%c17_643, %c0_644, %c0_645] : memref<25x8x13xf32, #tpu.memory_space<vmem>>, vector<1x8x13xf32>
    %570 = vector.shape_cast %569 : vector<1x8x13xf32> to vector<8x13xf32>
    %c0_646 = arith.constant 0 : index
    %c0_647 = arith.constant 0 : index
    %571 = vector.load %arg3[%c0_646, %c0_647] : memref<13x64xf32, #tpu.memory_space<vmem>>, vector<13x64xf32>
    %cst_648 = arith.constant dense<0.000000e+00> : vector<8x64xf32>
    %572 = tpu.matmul %570, %571, %cst_648 {dimension_numbers = #tpu.dot_dimension_numbers<[1], [0], [0], [1], [0, 0, 1, 1], [], []>} : vector<8x13xf32>, vector<13x64xf32>, vector<8x64xf32> -> vector<8x64xf32>
    %573 = arith.maximumf %568, %572 : vector<8x64xf32>
    %c18_649 = arith.constant 18 : index
    %c0_650 = arith.constant 0 : index
    %c0_651 = arith.constant 0 : index
    %574 = vector.load %arg1[%c18_649, %c0_650, %c0_651] : memref<25x8x13xf32, #tpu.memory_space<vmem>>, vector<1x8x13xf32>
    %575 = vector.shape_cast %574 : vector<1x8x13xf32> to vector<8x13xf32>
    %c0_652 = arith.constant 0 : index
    %c0_653 = arith.constant 0 : index
    %576 = vector.load %arg3[%c0_652, %c0_653] : memref<13x64xf32, #tpu.memory_space<vmem>>, vector<13x64xf32>
    %cst_654 = arith.constant dense<0.000000e+00> : vector<8x64xf32>
    %577 = tpu.matmul %575, %576, %cst_654 {dimension_numbers = #tpu.dot_dimension_numbers<[1], [0], [0], [1], [0, 0, 1, 1], [], []>} : vector<8x13xf32>, vector<13x64xf32>, vector<8x64xf32> -> vector<8x64xf32>
    %578 = arith.maximumf %573, %577 : vector<8x64xf32>
    %c19_655 = arith.constant 19 : index
    %c0_656 = arith.constant 0 : index
    %c0_657 = arith.constant 0 : index
    %579 = vector.load %arg1[%c19_655, %c0_656, %c0_657] : memref<25x8x13xf32, #tpu.memory_space<vmem>>, vector<1x8x13xf32>
    %580 = vector.shape_cast %579 : vector<1x8x13xf32> to vector<8x13xf32>
    %c0_658 = arith.constant 0 : index
    %c0_659 = arith.constant 0 : index
    %581 = vector.load %arg3[%c0_658, %c0_659] : memref<13x64xf32, #tpu.memory_space<vmem>>, vector<13x64xf32>
    %cst_660 = arith.constant dense<0.000000e+00> : vector<8x64xf32>
    %582 = tpu.matmul %580, %581, %cst_660 {dimension_numbers = #tpu.dot_dimension_numbers<[1], [0], [0], [1], [0, 0, 1, 1], [], []>} : vector<8x13xf32>, vector<13x64xf32>, vector<8x64xf32> -> vector<8x64xf32>
    %583 = arith.maximumf %578, %582 : vector<8x64xf32>
    %c20_661 = arith.constant 20 : index
    %c0_662 = arith.constant 0 : index
    %c0_663 = arith.constant 0 : index
    %584 = vector.load %arg1[%c20_661, %c0_662, %c0_663] : memref<25x8x13xf32, #tpu.memory_space<vmem>>, vector<1x8x13xf32>
    %585 = vector.shape_cast %584 : vector<1x8x13xf32> to vector<8x13xf32>
    %c0_664 = arith.constant 0 : index
    %c0_665 = arith.constant 0 : index
    %586 = vector.load %arg3[%c0_664, %c0_665] : memref<13x64xf32, #tpu.memory_space<vmem>>, vector<13x64xf32>
    %cst_666 = arith.constant dense<0.000000e+00> : vector<8x64xf32>
    %587 = tpu.matmul %585, %586, %cst_666 {dimension_numbers = #tpu.dot_dimension_numbers<[1], [0], [0], [1], [0, 0, 1, 1], [], []>} : vector<8x13xf32>, vector<13x64xf32>, vector<8x64xf32> -> vector<8x64xf32>
    %588 = arith.maximumf %583, %587 : vector<8x64xf32>
    %c21_667 = arith.constant 21 : index
    %c0_668 = arith.constant 0 : index
    %c0_669 = arith.constant 0 : index
    %589 = vector.load %arg1[%c21_667, %c0_668, %c0_669] : memref<25x8x13xf32, #tpu.memory_space<vmem>>, vector<1x8x13xf32>
    %590 = vector.shape_cast %589 : vector<1x8x13xf32> to vector<8x13xf32>
    %c0_670 = arith.constant 0 : index
    %c0_671 = arith.constant 0 : index
    %591 = vector.load %arg3[%c0_670, %c0_671] : memref<13x64xf32, #tpu.memory_space<vmem>>, vector<13x64xf32>
    %cst_672 = arith.constant dense<0.000000e+00> : vector<8x64xf32>
    %592 = tpu.matmul %590, %591, %cst_672 {dimension_numbers = #tpu.dot_dimension_numbers<[1], [0], [0], [1], [0, 0, 1, 1], [], []>} : vector<8x13xf32>, vector<13x64xf32>, vector<8x64xf32> -> vector<8x64xf32>
    %593 = arith.maximumf %588, %592 : vector<8x64xf32>
    %c22_673 = arith.constant 22 : index
    %c0_674 = arith.constant 0 : index
    %c0_675 = arith.constant 0 : index
    %594 = vector.load %arg1[%c22_673, %c0_674, %c0_675] : memref<25x8x13xf32, #tpu.memory_space<vmem>>, vector<1x8x13xf32>
    %595 = vector.shape_cast %594 : vector<1x8x13xf32> to vector<8x13xf32>
    %c0_676 = arith.constant 0 : index
    %c0_677 = arith.constant 0 : index
    %596 = vector.load %arg3[%c0_676, %c0_677] : memref<13x64xf32, #tpu.memory_space<vmem>>, vector<13x64xf32>
    %cst_678 = arith.constant dense<0.000000e+00> : vector<8x64xf32>
    %597 = tpu.matmul %595, %596, %cst_678 {dimension_numbers = #tpu.dot_dimension_numbers<[1], [0], [0], [1], [0, 0, 1, 1], [], []>} : vector<8x13xf32>, vector<13x64xf32>, vector<8x64xf32> -> vector<8x64xf32>
    %598 = arith.maximumf %593, %597 : vector<8x64xf32>
    %c23_679 = arith.constant 23 : index
    %c0_680 = arith.constant 0 : index
    %c0_681 = arith.constant 0 : index
    %599 = vector.load %arg1[%c23_679, %c0_680, %c0_681] : memref<25x8x13xf32, #tpu.memory_space<vmem>>, vector<1x8x13xf32>
    %600 = vector.shape_cast %599 : vector<1x8x13xf32> to vector<8x13xf32>
    %c0_682 = arith.constant 0 : index
    %c0_683 = arith.constant 0 : index
    %601 = vector.load %arg3[%c0_682, %c0_683] : memref<13x64xf32, #tpu.memory_space<vmem>>, vector<13x64xf32>
    %cst_684 = arith.constant dense<0.000000e+00> : vector<8x64xf32>
    %602 = tpu.matmul %600, %601, %cst_684 {dimension_numbers = #tpu.dot_dimension_numbers<[1], [0], [0], [1], [0, 0, 1, 1], [], []>} : vector<8x13xf32>, vector<13x64xf32>, vector<8x64xf32> -> vector<8x64xf32>
    %603 = arith.maximumf %598, %602 : vector<8x64xf32>
    %c24_685 = arith.constant 24 : index
    %c0_686 = arith.constant 0 : index
    %c0_687 = arith.constant 0 : index
    %604 = vector.load %arg1[%c24_685, %c0_686, %c0_687] : memref<25x8x13xf32, #tpu.memory_space<vmem>>, vector<1x8x13xf32>
    %605 = vector.shape_cast %604 : vector<1x8x13xf32> to vector<8x13xf32>
    %c0_688 = arith.constant 0 : index
    %c0_689 = arith.constant 0 : index
    %606 = vector.load %arg3[%c0_688, %c0_689] : memref<13x64xf32, #tpu.memory_space<vmem>>, vector<13x64xf32>
    %cst_690 = arith.constant dense<0.000000e+00> : vector<8x64xf32>
    %607 = tpu.matmul %605, %606, %cst_690 {dimension_numbers = #tpu.dot_dimension_numbers<[1], [0], [0], [1], [0, 0, 1, 1], [], []>} : vector<8x13xf32>, vector<13x64xf32>, vector<8x64xf32> -> vector<8x64xf32>
    %608 = arith.maximumf %603, %607 : vector<8x64xf32>
    %609 = arith.addf %484, %608 : vector<8x64xf32>
    %c0_691 = arith.constant 0 : index
    %c0_692 = arith.constant 0 : index
    %610 = vector.load %arg4[%c0_691, %c0_692] : memref<1x64xf32, #tpu.memory_space<vmem>>, vector<1x64xf32>
    %611 = vector.broadcast %610 : vector<1x64xf32> to vector<8x64xf32>
    %612 = arith.addf %609, %611 : vector<8x64xf32>
    %c0_693 = arith.constant 0 : index
    %c0_694 = arith.constant 0 : index
    %613 = vector.load %arg5[%c0_693, %c0_694] : memref<8x64xf32, #tpu.memory_space<vmem>>, vector<8x64xf32>
    tpu.vector_store %arg5[%c0_693, %c0_694], %612 {strides = array<i32>} : memref<8x64xf32, #tpu.memory_space<vmem>>, vector<8x64xf32>,
    return
  }
  func.func @transform_0(%arg0: i32) -> (i32, i32, i32) {
    %c0_i32 = arith.constant 0 : i32
    %c0_i32_0 = arith.constant 0 : i32
    %c0_i32_1 = arith.constant 0 : i32
    return %c0_i32, %arg0, %c0_i32_0 : i32, i32, i32
  }
  func.func @transform_1(%arg0: i32) -> (i32, i32, i32) {
    %c0_i32 = arith.constant 0 : i32
    %c0_i32_0 = arith.constant 0 : i32
    %c0_i32_1 = arith.constant 0 : i32
    %c0_i32_2 = arith.constant 0 : i32
    return %c0_i32, %c0_i32_0, %c0_i32_1 : i32, i32, i32
  }
  func.func @transform_2(%arg0: i32) -> (i32, i32) {
    %c0_i32 = arith.constant 0 : i32
    %c0_i32_0 = arith.constant 0 : i32
    %c0_i32_1 = arith.constant 0 : i32
    return %c0_i32, %c0_i32_0 : i32, i32
  }
  func.func @transform_3(%arg0: i32) -> (i32, i32) {
    %c0_i32 = arith.constant 0 : i32
    %c0_i32_0 = arith.constant 0 : i32
    %c0_i32_1 = arith.constant 0 : i32
    return %c0_i32, %c0_i32_0 : i32, i32
  }
  func.func @transform_4(%arg0: i32) -> (i32, i32) {
    %c0_i32 = arith.constant 0 : i32
    %c0_i32_0 = arith.constant 0 : i32
    return %arg0, %c0_i32 : i32, i32
  }
}

</mosaic_0001>

<bundles_post_ra>
// kernel: wcrn_forward.3
= control target key start
LH: loop header
LB: loop body
LE: loop exit
PB: predicated region body
PF: predicated region fallthrough
CT: control target
= control target key end

     0   :  { %vm83_vm3 = vcmask 523264   ;;  %s357_s5 = inlined_call_operand.vmem [shape: f32[64,64], index: 5, kind: input, shape index: {}]   ;;  %s358_s2 = inlined_call_operand.vmem [shape: f32[1,64], index: 2, kind: input, shape index: {}]   ;;  %s359_s1 = inlined_call_operand.vmem [shape: f32[1,64], index: 1, kind: input, shape index: {}]   ;;  %s360_s7 = inlined_call_operand.vmem [shape: f32[64,64], index: 7, kind: input, shape index: {}]   ;;  %s361_s3 = inlined_call_operand.vmem [shape: f32[1,64], index: 3, kind: input, shape index: {}]   ;;  %s362_s4 = inlined_call_operand.vmem [shape: f32[1,64], index: 4, kind: input, shape index: {}]   ;;  %s363_s6 = inlined_call_operand.vmem [shape: f32[1,64], index: 6, kind: input, shape index: {}]   ;;  %s364_s0 = inlined_call_operand.vmem [shape: f32[8,64], index: 0, kind: input, shape index: {}]   ;;  %s365_s8 = inlined_call_operand.vmem [shape: f32[1,64], index: 8, kind: input, shape index: {}]   ;;  %s366_s9 = inlined_call_operand.vmem [shape: f32[64,128], index: 9, kind: input, shape index: {}]   ;;  %s367_s10 = inlined_call_operand.vmem [shape: f32[1,128], index: 10, kind: input, shape index: {}]   ;;  %s368_s11 = inlined_call_operand.vmem [shape: f32[8,128], index: 11, kind: output, shape index: {}]  }
   0x1   :  { %v78_v0 = vld [vmem:[%s357_s5 + $0x38] sm:$0xff]  ;;  %v77_v1 = vld [vmem:[%s357_s5 + $0x30] sm:$0xff]  ;;  %v76_v2 = vld [vmem:[%s357_s5 + $0x28] sm:$0xff] }
   0x2   :  { %95 = vmatpush.msra.mxu0 %v78_v0  ;;  %v44_v3 = vld [vmem:[%s358_s2] sm:$0x1]  ;;  %v115_v6 = vld [vmem:[%s360_s7 + $0x38] sm:$0xff]  ;;  %v114_v8 = vld [vmem:[%s360_s7 + $0x30] sm:$0xff] }
   0x3   :  { %v75_v4 = vld [vmem:[%s357_s5 + $0x20] sm:$0xff]  ;;  %v45_v5 = vadd.f32 1e-05, %v44_v3  ;;  %v74_v7 = vld [vmem:[%s357_s5 + $0x18] sm:$0xff]  ;;  %131 = vmatpush.msra.mxu1 %v115_v6  ;;  %v113_v9 = vld [vmem:[%s360_s7 + $0x28] sm:$0xff] }
   0x4   :  { %96 = vmatpush.msra.mxu0 %v77_v1  ;;  %v73_v10 = vld [vmem:[%s357_s5 + $0x10] sm:$0xff]  ;;  %v112_v11 = vld [vmem:[%s360_s7 + $0x20] sm:$0xff]  ;;  %v72_v12 = vld [vmem:[%s357_s5 + $0x8] sm:$0xff] }
   0x5   :  { %193 = vrsqrt.f32 %v45_v5  ;;  %132 = vmatpush.msra.mxu1 %v114_v8  ;;  %v111_v13 = vld [vmem:[%s360_s7 + $0x18] sm:$0xff]  ;;  %v71_v15 = vld [vmem:[%s357_s5] sm:$0xff]  ;;  %vm52_vm0 = vweird.f32 %v45_v5  ;;  %v110_v32 = vld [vmem:[%s360_s7 + $0x10] sm:$0xff] }
   0x6   :  { %97 = vmatpush.msra.mxu0 %v76_v2  ;;  %v187_v19 = vld [vmem:[%s359_s1] ss:$0 sm:$0xff]  ;;  %v109_v33 = vld [vmem:[%s360_s7 + $0x8] sm:$0xff]  ;;  %v151_v35 = vld [vmem:[%s366_s9 + $0x38] sm:$0xff] }
   0x7   :  { %133 = vmatpush.msra.mxu1 %v113_v9  ;;  %v38_v20 = vld [vmem:[%s364_s0] sm:$0xff]  ;;  %v150_v36 = vld [vmem:[%s366_s9 + $0x30] sm:$0xff]  ;;  %167 = vmatpush.msra.mxu2 %v151_v35  ;;  %v149_v37 = vld [vmem:[%s366_s9 + $0x28] sm:$0xff] }
   0x8   :  { %98 = vmatpush.msra.mxu0 %v75_v4  ;;  %v43_v23 = vsub.f32 %v38_v20, %v187_v19  ;;  %v188_v26 = vld [vmem:[%s361_s3] ss:$0 sm:$0xff]  ;;  %v147_v39 = vld [vmem:[%s366_s9 + $0x18] sm:$0xff]  ;;  %v146_v44 = vld [vmem:[%s366_s9 + $0x10] sm:$0xff] }
   0x9   :  { %134 = vmatpush.msra.mxu1 %v112_v11  ;;  %v189_v28 = vld [vmem:[%s362_s4] ss:$0 sm:$0xff]  ;;  %168 = vmatpush.msra.mxu2 %v150_v36  ;;  %v145_v45 = vld [vmem:[%s366_s9 + $0x8] sm:$0xff] }
   0xa   :  { %99 = vmatpush.msra.mxu0 %v74_v7  ;;  %v108_v34 = vld [vmem:[%s360_s7] sm:$0xff] }
   0xb   :  { %v194_v14 = vpop.eup %193  ;;  %135 = vmatpush.msra.mxu1 %v111_v13  ;;  %v148_v38 = vld [vmem:[%s366_s9 + $0x20] sm:$0xff]  ;;  %169 = vmatpush.msra.mxu2 %v149_v37 }
   0xc   :  { %100 = vmatpush.msra.mxu0 %v73_v10  ;;  %v47_v16 = vmul.f32 %v194_v14, %v45_v5  ;;  %vm53_vm1 = vweird.f32 %v194_v14  ;;  %v190_v40 = vld [vmem:[%s363_s6] ss:$0 sm:$0xff] }
   0xd   :  { %vm54_vm2 = vmor %vm52_vm0, %vm53_vm1  ;;  %136 = vmatpush.msra.mxu1 %v110_v32  ;;  %170 = vmatpush.msra.mxu2 %v148_v38  ;;  %v144_v46 = vld [vmem:[%s366_s9] sm:$0xff] }
   0xe   :  { %101 = vmatpush.msra.mxu0 %v72_v12  ;;  %v48_v17 = vmul.f32 %v194_v14, %v47_v16  ;;  %v191_v47 = vld [vmem:[%s365_s8] ss:$0 sm:$0xff] }
   0xf   :  { %137 = vmatpush.msra.mxu1 %v109_v33  ;;  %171 = vmatpush.msra.mxu2 %v147_v39  ;;  %v192_v51 = vld [vmem:[%s367_s10] ss:$0 sm:$0xff] }
  0x10   :  { %102 = vmatpush.msra.mxu0 %v71_v15  ;;  %v49_v18 = vmul.f32 0.5, %v48_v17 }
  0x11   :  { %138 = vmatpush.msra.mxu1 %v108_v34  ;;  %172 = vmatpush.msra.mxu2 %v146_v44 }
  0x12   :  { %v50_v21 = vsub.f32 1.5, %v49_v18 }
  0x13   :  { %173 = vmatpush.msra.mxu2 %v145_v45 }
  0x14   :  { %v51_v22 = vmul.f32 %v194_v14, %v50_v21 }
  0x15   :  { %174 = vmatpush.msra.mxu2 %v144_v46 }
  0x16   :  { %v55_v24 = vsel %vm54_vm2, %v194_v14, %v51_v22 }
  0x17   :  { %v57_v25 = vperm.slane %v55_v24, 0 }
  0x19   :  { %v59_v27 = vmul.f32 %v57_v25, %v43_v23 }
  0x1b   :  { %v64_v29 = vmul.f32 %v188_v26, %v59_v27 }
  0x1d   :  { %v69_v30 = vadd.f32 %v189_v28, %v64_v29 }
  0x1f   :  { %v70_v31 = vmax.f32 %v69_v30, 0.0 }
  0x21   :  { %184 = vmatmul.msk.f32.vlgmr.msra.gmra.mxu0 %vm83_vm3, %v70_v31 }
  0x9e   :  { %v104_v41 = vpop.f32.mrf.mxu0 }
  0x9f   :  { %v105_v42 = vadd.f32 %v190_v40, %v104_v41 }
  0xa1   :  { %v107_v43 = vmax.f32 %v105_v42, 0.0 }
  0xa3   :  { %185 = vmatmul.msk.f32.vlgmr.msra.gmra.mxu1 %vm83_vm3, %v107_v43 }
 0x120   :  { %v140_v48 = vpop.f32.mrf.mxu1 }
 0x121   :  { %v141_v49 = vadd.f32 %v191_v47, %v140_v48 }
 0x123   :  { %v143_v50 = vadd.f32 %v141_v49, %v38_v20 }
 0x125   :  { %186 = vmatmul.msk.f32.vlgmr.msra.gmra.mxu2 %vm83_vm3, %v143_v50 }
 0x1a8   :  { %v176_v52 = vpop.f32.mrf.mxu2 }
 0x1a9   :  { %v177_v53 = vadd.f32 %v192_v51, %v176_v52 }
 0x1ab   :  { %179 = vst [vmem:[%s368_s11] sm:$0xff] %v177_v53 }

// kernel: wcrn_forward.2
= control target key start
LH: loop header
LB: loop body
LE: loop exit
PB: predicated region body
PF: predicated region fallthrough
CT: control target
= control target key end

     0   :  { %vm29_vm0 = vcmask 1044480   ;;  %vm25_vm1 = vcmask 105472   ;;  %vm2422_vm2 = vcmask 523264   ;;  %s3479_s1 = inlined_call_operand.vmem [shape: f32[9,13,64], index: 1, kind: input, shape index: {}]   ;;  %s3480_s0 = inlined_call_operand.vmem [shape: f32[25,8,13], index: 0, kind: input, shape index: {}]   ;;  %s3481_s2 = inlined_call_operand.vmem [shape: f32[13,64], index: 2, kind: input, shape index: {}]   ;;  %s3482_s3 = inlined_call_operand.vmem [shape: f32[1,64], index: 3, kind: input, shape index: {}]   ;;  %s3483_s4 = inlined_call_operand.vmem [shape: f32[8,64], index: 4, kind: output, shape index: {}]  }
   0x1   :  { %v2709_v0 = vld [vmem:[%s3479_s1 + $0x18] sm:$0x1f]  ;;  %v2714_v1 = vld [vmem:[%s3479_s1 + $0x28] sm:$0x1f]  ;;  %v2728_v3 = vld [vmem:[%s3479_s1 + $0x10] sm:$0xff] }
   0x2   :  { %v2719_v2 = vld [vmem:[%s3479_s1 + $0x38] sm:$0x1f]  ;;  %2431 = vmatpush.msk.msra.mxu0 %vm29_vm0, %v2709_v0  ;;  %2438 = vmatpush.msk.msra.mxu2 %vm29_vm0, %v2714_v1  ;;  %v2733_v4 = vld [vmem:[%s3479_s1 + $0x8] sm:$0x1f]  ;;  %v2738_v5 = vld [vmem:[%s3479_s1 + $0x20] sm:$0xff] }
   0x3   :  { %2443 = vmatpush.msk.msra.mxu3 %vm29_vm0, %v2719_v2  ;;  %2433 = vmatpush.msk.msra.mxu1 %vm29_vm0, %v2733_v4  ;;  %v2747_v6 = vld [vmem:[%s3479_s1 + $0x30] sm:$0xff]  ;;  %v2752_v7 = vld [vmem:[%s3480_s0 + $0x8] sm:$0xff]  ;;  %v2774_v11 = vld [vmem:[%s3479_s1] sm:$0xff] }
   0x4   :  { %v2757_v8 = vld [vmem:[%s3480_s0 + $0x10] sm:$0xff]  ;;  %48 = vmatpush.msra.mxu0 %v2728_v3  ;;  %105 = vmatpush.msra.mxu2 %v2738_v5  ;;  %v2764_v9 = vld [vmem:[%s3480_s0 + $0x28] sm:$0xff]  ;;  %v2782_v12 = vld [vmem:[%s3480_s0] sm:$0xff] }
   0x5   :  { %v2769_v10 = vld [vmem:[%s3479_s1 + $0x68] sm:$0x1f]  ;;  %137 = vmatpush.msra.mxu3 %v2747_v6  ;;  %2432 = vmatmul.msk.f32.vlgmr.msra.gmra.mxu0 %vm25_vm1, %v2752_v7  ;;  %v2796_v14 = vld [vmem:[%s3479_s1 + $0x78] sm:$0x1f]  ;;  %v2809_v16 = vld [vmem:[%s3479_s1 + $0x60] sm:$0xff] }
   0x6   :  { %v2787_v13 = vld [vmem:[%s3479_s1 + $0x48] sm:$0x1f]  ;;  %2439 = vmatmul.msk.f32.vlgmr.msra.gmra.mxu2 %vm25_vm1, %v2757_v8  ;;  %2444 = vmatmul.msk.f32.vlgmr.msra.gmra.mxu3 %vm25_vm1, %v2764_v9  ;;  %v2801_v15 = vld [vmem:[%s3479_s1 + $0x58] sm:$0x1f]  ;;  %v2814_v17 = vld [vmem:[%s3479_s1 + $0x40] sm:$0xff] }
   0x7   :  { %2458 = vmatpush.msk.msrb.mxu2 %vm29_vm0, %v2769_v10  ;;  %74 = vmatpush.msra.mxu1 %v2774_v11  ;;  %v2823_v18 = vld [vmem:[%s3479_s1 + $0x70] sm:$0xff]  ;;  %v2837_v20 = vld [vmem:[%s3479_s1 + $0x88] sm:$0x1f]  ;;  %v2856_v23 = vld [vmem:[%s3480_s0 + $0x58] sm:$0xff] }
   0x8   :  { %2434 = vmatmul.msk.f32.vlgmr.msra.gmra.mxu1 %vm25_vm1, %v2782_v12  ;;  %2448 = vmatpush.msk.msrb.mxu0 %vm29_vm0, %v2787_v13  ;;  %v2828_v19 = vld [vmem:[%s3479_s1 + $0x50] sm:$0xff]  ;;  %v2867_v24 = vld [vmem:[%s3480_s0 + $0x38] sm:$0xff]  ;;  %v2874_v25 = vld [vmem:[%s3479_s1 + $0x80] sm:$0xff] }
   0x9   :  { %2463 = vmatpush.msk.msrb.mxu3 %vm29_vm0, %v2796_v14  ;;  %2453 = vmatpush.msk.msrb.mxu1 %vm29_vm0, %v2801_v15  ;;  %v2844_v21 = vld [vmem:[%s3480_s0 + $0x30] sm:$0xff]  ;;  %v2891_v26 = vld [vmem:[%s3480_s0 + $0x60] sm:$0xff]  ;;  %v2900_v27 = vld [vmem:[%s3480_s0 + $0x18] sm:$0xff] }
   0xa   :  { %233 = vmatpush.msrb.mxu2 %v2809_v16  ;;  %169 = vmatpush.msrb.mxu0 %v2814_v17  ;;  %v2851_v22 = vld [vmem:[%s3480_s0 + $0x50] sm:$0xff]  ;;  %v2931_v28 = vld [vmem:[%s3480_s0 + $0x40] sm:$0xff]  ;;  %v2960_v29 = vld [vmem:[%s3480_s0 + $0x68] sm:$0xff] }
   0xb   :  { %265 = vmatpush.msrb.mxu3 %v2823_v18  ;;  %201 = vmatpush.msrb.mxu1 %v2828_v19  ;;  %v2980_v30 = vld [vmem:[%s3480_s0 + $0x20] sm:$0xff]  ;;  %v2987_v31 = vld [vmem:[%s3480_s0 + $0x48] sm:$0xff]  ;;  %v3012_v32 = vld [vmem:[%s3480_s0 + $0x70] sm:$0xff] }
   0xc   :  { %2472 = vmatpush.msk.msra.mxu2 %vm29_vm0, %v2733_v4  ;;  %2468 = vmatpush.msk.msra.mxu0 %vm29_vm0, %v2837_v20  ;;  %v3057_v33 = vld [vmem:[%s3480_s0 + $0x80] sm:$0xff]  ;;  %v3062_v34 = vld [vmem:[%s3480_s0 + $0x88] sm:$0xff]  ;;  %v3070_v35 = vld [vmem:[%s3480_s0 + $0x78] sm:$0xff] }
   0xd   :  { %2449 = vmatmul.msk.f32.vlgmr.msrb.gmra.mxu0 %vm25_vm1, %v2844_v21  ;;  %2475 = vmatpush.msk.msra.mxu3 %vm29_vm0, %v2714_v1  ;;  %v3130_v36 = vld [vmem:[%s3480_s0 + $0x90] sm:$0xff]  ;;  %v3180_v37 = vld [vmem:[%s3480_s0 + $0x98] sm:$0xff]  ;;  %v3220_v38 = vld [vmem:[%s3480_s0 + $0xa0] sm:$0xff] }
   0xe   :  { %2459 = vmatmul.msk.f32.vlgmr.msrb.gmra.mxu2 %vm25_vm1, %v2851_v22  ;;  %2464 = vmatmul.msk.f32.vlgmr.msrb.gmra.mxu3 %vm25_vm1, %v2856_v23  ;;  %v3227_v39 = vld [vmem:[%s3480_s0 + $0xb0] sm:$0xff]  ;;  %v3235_v40 = vld [vmem:[%s3480_s0 + $0xa8] sm:$0xff]  ;;  %v3277_v48 = vld [vmem:[%s3480_s0 + $0xb8] sm:$0xff] }
   0xf   :  { %2470 = vmatpush.msk.msra.mxu1 %vm29_vm0, %v2709_v0  ;;  %338 = vmatpush.msra.mxu2 %v2774_v11  ;;  %v3303_v58 = vld [vmem:[%s3481_s2 + $0x8] sm:$0x1f]  ;;  %v3316_v61 = vld [vmem:[%s3481_s2] sm:$0xff] }
  0x10   :  { %2454 = vmatmul.msk.f32.vlgmr.msrb.gmra.mxu1 %vm25_vm1, %v2867_v24  ;;  %297 = vmatpush.msra.mxu0 %v2874_v25 }
  0x11   :  { %363 = vmatpush.msra.mxu3 %v2738_v5  ;;  %318 = vmatpush.msra.mxu1 %v2728_v3 }
  0x12   :  { %2482 = vmatpush.msk.msrb.mxu2 %vm29_vm0, %v2801_v15  ;;  %2477 = vmatpush.msk.msrb.mxu0 %vm29_vm0, %v2719_v2 }
  0x13   :  { %2484 = vmatpush.msk.msrb.mxu3 %vm29_vm0, %v2769_v10  ;;  %2479 = vmatpush.msk.msrb.mxu1 %vm29_vm0, %v2787_v13 }
  0x14   :  { %431 = vmatpush.msrb.mxu2 %v2828_v19  ;;  %384 = vmatpush.msrb.mxu0 %v2747_v6 }
  0x15   :  { %2469 = vmatmul.msk.f32.vlgmr.msra.gmra.mxu0 %vm25_vm1, %v2891_v26  ;;  %452 = vmatpush.msrb.mxu3 %v2809_v16 }
  0x16   :  { %2473 = vmatmul.msk.f32.vlgmr.msra.gmra.mxu2 %vm25_vm1, %v2752_v7  ;;  %2476 = vmatmul.msk.f32.vlgmr.msra.gmra.mxu3 %vm25_vm1, %v2900_v27 }
  0x17   :  { %405 = vmatpush.msrb.mxu1 %v2814_v17  ;;  %2491 = vmatpush.msk.msra.mxu2 %vm29_vm0, %v2709_v0 }
  0x18   :  { %2471 = vmatmul.msk.f32.vlgmr.msra.gmra.mxu1 %vm25_vm1, %v2757_v8  ;;  %2486 = vmatpush.msk.msra.mxu0 %vm29_vm0, %v2796_v14 }
  0x19   :  { %2493 = vmatpush.msk.msra.mxu3 %vm29_vm0, %v2733_v4  ;;  %2489 = vmatpush.msk.msra.mxu1 %vm29_vm0, %v2837_v20 }
  0x1a   :  { %521 = vmatpush.msra.mxu2 %v2728_v3  ;;  %473 = vmatpush.msra.mxu0 %v2823_v18 }
  0x1b   :  { %541 = vmatpush.msra.mxu3 %v2774_v11  ;;  %499 = vmatpush.msra.mxu1 %v2874_v25 }
  0x1d   :  { %2478 = vmatmul.msk.f32.vlgmr.msrb.gmra.mxu0 %vm25_vm1, %v2844_v21 }
  0x1e   :  { %2483 = vmatmul.msk.f32.vlgmr.msrb.gmra.mxu2 %vm25_vm1, %v2931_v28  ;;  %2485 = vmatmul.msk.f32.vlgmr.msrb.gmra.mxu3 %vm25_vm1, %v2856_v23 }
  0x1f   :  { %2500 = vmatpush.msk.msrb.mxu2 %vm29_vm0, %v2787_v13  ;;  %2496 = vmatpush.msk.msrb.mxu0 %vm29_vm0, %v2714_v1 }
  0x20   :  { %2480 = vmatmul.msk.f32.vlgmr.msrb.gmra.mxu1 %vm25_vm1, %v2867_v24  ;;  %2503 = vmatpush.msk.msrb.mxu3 %vm29_vm0, %v2801_v15 }
  0x21   :  { %2498 = vmatpush.msk.msrb.mxu1 %vm29_vm0, %v2719_v2  ;;  %608 = vmatpush.msrb.mxu2 %v2814_v17 }
  0x22   :  { %566 = vmatpush.msrb.mxu0 %v2738_v5  ;;  %634 = vmatpush.msrb.mxu3 %v2828_v19 }
  0x23   :  { %587 = vmatpush.msrb.mxu1 %v2747_v6 }
  0x25   :  { %2487 = vmatmul.msk.f32.vlgmr.msra.gmra.mxu0 %vm25_vm1, %v2891_v26 }
  0x26   :  { %2492 = vmatmul.msk.f32.vlgmr.msra.gmra.mxu2 %vm25_vm1, %v2900_v27  ;;  %2494 = vmatmul.msk.f32.vlgmr.msra.gmra.mxu3 %vm25_vm1, %v2757_v8 }
  0x27   :  { %2510 = vmatpush.msk.msra.mxu2 %vm29_vm0, %v2837_v20  ;;  %2505 = vmatpush.msk.msra.mxu0 %vm29_vm0, %v2769_v10 }
  0x28   :  { %2490 = vmatmul.msk.f32.vlgmr.msra.gmra.mxu1 %vm25_vm1, %v2960_v29  ;;  %2512 = vmatpush.msk.msra.mxu3 %vm29_vm0, %v2709_v0 }
  0x29   :  { %2507 = vmatpush.msk.msra.mxu1 %vm29_vm0, %v2796_v14  ;;  %702 = vmatpush.msra.mxu2 %v2874_v25 }
  0x2a   :  { %655 = vmatpush.msra.mxu0 %v2809_v16  ;;  %724 = vmatpush.msra.mxu3 %v2728_v3 }
  0x2b   :  { %676 = vmatpush.msra.mxu1 %v2823_v18 }
  0x2d   :  { %2497 = vmatmul.msk.f32.vlgmr.msrb.gmra.mxu0 %vm25_vm1, %v2980_v30 }
  0x2e   :  { %2501 = vmatmul.msk.f32.vlgmr.msrb.gmra.mxu2 %vm25_vm1, %v2931_v28  ;;  %2504 = vmatmul.msk.f32.vlgmr.msrb.gmra.mxu3 %vm25_vm1, %v2987_v31 }
  0x2f   :  { %2518 = vmatpush.msk.msrb.mxu2 %vm29_vm0, %v2719_v2  ;;  %2514 = vmatpush.msk.msrb.mxu0 %vm29_vm0, %v2733_v4 }
  0x30   :  { %2499 = vmatmul.msk.f32.vlgmr.msrb.gmra.mxu1 %vm25_vm1, %v2867_v24  ;;  %2520 = vmatpush.msk.msrb.mxu3 %vm29_vm0, %v2787_v13 }
  0x31   :  { %2516 = vmatpush.msk.msrb.mxu1 %vm29_vm0, %v2714_v1  ;;  %785 = vmatpush.msrb.mxu2 %v2747_v6 }
  0x32   :  { %744 = vmatpush.msrb.mxu0 %v2774_v11  ;;  %806 = vmatpush.msrb.mxu3 %v2814_v17 }
  0x33   :  { %764 = vmatpush.msrb.mxu1 %v2738_v5 }
  0x35   :  { %2506 = vmatmul.msk.f32.vlgmr.msra.gmra.mxu0 %vm25_vm1, %v2891_v26 }
  0x36   :  { %2511 = vmatmul.msk.f32.vlgmr.msra.gmra.mxu2 %vm25_vm1, %v3012_v32  ;;  %2513 = vmatmul.msk.f32.vlgmr.msra.gmra.mxu3 %vm25_vm1, %v2844_v21 }
  0x37   :  { %2528 = vmatpush.msk.msra.mxu2 %vm29_vm0, %v2796_v14  ;;  %2522 = vmatpush.msk.msra.mxu0 %vm29_vm0, %v2801_v15 }
  0x38   :  { %2508 = vmatmul.msk.f32.vlgmr.msra.gmra.mxu1 %vm25_vm1, %v2960_v29  ;;  %2531 = vmatpush.msk.msra.mxu3 %vm29_vm0, %v2837_v20 }
  0x39   :  { %2525 = vmatpush.msk.msra.mxu1 %vm29_vm0, %v2769_v10  ;;  %879 = vmatpush.msra.mxu2 %v2823_v18 }
  0x3a   :  { %827 = vmatpush.msra.mxu0 %v2828_v19  ;;  %905 = vmatpush.msra.mxu3 %v2874_v25 }
  0x3b   :  { %853 = vmatpush.msra.mxu1 %v2809_v16 }
  0x3d   :  { %2515 = vmatmul.msk.f32.vlgmr.msrb.gmra.mxu0 %vm25_vm1, %v2764_v9 }
  0x3e   :  { %2519 = vmatmul.msk.f32.vlgmr.msrb.gmra.mxu2 %vm25_vm1, %v2851_v22  ;;  %2521 = vmatmul.msk.f32.vlgmr.msrb.gmra.mxu3 %vm25_vm1, %v2856_v23 }
  0x3f   :  { %2537 = vmatpush.msk.msrb.mxu2 %vm29_vm0, %v2714_v1  ;;  %2533 = vmatpush.msk.msrb.mxu0 %vm29_vm0, %v2709_v0 }
  0x40   :  { %2517 = vmatmul.msk.f32.vlgmr.msrb.gmra.mxu1 %vm25_vm1, %v2867_v24  ;;  %2539 = vmatpush.msk.msrb.mxu3 %vm29_vm0, %v2719_v2 }
  0x41   :  { %2535 = vmatpush.msk.msrb.mxu1 %vm29_vm0, %v2733_v4  ;;  %967 = vmatpush.msrb.mxu2 %v2738_v5 }
  0x42   :  { %927 = vmatpush.msrb.mxu0 %v2728_v3  ;;  %988 = vmatpush.msrb.mxu3 %v2747_v6 }
  0x43   :  { %947 = vmatpush.msrb.mxu1 %v2774_v11 }
  0x45   :  { %2523 = vmatmul.msk.f32.vlgmr.msra.gmra.mxu0 %vm25_vm1, %v2891_v26 }
  0x46   :  { %2529 = vmatmul.msk.f32.vlgmr.msra.gmra.mxu2 %vm25_vm1, %v3057_v33  ;;  %2532 = vmatmul.msk.f32.vlgmr.msra.gmra.mxu3 %vm25_vm1, %v3062_v34 }
  0x47   :  { %2545 = vmatpush.msk.msra.mxu2 %vm29_vm0, %v2769_v10  ;;  %2541 = vmatpush.msk.msra.mxu0 %vm29_vm0, %v2787_v13 }
  0x48   :  { %2526 = vmatmul.msk.f32.vlgmr.msra.gmra.mxu1 %vm25_vm1, %v3070_v35  ;;  %2547 = vmatpush.msk.msra.mxu3 %vm29_vm0, %v2796_v14 }
  0x49   :  { %2543 = vmatpush.msk.msra.mxu1 %vm29_vm0, %v2801_v15  ;;  %1051 = vmatpush.msra.mxu2 %v2809_v16 }
  0x4a   :  { %1009 = vmatpush.msra.mxu0 %v2814_v17  ;;  %1072 = vmatpush.msra.mxu3 %v2823_v18 }
  0x4b   :  { %1030 = vmatpush.msra.mxu1 %v2828_v19 }
  0x4d   :  { %2534 = vmatmul.msk.f32.vlgmr.msrb.gmra.mxu0 %vm25_vm1, %v2867_v24 }
  0x4e   :  { %2538 = vmatmul.msk.f32.vlgmr.msrb.gmra.mxu2 %vm25_vm1, %v2931_v28  ;;  %2540 = vmatmul.msk.f32.vlgmr.msrb.gmra.mxu3 %vm25_vm1, %v2856_v23 }
  0x4f   :  { %2554 = vmatpush.msk.msrb.mxu2 %vm29_vm0, %v2733_v4  ;;  %2550 = vmatpush.msk.msrb.mxu0 %vm29_vm0, %v2837_v20 }
  0x50   :  { %2536 = vmatmul.msk.f32.vlgmr.msrb.gmra.mxu1 %vm25_vm1, %v2844_v21  ;;  %2556 = vmatpush.msk.msrb.mxu3 %vm29_vm0, %v2714_v1 }
  0x51   :  { %2552 = vmatpush.msk.msrb.mxu1 %vm29_vm0, %v2709_v0  ;;  %1140 = vmatpush.msrb.mxu2 %v2774_v11 }
  0x52   :  { %1098 = vmatpush.msrb.mxu0 %v2874_v25  ;;  %1160 = vmatpush.msrb.mxu3 %v2738_v5 }
  0x53   :  { %1120 = vmatpush.msrb.mxu1 %v2728_v3 }
  0x55   :  { %2542 = vmatmul.msk.f32.vlgmr.msra.gmra.mxu0 %vm25_vm1, %v2891_v26 }
  0x56   :  { %2546 = vmatmul.msk.f32.vlgmr.msra.gmra.mxu2 %vm25_vm1, %v3057_v33  ;;  %2548 = vmatmul.msk.f32.vlgmr.msra.gmra.mxu3 %vm25_vm1, %v3062_v34 }
  0x57   :  { %2562 = vmatpush.msk.msra.mxu2 %vm29_vm0, %v2801_v15  ;;  %2558 = vmatpush.msk.msra.mxu0 %vm29_vm0, %v2719_v2 }
  0x58   :  { %2544 = vmatmul.msk.f32.vlgmr.msra.gmra.mxu1 %vm25_vm1, %v2960_v29  ;;  %2564 = vmatpush.msk.msra.mxu3 %vm29_vm0, %v2769_v10 }
  0x59   :  { %2560 = vmatpush.msk.msra.mxu1 %vm29_vm0, %v2787_v13  ;;  %1223 = vmatpush.msra.mxu2 %v2828_v19 }
  0x5a   :  { %1181 = vmatpush.msra.mxu0 %v2747_v6  ;;  %1244 = vmatpush.msra.mxu3 %v2809_v16 }
  0x5b   :  { %1202 = vmatpush.msra.mxu1 %v2814_v17 }
  0x5d   :  { %2551 = vmatmul.msk.f32.vlgmr.msrb.gmra.mxu0 %vm25_vm1, %v3130_v36 }
  0x5e   :  { %2555 = vmatmul.msk.f32.vlgmr.msrb.gmra.mxu2 %vm25_vm1, %v2867_v24  ;;  %2557 = vmatmul.msk.f32.vlgmr.msrb.gmra.mxu3 %vm25_vm1, %v2987_v31 }
  0x5f   :  { %2571 = vmatpush.msk.msrb.mxu2 %vm29_vm0, %v2709_v0  ;;  %2566 = vmatpush.msk.msrb.mxu0 %vm29_vm0, %v2796_v14 }
  0x60   :  { %2553 = vmatmul.msk.f32.vlgmr.msrb.gmra.mxu1 %vm25_vm1, %v2931_v28  ;;  %2573 = vmatpush.msk.msrb.mxu3 %vm29_vm0, %v2733_v4 }
  0x61   :  { %2569 = vmatpush.msk.msrb.mxu1 %vm29_vm0, %v2837_v20  ;;  %1313 = vmatpush.msrb.mxu2 %v2728_v3 }
  0x62   :  { %1265 = vmatpush.msrb.mxu0 %v2823_v18  ;;  %1333 = vmatpush.msrb.mxu3 %v2774_v11 }
  0x63   :  { %1291 = vmatpush.msrb.mxu1 %v2874_v25 }
  0x65   :  { %2559 = vmatmul.msk.f32.vlgmr.msra.gmra.mxu0 %vm25_vm1, %v2891_v26 }
  0x66   :  { %2563 = vmatmul.msk.f32.vlgmr.msra.gmra.mxu2 %vm25_vm1, %v3012_v32  ;;  %2565 = vmatmul.msk.f32.vlgmr.msra.gmra.mxu3 %vm25_vm1, %v3062_v34 }
  0x67   :  { %2579 = vmatpush.msk.msra.mxu2 %vm29_vm0, %v2787_v13  ;;  %2575 = vmatpush.msk.msra.mxu0 %vm29_vm0, %v2714_v1 }
  0x68   :  { %2561 = vmatmul.msk.f32.vlgmr.msra.gmra.mxu1 %vm25_vm1, %v2960_v29  ;;  %2581 = vmatpush.msk.msra.mxu3 %vm29_vm0, %v2801_v15 }
  0x69   :  { %2577 = vmatpush.msk.msra.mxu1 %vm29_vm0, %v2719_v2  ;;  %1395 = vmatpush.msra.mxu2 %v2814_v17 }
  0x6a   :  { %1353 = vmatpush.msra.mxu0 %v2738_v5  ;;  %1416 = vmatpush.msra.mxu3 %v2828_v19 }
  0x6b   :  { %1374 = vmatpush.msra.mxu1 %v2747_v6 }
  0x6d   :  { %2567 = vmatmul.msk.f32.vlgmr.msrb.gmra.mxu0 %vm25_vm1, %v3130_v36 }
  0x6e   :  { %2572 = vmatmul.msk.f32.vlgmr.msrb.gmra.mxu2 %vm25_vm1, %v2856_v23  ;;  %2574 = vmatmul.msk.f32.vlgmr.msrb.gmra.mxu3 %vm25_vm1, %v2851_v22 }
  0x6f   :  { %2590 = vmatpush.msk.msrb.mxu2 %vm29_vm0, %v2837_v20  ;;  %2584 = vmatpush.msk.msrb.mxu0 %vm29_vm0, %v2769_v10 }
  0x70   :  { %2570 = vmatmul.msk.f32.vlgmr.msrb.gmra.mxu1 %vm25_vm1, %v3180_v37  ;;  %2592 = vmatpush.msk.msrb.mxu3 %vm29_vm0, %v2709_v0 }
  0x71   :  { %2587 = vmatpush.msk.msrb.mxu1 %vm29_vm0, %v2796_v14  ;;  %1494 = vmatpush.msrb.mxu2 %v2874_v25 }
  0x72   :  { %1442 = vmatpush.msrb.mxu0 %v2809_v16  ;;  %1516 = vmatpush.msrb.mxu3 %v2728_v3 }
  0x73   :  { %1468 = vmatpush.msrb.mxu1 %v2823_v18 }
  0x75   :  { %2576 = vmatmul.msk.f32.vlgmr.msra.gmra.mxu0 %vm25_vm1, %v2891_v26 }
  0x76   :  { %2580 = vmatmul.msk.f32.vlgmr.msra.gmra.mxu2 %vm25_vm1, %v3057_v33  ;;  %2582 = vmatmul.msk.f32.vlgmr.msra.gmra.mxu3 %vm25_vm1, %v3062_v34 }
  0x77   :  { %2598 = vmatpush.msk.msra.mxu2 %vm29_vm0, %v2719_v2  ;;  %2594 = vmatpush.msk.msra.mxu0 %vm29_vm0, %v2733_v4 }
  0x78   :  { %2578 = vmatmul.msk.f32.vlgmr.msra.gmra.mxu1 %vm25_vm1, %v3070_v35  ;;  %2600 = vmatpush.msk.msra.mxu3 %vm29_vm0, %v2787_v13 }
  0x79   :  { %2596 = vmatpush.msk.msra.mxu1 %vm29_vm0, %v2714_v1  ;;  %1577 = vmatpush.msra.mxu2 %v2747_v6 }
  0x7a   :  { %1536 = vmatpush.msra.mxu0 %v2774_v11  ;;  %1598 = vmatpush.msra.mxu3 %v2814_v17 }
  0x7b   :  { %1556 = vmatpush.msra.mxu1 %v2738_v5 }
  0x7d   :  { %2585 = vmatmul.msk.f32.vlgmr.msrb.gmra.mxu0 %vm25_vm1, %v3220_v38 }
  0x7e   :  { %2591 = vmatmul.msk.f32.vlgmr.msrb.gmra.mxu2 %vm25_vm1, %v3227_v39  ;;  %2593 = vmatmul.msk.f32.vlgmr.msrb.gmra.mxu3 %vm25_vm1, %v2891_v26 }
  0x7f   :  { %2606 = vmatpush.msk.msrb.mxu2 %vm29_vm0, %v2796_v14  ;;  %2602 = vmatpush.msk.msrb.mxu0 %vm29_vm0, %v2801_v15 }
  0x80   :  { %2588 = vmatmul.msk.f32.vlgmr.msrb.gmra.mxu1 %vm25_vm1, %v3235_v40  ;;  %2609 = vmatpush.msk.msrb.mxu3 %vm29_vm0, %v2837_v20 }
  0x81   :  { %2604 = vmatpush.msk.msrb.mxu1 %vm29_vm0, %v2769_v10  ;;  %1661 = vmatpush.msrb.mxu2 %v2823_v18 }
  0x82   :  { %v50_v41 = vpop.f32.mrf.mxu0  ;;  %1619 = vmatpush.msrb.mxu0 %v2828_v19  ;;  %1687 = vmatpush.msrb.mxu3 %v2874_v25 }
  0x83   :  { %1640 = vmatpush.msrb.mxu1 %v2809_v16 }
  0x85   :  { %v76_v42 = vpop.f32.mrf.mxu1  ;;  %2595 = vmatmul.msk.f32.vlgmr.msra.gmra.mxu0 %vm25_vm1, %v2856_v23 }
  0x86   :  { %2599 = vmatmul.msk.f32.vlgmr.msra.gmra.mxu2 %vm25_vm1, %v3057_v33  ;;  %2601 = vmatmul.msk.f32.vlgmr.msra.gmra.mxu3 %vm25_vm1, %v3062_v34  ;;  %v77_v43 = vadd.f32 %v76_v42, %v50_v41 }
  0x87   :  { %2615 = vmatpush.msk.msra.mxu2 %vm29_vm0, %v2714_v1  ;;  %2611 = vmatpush.msk.msra.mxu0 %vm29_vm0, %v2709_v0 }
  0x88   :  { %2597 = vmatmul.msk.f32.vlgmr.msra.gmra.mxu1 %vm25_vm1, %v2960_v29  ;;  %2617 = vmatpush.msk.msra.mxu3 %vm29_vm0, %v2719_v2 }
  0x89   :  { %v107_v44 = vpop.f32.mrf.mxu2  ;;  %v139_v45 = vpop.f32.mrf.mxu3  ;;  %2613 = vmatpush.msk.msra.mxu1 %vm29_vm0, %v2733_v4  ;;  %1749 = vmatpush.msra.mxu2 %v2738_v5 }
  0x8a   :  { %v110_v46 = vadd.f32 %v107_v44, %v77_v43  ;;  %v171_v47 = vpop.f32.mrf.mxu0  ;;  %1709 = vmatpush.msra.mxu0 %v2728_v3  ;;  %1770 = vmatpush.msra.mxu3 %v2747_v6 }
  0x8b   :  { %1729 = vmatpush.msra.mxu1 %v2774_v11 }
  0x8c   :  { %v142_v49 = vadd.f32 %v139_v45, %v110_v46 }
  0x8d   :  { %v203_v50 = vpop.f32.mrf.mxu1  ;;  %2603 = vmatmul.msk.f32.vlgmr.msrb.gmra.mxu0 %vm25_vm1, %v3130_v36 }
  0x8e   :  { %v174_v51 = vadd.f32 %v171_v47, %v142_v49  ;;  %2607 = vmatmul.msk.f32.vlgmr.msrb.gmra.mxu2 %vm25_vm1, %v3227_v39  ;;  %2610 = vmatmul.msk.f32.vlgmr.msrb.gmra.mxu3 %vm25_vm1, %v3277_v48 }
  0x8f   :  { %2623 = vmatpush.msk.msrb.mxu2 %vm29_vm0, %v2769_v10  ;;  %2619 = vmatpush.msk.msrb.mxu0 %vm29_vm0, %v2787_v13 }
  0x90   :  { %v206_v52 = vadd.f32 %v203_v50, %v174_v51  ;;  %2605 = vmatmul.msk.f32.vlgmr.msrb.gmra.mxu1 %vm25_vm1, %v3235_v40  ;;  %2625 = vmatpush.msk.msrb.mxu3 %vm29_vm0, %v2796_v14  ;;  %v3352_v14 = vld [vmem:[%s3480_s0 + $0xc0] sm:$0xff] }
  0x91   :  { %v235_v53 = vpop.f32.mrf.mxu2  ;;  %v267_v54 = vpop.f32.mrf.mxu3  ;;  %2621 = vmatpush.msk.msrb.mxu1 %vm29_vm0, %v2801_v15  ;;  %1833 = vmatpush.msrb.mxu2 %v2809_v16 }
  0x92   :  { %v238_v55 = vadd.f32 %v235_v53, %v206_v52  ;;  %v299_v56 = vpop.f32.mrf.mxu0  ;;  %1791 = vmatpush.msrb.mxu0 %v2814_v17  ;;  %1854 = vmatpush.msrb.mxu3 %v2823_v18 }
  0x93   :  { %1812 = vmatpush.msrb.mxu1 %v2828_v19 }
  0x94   :  { %v270_v57 = vadd.f32 %v267_v54, %v238_v55 }
  0x95   :  { %v320_v59 = vpop.f32.mrf.mxu1  ;;  %2612 = vmatmul.msk.f32.vlgmr.msra.gmra.mxu0 %vm25_vm1, %v2960_v29 }
  0x96   :  { %v3307_v60 = vadd.f32 %v299_v56, %v270_v57  ;;  %2616 = vmatmul.msk.f32.vlgmr.msra.gmra.mxu2 %vm25_vm1, %v3012_v32  ;;  %2618 = vmatmul.msk.f32.vlgmr.msra.gmra.mxu3 %vm25_vm1, %v3062_v34 }
  0x97   :  { %2632 = vmatpush.msk.msra.mxu2 %vm29_vm0, %v3303_v58  ;;  %2628 = vmatpush.msk.msra.mxu0 %vm29_vm0, %v2837_v20 }
  0x98   :  { %2614 = vmatmul.msk.f32.vlgmr.msra.gmra.mxu1 %vm25_vm1, %v2891_v26  ;;  %2634 = vmatpush.msk.msra.mxu3 %vm29_vm0, %v3303_v58 }
  0x99   :  { %v340_v62 = vpop.f32.mrf.mxu2  ;;  %v365_v63 = vpop.f32.mrf.mxu3  ;;  %2630 = vmatpush.msk.msra.mxu1 %vm29_vm0, %v3303_v58  ;;  %1927 = vmatpush.msra.mxu2 %v3316_v61 }
  0x9a   :  { %v341_v0 = vadd.f32 %v340_v62, %v320_v59  ;;  %v386_v1 = vpop.f32.mrf.mxu0  ;;  %1880 = vmatpush.msra.mxu0 %v2874_v25  ;;  %1948 = vmatpush.msra.mxu3 %v3316_v61 }
  0x9b   :  { %1907 = vmatpush.msra.mxu1 %v3316_v61 }
  0x9c   :  { %v368_v2 = vadd.f32 %v365_v63, %v341_v0 }
  0x9d   :  { %v407_v3 = vpop.f32.mrf.mxu1  ;;  %2620 = vmatmul.msk.f32.vlgmr.msrb.gmra.mxu0 %vm25_vm1, %v3130_v36 }
  0x9e   :  { %v389_v4 = vadd.f32 %v386_v1, %v368_v2  ;;  %2624 = vmatmul.msk.f32.vlgmr.msrb.gmra.mxu2 %vm25_vm1, %v3227_v39  ;;  %2626 = vmatmul.msk.f32.vlgmr.msrb.gmra.mxu3 %vm25_vm1, %v3277_v48 }
  0x9f   :  { %2640 = vmatpush.msk.msrb.mxu2 %vm29_vm0, %v3303_v58  ;;  %2636 = vmatpush.msk.msrb.mxu0 %vm29_vm0, %v3303_v58 }
  0xa0   :  { %v410_v5 = vadd.f32 %v407_v3, %v389_v4  ;;  %2622 = vmatmul.msk.f32.vlgmr.msrb.gmra.mxu1 %vm25_vm1, %v3180_v37  ;;  %2642 = vmatpush.msk.msrb.mxu3 %vm29_vm0, %v3303_v58 }
  0xa1   :  { %v433_v6 = vpop.f32.mrf.mxu2  ;;  %v454_v10 = vpop.f32.mrf.mxu3  ;;  %2638 = vmatpush.msk.msrb.mxu1 %vm29_vm0, %v3303_v58  ;;  %2011 = vmatpush.msrb.mxu2 %v3316_v61 }
  0xa2   :  { %v436_v11 = vadd.f32 %v433_v6, %v410_v5  ;;  %v475_v13 = vpop.f32.mrf.mxu0  ;;  %1969 = vmatpush.msrb.mxu0 %v3316_v61  ;;  %2032 = vmatpush.msrb.mxu3 %v3316_v61 }
  0xa3   :  { %1990 = vmatpush.msrb.mxu1 %v3316_v61 }
  0xa4   :  { %v457_v15 = vadd.f32 %v454_v10, %v436_v11 }
  0xa5   :  { %v501_v16 = vpop.f32.mrf.mxu1  ;;  %2629 = vmatmul.msk.f32.vlgmr.msra.gmra.mxu0 %vm25_vm1, %v3352_v14 }
  0xa6   :  { %v478_v17 = vadd.f32 %v475_v13, %v457_v15  ;;  %2633 = vmatmul.msk.f32.vlgmr.msra.gmra.mxu2 %vm25_vm1, %v2752_v7  ;;  %2635 = vmatmul.msk.f32.vlgmr.msra.gmra.mxu3 %vm25_vm1, %v2757_v8 }
  0xa7   :  { %2648 = vmatpush.msk.msra.mxu2 %vm29_vm0, %v3303_v58  ;;  %2644 = vmatpush.msk.msra.mxu0 %vm29_vm0, %v3303_v58 }
  0xa8   :  { %v504_v18 = vadd.f32 %v501_v16, %v478_v17  ;;  %2631 = vmatmul.msk.f32.vlgmr.msra.gmra.mxu1 %vm25_vm1, %v2782_v12  ;;  %2650 = vmatpush.msk.msra.mxu3 %vm29_vm0, %v3303_v58 }
  0xa9   :  { %v523_v19 = vpop.f32.mrf.mxu2  ;;  %v543_v20 = vpop.f32.mrf.mxu3  ;;  %2646 = vmatpush.msk.msra.mxu1 %vm29_vm0, %v3303_v58  ;;  %2095 = vmatpush.msra.mxu2 %v3316_v61 }
  0xaa   :  { %v505_v7 = vmax.f32 %v3307_v60, %v504_v18  ;;  %v544_v8 = vadd.f32 %v543_v20, %v523_v19  ;;  %v568_v25 = vpop.f32.mrf.mxu0  ;;  %2053 = vmatpush.msra.mxu0 %v3316_v61  ;;  %2116 = vmatpush.msra.mxu3 %v3316_v61 }
  0xab   :  { %2074 = vmatpush.msra.mxu1 %v3316_v61 }
  0xac   :  { %v571_v12 = vadd.f32 %v568_v25, %v544_v8 }
  0xad   :  { %v589_v41 = vpop.f32.mrf.mxu1  ;;  %2637 = vmatmul.msk.f32.vlgmr.msrb.gmra.mxu0 %vm25_vm1, %v2900_v27 }
  0xae   :  { %v592_v42 = vadd.f32 %v589_v41, %v571_v12  ;;  %2641 = vmatmul.msk.f32.vlgmr.msrb.gmra.mxu2 %vm25_vm1, %v2764_v9  ;;  %2643 = vmatmul.msk.f32.vlgmr.msrb.gmra.mxu3 %vm25_vm1, %v2844_v21 }
  0xaf   :  { %2656 = vmatpush.msk.msrb.mxu2 %vm29_vm0, %v3303_v58  ;;  %2652 = vmatpush.msk.msrb.mxu0 %vm29_vm0, %v3303_v58 }
  0xb0   :  { %2639 = vmatmul.msk.f32.vlgmr.msrb.gmra.mxu1 %vm25_vm1, %v2980_v30  ;;  %2658 = vmatpush.msk.msrb.mxu3 %vm29_vm0, %v3303_v58 }
  0xb1   :  { %v610_v27 = vpop.f32.mrf.mxu2  ;;  %v636_v43 = vpop.f32.mrf.mxu3  ;;  %2654 = vmatpush.msk.msrb.mxu1 %vm29_vm0, %v3303_v58  ;;  %2179 = vmatpush.msrb.mxu2 %v3316_v61 }
  0xb2   :  { %v613_v9 = vadd.f32 %v610_v27, %v592_v42  ;;  %v657_v21 = vpop.f32.mrf.mxu0  ;;  %2137 = vmatpush.msrb.mxu0 %v3316_v61  ;;  %2200 = vmatpush.msrb.mxu3 %v3316_v61 }
  0xb3   :  { %2158 = vmatpush.msrb.mxu1 %v3316_v61 }
  0xb4   :  { %v639_v44 = vadd.f32 %v636_v43, %v613_v9 }
  0xb5   :  { %v678_v30 = vpop.f32.mrf.mxu1  ;;  %2645 = vmatmul.msk.f32.vlgmr.msra.gmra.mxu0 %vm25_vm1, %v2867_v24 }
  0xb6   :  { %v660_v45 = vadd.f32 %v657_v21, %v639_v44  ;;  %2649 = vmatmul.msk.f32.vlgmr.msra.gmra.mxu2 %vm25_vm1, %v2987_v31  ;;  %2651 = vmatmul.msk.f32.vlgmr.msra.gmra.mxu3 %vm25_vm1, %v2851_v22 }
  0xb7   :  { %2664 = vmatpush.msk.msra.mxu2 %vm29_vm0, %v3303_v58  ;;  %2660 = vmatpush.msk.msra.mxu0 %vm29_vm0, %v3303_v58 }
  0xb8   :  { %v681_v46 = vadd.f32 %v678_v30, %v660_v45  ;;  %2647 = vmatmul.msk.f32.vlgmr.msra.gmra.mxu1 %vm25_vm1, %v2931_v28  ;;  %2666 = vmatpush.msk.msra.mxu3 %vm29_vm0, %v3303_v58 }
  0xb9   :  { %v704_v24 = vpop.f32.mrf.mxu2  ;;  %v726_v47 = vpop.f32.mrf.mxu3  ;;  %2662 = vmatpush.msk.msra.mxu1 %vm29_vm0, %v3303_v58  ;;  %2263 = vmatpush.msra.mxu2 %v3316_v61 }
  0xba   :  { %v707_v22 = vadd.f32 %v704_v24, %v681_v46  ;;  %v746_v31 = vpop.f32.mrf.mxu0  ;;  %2221 = vmatpush.msra.mxu0 %v3316_v61  ;;  %2284 = vmatpush.msra.mxu3 %v3316_v61 }
  0xbb   :  { %v747_v49 = vadd.f32 %v746_v31, %v726_v47  ;;  %2242 = vmatpush.msra.mxu1 %v3316_v61 }
  0xbc   :  { %v708_v28 = vmax.f32 %v505_v7, %v707_v22 }
  0xbd   :  { %v766_v50 = vpop.f32.mrf.mxu1  ;;  %2653 = vmatmul.msk.f32.vlgmr.msrb.gmra.mxu0 %vm25_vm1, %v2856_v23 }
  0xbe   :  { %v769_v51 = vadd.f32 %v766_v50, %v747_v49  ;;  %2657 = vmatmul.msk.f32.vlgmr.msrb.gmra.mxu2 %vm25_vm1, %v2960_v29  ;;  %2659 = vmatmul.msk.f32.vlgmr.msrb.gmra.mxu3 %vm25_vm1, %v3012_v32 }
  0xbf   :  { %2672 = vmatpush.msk.msrb.mxu2 %vm29_vm0, %v3303_v58  ;;  %2668 = vmatpush.msk.msrb.mxu0 %vm29_vm0, %v3303_v58 }
  0xc0   :  { %2655 = vmatmul.msk.f32.vlgmr.msrb.gmra.mxu1 %vm25_vm1, %v2891_v26  ;;  %2674 = vmatpush.msk.msrb.mxu3 %vm29_vm0, %v3303_v58 }
  0xc1   :  { %v787_v23 = vpop.f32.mrf.mxu2  ;;  %v808_v52 = vpop.f32.mrf.mxu3  ;;  %2670 = vmatpush.msk.msrb.mxu1 %vm29_vm0, %v3303_v58  ;;  %2347 = vmatpush.msrb.mxu2 %v3316_v61 }
  0xc2   :  { %v790_v29 = vadd.f32 %v787_v23, %v769_v51  ;;  %v829_v32 = vpop.f32.mrf.mxu0  ;;  %2305 = vmatpush.msrb.mxu0 %v3316_v61  ;;  %2368 = vmatpush.msrb.mxu3 %v3316_v61 }
  0xc3   :  { %2326 = vmatpush.msrb.mxu1 %v3316_v61 }
  0xc4   :  { %v811_v53 = vadd.f32 %v808_v52, %v790_v29 }
  0xc5   :  { %v855_v26 = vpop.f32.mrf.mxu1  ;;  %2661 = vmatmul.msk.f32.vlgmr.msra.gmra.mxu0 %vm25_vm1, %v3070_v35 }
  0xc6   :  { %v832_v54 = vadd.f32 %v829_v32, %v811_v53  ;;  %2665 = vmatmul.msk.f32.vlgmr.msra.gmra.mxu2 %vm25_vm1, %v3062_v34  ;;  %2667 = vmatmul.msk.f32.vlgmr.msra.gmra.mxu3 %vm25_vm1, %v3130_v36 }
  0xc7   :  { %2676 = vmatpush.msk.msra.mxu0 %vm29_vm0, %v3303_v58 }
  0xc8   :  { %v858_v55 = vadd.f32 %v855_v26, %v832_v54  ;;  %2663 = vmatmul.msk.f32.vlgmr.msra.gmra.mxu1 %vm25_vm1, %v3057_v33 }
  0xc9   :  { %v881_v56 = vpop.f32.mrf.mxu2  ;;  %v907_v57 = vpop.f32.mrf.mxu3  ;;  %2678 = vmatpush.msk.msra.mxu1 %vm29_vm0, %v3303_v58  ;;  %2389 = vmatpush.msra.mxu0 %v3316_v61 }
  0xca   :  { %v884_v35 = vadd.f32 %v881_v56, %v858_v55  ;;  %v929_v59 = vpop.f32.mrf.mxu0 }
  0xcb   :  { %2410 = vmatpush.msra.mxu1 %v3316_v61 }
  0xcc   :  { %v910_v34 = vadd.f32 %v907_v57, %v884_v35 }
  0xcd   :  { %v949_v36 = vpop.f32.mrf.mxu1  ;;  %2669 = vmatmul.msk.f32.vlgmr.msrb.gmra.mxu0 %vm25_vm1, %v3180_v37 }
  0xce   :  { %v911_v60 = vmax.f32 %v708_v28, %v910_v34  ;;  %v950_v62 = vadd.f32 %v949_v36, %v929_v59  ;;  %2673 = vmatmul.msk.f32.vlgmr.msrb.gmra.mxu2 %vm25_vm1, %v3235_v40  ;;  %2675 = vmatmul.msk.f32.vlgmr.msrb.gmra.mxu3 %vm25_vm1, %v3227_v39 }
  0xd0   :  { %2671 = vmatmul.msk.f32.vlgmr.msrb.gmra.mxu1 %vm25_vm1, %v3220_v38 }
  0xd1   :  { %v969_v33 = vpop.f32.mrf.mxu2  ;;  %v990_v58 = vpop.f32.mrf.mxu3 }
  0xd2   :  { %v972_v63 = vadd.f32 %v969_v33, %v950_v62  ;;  %v1011_v61 = vpop.f32.mrf.mxu0 }
  0xd4   :  { %v993_v0 = vadd.f32 %v990_v58, %v972_v63 }
  0xd5   :  { %v1032_v1 = vpop.f32.mrf.mxu1  ;;  %2677 = vmatmul.msk.f32.vlgmr.msra.gmra.mxu0 %vm25_vm1, %v3277_v48 }
  0xd6   :  { %v1014_v37 = vadd.f32 %v1011_v61, %v993_v0 }
  0xd8   :  { %v1035_v2 = vadd.f32 %v1032_v1, %v1014_v37  ;;  %2679 = vmatmul.msk.f32.vlgmr.msra.gmra.mxu1 %vm25_vm1, %v3352_v14 }
  0xd9   :  { %v1053_v40 = vpop.f32.mrf.mxu2  ;;  %v1074_v3 = vpop.f32.mrf.mxu3 }
  0xda   :  { %v1056_v39 = vadd.f32 %v1053_v40, %v1035_v2  ;;  %v1100_v4 = vpop.f32.mrf.mxu0 }
  0xdc   :  { %v1077_v5 = vadd.f32 %v1074_v3, %v1056_v39 }
  0xdd   :  { %v1122_v38 = vpop.f32.mrf.mxu1 }
  0xde   :  { %v1103_v6 = vadd.f32 %v1100_v4, %v1077_v5 }
  0xe0   :  { %v1104_v10 = vmax.f32 %v911_v60, %v1103_v6 }
  0xe1   :  { %v1142_v11 = vpop.f32.mrf.mxu2  ;;  %v1162_v13 = vpop.f32.mrf.mxu3 }
  0xe2   :  { %v1143_v15 = vadd.f32 %v1142_v11, %v1122_v38  ;;  %v1183_v16 = vpop.f32.mrf.mxu0 }
  0xe4   :  { %v1165_v17 = vadd.f32 %v1162_v13, %v1143_v15 }
  0xe5   :  { %v1204_v18 = vpop.f32.mrf.mxu1 }
  0xe6   :  { %v1186_v48 = vadd.f32 %v1183_v16, %v1165_v17 }
  0xe8   :  { %v1207_v19 = vadd.f32 %v1204_v18, %v1186_v48 }
  0xe9   :  { %v1225_v20 = vpop.f32.mrf.mxu2  ;;  %v1246_v7 = vpop.f32.mrf.mxu3 }
  0xea   :  { %v1228_v8 = vadd.f32 %v1225_v20, %v1207_v19  ;;  %v1267_v14 = vpop.f32.mrf.mxu0 }
  0xec   :  { %v1249_v25 = vadd.f32 %v1246_v7, %v1228_v8 }
  0xed   :  { %v1293_v12 = vpop.f32.mrf.mxu1 }
  0xee   :  { %v1270_v41 = vadd.f32 %v1267_v14, %v1249_v25 }
  0xf0   :  { %v1296_v42 = vadd.f32 %v1293_v12, %v1270_v41 }
  0xf1   :  { %v1315_v27 = vpop.f32.mrf.mxu2  ;;  %v1335_v43 = vpop.f32.mrf.mxu3 }
  0xf2   :  { %v1297_v9 = vmax.f32 %v1104_v10, %v1296_v42  ;;  %v1336_v21 = vadd.f32 %v1335_v43, %v1315_v27  ;;  %v1355_v44 = vpop.f32.mrf.mxu0 }
  0xf4   :  { %v1358_v30 = vadd.f32 %v1355_v44, %v1336_v21 }
  0xf5   :  { %v1376_v45 = vpop.f32.mrf.mxu1 }
  0xf6   :  { %v1379_v46 = vadd.f32 %v1376_v45, %v1358_v30 }
  0xf9   :  { %v1397_v24 = vpop.f32.mrf.mxu2  ;;  %v1418_v47 = vpop.f32.mrf.mxu3 }
  0xfa   :  { %v1400_v22 = vadd.f32 %v1397_v24, %v1379_v46  ;;  %v1444_v31 = vpop.f32.mrf.mxu0 }
  0xfc   :  { %v1421_v49 = vadd.f32 %v1418_v47, %v1400_v22 }
  0xfd   :  { %v1470_v28 = vpop.f32.mrf.mxu1 }
  0xfe   :  { %v1447_v50 = vadd.f32 %v1444_v31, %v1421_v49 }
 0x100   :  { %v1473_v51 = vadd.f32 %v1470_v28, %v1447_v50 }
 0x101   :  { %v1496_v23 = vpop.f32.mrf.mxu2  ;;  %v1518_v52 = vpop.f32.mrf.mxu3 }
 0x102   :  { %v1499_v29 = vadd.f32 %v1496_v23, %v1473_v51  ;;  %v1538_v32 = vpop.f32.mrf.mxu0 }
 0x103   :  { %v1539_v53 = vadd.f32 %v1538_v32, %v1518_v52 }
 0x104   :  { %v3464_v26 = vmax.f32 %v1297_v9, %v1499_v29 }
 0x105   :  { %v1558_v54 = vpop.f32.mrf.mxu1 }
 0x106   :  { %v1561_v55 = vadd.f32 %v1558_v54, %v1539_v53 }
 0x109   :  { %v1579_v56 = vpop.f32.mrf.mxu2  ;;  %v1600_v57 = vpop.f32.mrf.mxu3 }
 0x10a   :  { %v1582_v35 = vadd.f32 %v1579_v56, %v1561_v55  ;;  %v1621_v59 = vpop.f32.mrf.mxu0 }
 0x10c   :  { %v1603_v34 = vadd.f32 %v1600_v57, %v1582_v35 }
 0x10d   :  { %v1642_v36 = vpop.f32.mrf.mxu1 }
 0x10e   :  { %v1624_v60 = vadd.f32 %v1621_v59, %v1603_v34 }
 0x110   :  { %v1645_v62 = vadd.f32 %v1642_v36, %v1624_v60 }
 0x111   :  { %v1663_v33 = vpop.f32.mrf.mxu2  ;;  %v1689_v58 = vpop.f32.mrf.mxu3 }
 0x112   :  { %v1666_v63 = vadd.f32 %v1663_v33, %v1645_v62  ;;  %v1711_v61 = vpop.f32.mrf.mxu0 }
 0x114   :  { %v3466_v0 = vadd.f32 %v1689_v58, %v1666_v63 }
 0x115   :  { %v1731_v1 = vpop.f32.mrf.mxu1 }
 0x116   :  { %v1693_v37 = vmax.f32 %v3464_v26, %v3466_v0  ;;  %v1732_v43 = vadd.f32 %v1731_v1, %v1711_v61 }
 0x119   :  { %v1751_v2 = vpop.f32.mrf.mxu2  ;;  %v1772_v40 = vpop.f32.mrf.mxu3 }
 0x11a   :  { %v1793_v3 = vpop.f32.mrf.mxu0  ;;  %v1754_v44 = vadd.f32 %v1751_v2, %v1732_v43 }
 0x11c   :  { %v1775_v24 = vadd.f32 %v1772_v40, %v1754_v44 }
 0x11d   :  { %v1814_v39 = vpop.f32.mrf.mxu1 }
 0x11e   :  { %v1796_v50 = vadd.f32 %v1793_v3, %v1775_v24 }
 0x120   :  { %v1817_v29 = vadd.f32 %v1814_v39, %v1796_v50 }
 0x121   :  { %v1835_v4 = vpop.f32.mrf.mxu2  ;;  %v1856_v5 = vpop.f32.mrf.mxu3 }
 0x122   :  { %v1882_v38 = vpop.f32.mrf.mxu0  ;;  %v1838_v57 = vadd.f32 %v1835_v4, %v1817_v29  ;;  %v2680_v4 = vld [vmem:[%s3482_s3] ss:$0 sm:$0xff] }
 0x124   :  { %v1859_v36 = vadd.f32 %v1856_v5, %v1838_v57 }
 0x125   :  { %v1909_v6 = vpop.f32.mrf.mxu1 }
 0x126   :  { %v1885_v61 = vadd.f32 %v1882_v38, %v1859_v36 }
 0x128   :  { %v1886_v3 = vmax.f32 %v1693_v37, %v1885_v61 }
 0x129   :  { %v1929_v10 = vpop.f32.mrf.mxu2  ;;  %v1950_v11 = vpop.f32.mrf.mxu3 }
 0x12a   :  { %v1932_v13 = vmax.f32 %v1909_v6, %v1929_v10  ;;  %v1971_v15 = vpop.f32.mrf.mxu0 }
 0x12c   :  { %v1953_v16 = vmax.f32 %v1932_v13, %v1950_v11 }
 0x12d   :  { %v1992_v17 = vpop.f32.mrf.mxu1 }
 0x12e   :  { %v1974_v18 = vmax.f32 %v1953_v16, %v1971_v15 }
 0x130   :  { %v1995_v48 = vmax.f32 %v1974_v18, %v1992_v17 }
 0x131   :  { %v2013_v19 = vpop.f32.mrf.mxu2  ;;  %v2034_v20 = vpop.f32.mrf.mxu3 }
 0x132   :  { %v2016_v7 = vmax.f32 %v1995_v48, %v2013_v19  ;;  %v2055_v8 = vpop.f32.mrf.mxu0 }
 0x134   :  { %v2037_v14 = vmax.f32 %v2016_v7, %v2034_v20 }
 0x135   :  { %v2076_v25 = vpop.f32.mrf.mxu1 }
 0x136   :  { %v2058_v12 = vmax.f32 %v2037_v14, %v2055_v8 }
 0x138   :  { %v2079_v41 = vmax.f32 %v2058_v12, %v2076_v25 }
 0x139   :  { %v2097_v42 = vpop.f32.mrf.mxu2  ;;  %v2118_v27 = vpop.f32.mrf.mxu3 }
 0x13a   :  { %v2100_v9 = vmax.f32 %v2079_v41, %v2097_v42  ;;  %v2139_v21 = vpop.f32.mrf.mxu0 }
 0x13c   :  { %v2121_v30 = vmax.f32 %v2100_v9, %v2118_v27 }
 0x13d   :  { %v2160_v45 = vpop.f32.mrf.mxu1 }
 0x13e   :  { %v2142_v46 = vmax.f32 %v2121_v30, %v2139_v21 }
 0x140   :  { %v2163_v47 = vmax.f32 %v2142_v46, %v2160_v45 }
 0x141   :  { %v2181_v22 = vpop.f32.mrf.mxu2  ;;  %v2202_v31 = vpop.f32.mrf.mxu3 }
 0x142   :  { %v2184_v49 = vmax.f32 %v2163_v47, %v2181_v22  ;;  %v2223_v28 = vpop.f32.mrf.mxu0 }
 0x144   :  { %v2205_v51 = vmax.f32 %v2184_v49, %v2202_v31 }
 0x145   :  { %v2244_v23 = vpop.f32.mrf.mxu1 }
 0x146   :  { %v2226_v52 = vmax.f32 %v2205_v51, %v2223_v28 }
 0x148   :  { %v2247_v32 = vmax.f32 %v2226_v52, %v2244_v23 }
 0x149   :  { %v2265_v53 = vpop.f32.mrf.mxu2  ;;  %v2286_v54 = vpop.f32.mrf.mxu3 }
 0x14a   :  { %v2268_v55 = vmax.f32 %v2247_v32, %v2265_v53  ;;  %v2307_v56 = vpop.f32.mrf.mxu0 }
 0x14c   :  { %v2289_v35 = vmax.f32 %v2268_v55, %v2286_v54 }
 0x14d   :  { %v2328_v59 = vpop.f32.mrf.mxu1 }
 0x14e   :  { %v2310_v34 = vmax.f32 %v2289_v35, %v2307_v56 }
 0x150   :  { %v2331_v60 = vmax.f32 %v2310_v34, %v2328_v59 }
 0x151   :  { %v2349_v62 = vpop.f32.mrf.mxu2  ;;  %v2370_v33 = vpop.f32.mrf.mxu3 }
 0x152   :  { %v2352_v58 = vmax.f32 %v2331_v60, %v2349_v62  ;;  %v2391_v63 = vpop.f32.mrf.mxu0 }
 0x154   :  { %v2373_v1 = vmax.f32 %v2352_v58, %v2370_v33 }
 0x155   :  { %v2412_v2 = vpop.f32.mrf.mxu1 }
 0x156   :  { %v2394_v40 = vmax.f32 %v2373_v1, %v2391_v63 }
 0x158   :  { %v2415_v39 = vmax.f32 %v2394_v40, %v2412_v2 }
 0x15a   :  { %v2416_v6 = vadd.f32 %v2415_v39, %v1886_v3 }
 0x15c   :  { %v2421_v5 = vadd.f32 %v2680_v4, %v2416_v6 }
 0x15e   :  { %2423 = vst.msk [vmem:[%s3483_s4] sm:$0xff] %vm2422_vm2, %v2421_v5 }

</bundles_post_ra>
